<compile_context>
chip_gen: v7x
topology: tpu7x:2x2x1
jax: 0.10.0
libtpu: 0.0.40
codegen_flags: <defaults>
</compile_context>

<pallas_src>
import functools

import jax
import jax.numpy as jnp
from jax.experimental import pallas as pl
from jax.experimental.pallas import tpu as pltpu

_NEG_BIG = -9000000000000000.0  # same constant as the PyTorch module


def _round_up(x, m):
    return ((x + m - 1) // m) * m


# Feature-test single-buffered weight BlockSpecs. Constant weight blocks are DMA'd
# exactly once, so double-buffering them only wastes VMEM (matters at realistic H on
# v7x's 64 MiB physical VMEM). Fall back gracefully if the kwarg is unavailable.
try:
    _WEIGHT_SPEC_KW = dict(pipeline_mode=pl.Buffered(1))
    pl.BlockSpec((8, 128), lambda i: (0, 0), **_WEIGHT_SPEC_KW)
except Exception:  # pragma: no cover - older pallas API
    _WEIGHT_SPEC_KW = {}


def _make_dgn_kernel(compute_dtype):
    cd = jnp.dtype(compute_dtype)
    # f32 path: force full-f32 MXU passes so the kernel matches the HIGHEST-precision
    # reference. bf16 path: operands are already bf16, default precision is fine.
    prec = jax.lax.Precision.HIGHEST if cd == jnp.dtype(jnp.float32) else None

    def kernel(x_ref, mask_ref,
               we_ref, be_ref,
               wvqk1_ref, bvqk1_ref, wo1_ref, bo1_ref,
               wvqk2_ref, bvqk2_ref, wo2_ref, bo2_ref,
               wqn_ref, bqn_ref,
               out_ref):
        Bt, Np, Din = x_ref.shape
        Hp = we_ref.shape[1]           # lane-padded hidden dim (multiple of 128)
        Ap = out_ref.shape[-1]         # lane-padded action dim (multiple of 128)

        relu = lambda z: jnp.maximum(z, 0.0)

        def linear(x2, w_ref, b_ref):
            # Matmul operands in compute_dtype (bf16 on the perf path); accumulation,
            # bias add and every elementwise op stay in f32 (v5e VPU has no bf16).
            y = jnp.dot(x2.astype(cd), w_ref[...],
                        preferred_element_type=jnp.float32, precision=prec)
            return y + b_ref[...].astype(jnp.float32)

        # Flatten the batch tile so every linear layer is one (Bt*Np, D) matmul.
        x2 = x_ref[...].reshape(Bt * Np, Din)
        mask = mask_ref[...]                            # (Bt, Np, Np), f32

        h = relu(linear(x2, we_ref, be_ref))            # encoder -> (Bt*Np, Hp)

        def att_block(h2, wvqk_ref, bvqk_ref, wo_ref, bo_ref):
            # Fused V|Q|K projection: one (Bt*Np, Hp) @ (Hp, 3*Hp) matmul; the lane
            # slices below are 128-aligned because Hp % 128 == 0.
            vqk = relu(linear(h2, wvqk_ref, bvqk_ref))  # (Bt*Np, 3*Hp)
            v3 = vqk[:, 0 * Hp:1 * Hp].reshape(Bt, Np, Hp)
            q3 = vqk[:, 1 * Hp:2 * Hp].reshape(Bt, Np, Hp)
            k3 = vqk[:, 2 * Hp:3 * Hp].reshape(Bt, Np, Hp)

            # Batched q @ k^T with the transpose folded into the contraction.
            scores = jnp.einsum('bnh,bmh->bnm', q3.astype(cd), k3.astype(cd),
                                preferred_element_type=jnp.float32,
                                precision=prec)          # (Bt, Np, Np)
            # Binary mask: equivalent to scores*mask - 9e15*(1-mask).
            scores = jnp.where(mask != 0, scores, _NEG_BIG)
            scores = scores - jnp.max(scores, axis=-1, keepdims=True)
            e = jnp.exp(scores)
            att = e / jnp.sum(e, axis=-1, keepdims=True)   # exact divide (f32)

            attn_out = jnp.einsum('bnm,bmh->bnh', att.astype(cd), v3.astype(cd),
                                  preferred_element_type=jnp.float32,
                                  precision=prec)          # (Bt, Np, Hp)
            return relu(linear(attn_out.reshape(Bt * Np, Hp), wo_ref, bo_ref))

        h = att_block(h, wvqk1_ref, bvqk1_ref, wo1_ref, bo1_ref)
        h = att_block(h, wvqk2_ref, bvqk2_ref, wo2_ref, bo2_ref)

        # Q_Net head: plain linear, lane-dense (Ap % 128 == 0) unmasked store.
        q_vals = linear(h, wqn_ref, bqn_ref)
        out_ref[...] = q_vals.reshape(Bt, Np, Ap)

    return kernel


@functools.partial(jax.jit, static_argnames=("target_rows", "compute_dtype"))
def dgn_forward(x, mask, params, *, target_rows=512, compute_dtype="bfloat16"):
    cd = jnp.dtype(compute_dtype)
    B, N, Din = x.shape
    H = params["we"].shape[1]
    A = params["wqn"].shape[1]

    # Sublane-pad agents, lane-pad hidden/action dims. All padding is zeros -> exact.
    N_pad = _round_up(N, 8)
    H_pad = _round_up(H, 128)
    A_pad = _round_up(A, 128)

    # Batch tile: ~target_rows rows per layer matmul, but keep >= 2 grid blocks when
    # B >= 2 so both v7x TensorCores get work via dimension_semantics=("parallel",).
    Bt = max(1, min(B, max(1, target_rows // N_pad)))
    Bt = min(Bt, max(1, pl.cdiv(B, 2)))
    num_blocks = pl.cdiv(B, Bt)
    B_pad = num_blocks * Bt

    x = x.astype(jnp.float32)
    mask = mask.astype(jnp.float32)
    if (B_pad, N_pad) != (B, N):
        x = jnp.pad(x, ((0, B_pad - B), (0, N_pad - N), (0, 0)))
        mask = jnp.pad(mask, ((0, B_pad - B), (0, N_pad - N), (0, N_pad - N)))

    def pad2(w, rows, cols):
        return jnp.pad(w, ((0, rows - w.shape[0]), (0, cols - w.shape[1])))

    def fuse(idx):  # fused, lane-aligned V|Q|K projection weights / biases
        w = jnp.concatenate([pad2(params[f"wv{idx}"], H_pad, H_pad),
                             pad2(params[f"wq{idx}"], H_pad, H_pad),
                             pad2(params[f"wk{idx}"], H_pad, H_pad)], axis=1)
        b = jnp.concatenate([pad2(params[f"bv{idx}"], 1, H_pad),
                             pad2(params[f"bq{idx}"], 1, H_pad),
                             pad2(params[f"bk{idx}"], 1, H_pad)], axis=1)
        return w, b

    wvqk1, bvqk1 = fuse(1)
    wvqk2, bvqk2 = fuse(2)
    weight_args = [
        pad2(params["we"], Din, H_pad), pad2(params["be"], 1, H_pad),
        wvqk1, bvqk1, pad2(params["wo1"], H_pad, H_pad), pad2(params["bo1"], 1, H_pad),
        wvqk2, bvqk2, pad2(params["wo2"], H_pad, H_pad), pad2(params["bo2"], 1, H_pad),
        pad2(params["wqn"], H_pad, A_pad), pad2(params["bqn"], 1, A_pad),
    ]
    # bf16 weights on the perf path: halves weight DMA + VMEM; MXU is bf16-native.
    weight_args = [w.astype(cd) for w in weight_args]

    def const_spec(arr):  # constant-index, single-buffered weight block
        return pl.BlockSpec(arr.shape, lambda b: (0, 0), **_WEIGHT_SPEC_KW)

    in_specs = [
        pl.BlockSpec((Bt, N_pad, Din), lambda b: (b, 0, 0)),     # x tile
        pl.BlockSpec((Bt, N_pad, N_pad), lambda b: (b, 0, 0)),   # mask tile
    ] + [const_spec(w) for w in weight_args]

    out = pl.pallas_call(
        _make_dgn_kernel(compute_dtype),
        out_shape=jax.ShapeDtypeStruct((B_pad, N_pad, A_pad), jnp.float32),
        grid=(num_blocks,),
        in_specs=in_specs,
        out_specs=pl.BlockSpec((Bt, N_pad, A_pad), lambda b: (b, 0, 0)),
        compiler_params=pltpu.CompilerParams(
            dimension_semantics=("parallel",),
            # 32 MiB fits every generation's budget (v7x physical VMEM is 64 MiB);
            # activations + single-buffered weights stay well inside at these tiles.
            vmem_limit_bytes=32 * 1024 * 1024),
    )(x, mask, *weight_args)

    return out[:B, :N, :A]


def init_params(key, num_inputs, hidden_dim, num_actions):
    """Deterministic synthetic init (Linear weights as (in, out), biases as (1, out))."""
    specs = {
        "we": (num_inputs, hidden_dim), "be": (1, hidden_dim),
        "wv1": (hidden_dim, hidden_dim), "bv1": (1, hidden_dim),
        "wq1": (hidden_dim, hidden_dim), "bq1": (1, hidden_dim),
        "wk1": (hidden_dim, hidden_dim), "bk1": (1, hidden_dim),
        "wo1": (hidden_dim, hidden_dim), "bo1": (1, hidden_dim),
        "wv2": (hidden_dim, hidden_dim), "bv2": (1, hidden_dim),
        "wq2": (hidden_dim, hidden_dim), "bq2": (1, hidden_dim),
        "wk2": (hidden_dim, hidden_dim), "bk2": (1, hidden_dim),
        "wo2": (hidden_dim, hidden_dim), "bo2": (1, hidden_dim),
        "wqn": (hidden_dim, num_actions), "bqn": (1, num_actions),
    }
    params = {}
    keys = jax.random.split(key, len(specs))
    for (name, shape), k in zip(specs.items(), keys):
        fan_in = shape[0] if name.startswith("w") else shape[1]
        scale = 1.0 / jnp.sqrt(jnp.float32(fan_in))
        params[name] = scale * jax.random.normal(k, shape, dtype=jnp.float32)
    return params


def dgn_reference(x, mask, p):
    """Pure-JAX, full-f32 (Precision.HIGHEST) reference of the PyTorch forward."""
    hp = jax.lax.Precision.HIGHEST
    relu = lambda z: jnp.maximum(z, 0.0)
    h = relu(jnp.dot(x, p["we"], precision=hp) + p["be"])

    def att(h, wv, bv, wq, bq, wk, bk, wo, bo):
        v = relu(jnp.dot(h, wv, precision=hp) + bv)
        q = relu(jnp.dot(h, wq, precision=hp) + bq)
        k = relu(jnp.dot(h, wk, precision=hp) + bk)
        scores = jnp.einsum("bnh,bmh->bnm", q, k, precision=hp)
        scores = scores * mask - 9000000000000000.0 * (1.0 - mask)
        att_w = jax.nn.softmax(scores, axis=2)
        o = jnp.einsum("bnm,bmh->bnh", att_w, v, precision=hp)
        return relu(jnp.dot(o, wo, precision=hp) + bo)

    h = att(h, p["wv1"], p["bv1"], p["wq1"], p["bq1"], p["wk1"], p["bk1"], p["wo1"], p["bo1"])
    h = att(h, p["wv2"], p["bv2"], p["wq2"], p["bq2"], p["wk2"], p["bk2"], p["wo2"], p["bo2"])
    return jnp.dot(h, p["wqn"], precision=hp) + p["bqn"]


if __name__ == "__main__":
    # Small shapes consistent with DGN(n_agent, num_inputs, hidden_dim, num_actions).
    B, N_AGENT, NUM_INPUTS, HIDDEN, NUM_ACTIONS = 2, 8, 16, 32, 4

    key = jax.random.PRNGKey(0)
    k_x, k_m, k_p = jax.random.split(key, 3)

    x = jax.random.normal(k_x, (B, N_AGENT, NUM_INPUTS), dtype=jnp.float32)
    # Binary adjacency mask with self-edges (diag = 1), as in DGN usage.
    rand_adj = (jax.random.uniform(k_m, (B, N_AGENT, N_AGENT)) > 0.5).astype(jnp.float32)
    mask = jnp.maximum(rand_adj, jnp.eye(N_AGENT, dtype=jnp.float32)[None, :, :])

    params = init_params(k_p, NUM_INPUTS, HIDDEN, NUM_ACTIONS)

    q_ref = dgn_reference(x, mask, params)
    scale = float(jnp.max(jnp.abs(q_ref))) + 1e-6

    # Full-f32 path: must closely match the HIGHEST-precision pure-JAX reference.
    q_f32 = dgn_forward(x, mask, params, compute_dtype="float32")
    jax.block_until_ready(q_f32)
    assert q_f32.shape == (B, N_AGENT, NUM_ACTIONS)
    err_f32 = float(jnp.max(jnp.abs(q_f32 - q_ref)))
    assert err_f32 <= 2e-2 * scale + 1e-5, f"f32 mismatch: err={err_f32:.3e} scale={scale:.3e}"

    # Default perf path (bf16 MXU operands): loose sanity bound vs the f32 reference.
    q_bf16 = dgn_forward(x, mask, params)
    jax.block_until_ready(q_bf16)
    assert bool(jnp.all(jnp.isfinite(q_bf16))), "bf16 path produced non-finite values"
    err_bf16 = float(jnp.max(jnp.abs(q_bf16 - q_ref)))
    assert err_bf16 <= 0.25 * scale, f"bf16 mismatch: err={err_bf16:.3e} scale={scale:.3e}"

    print("KERNEL_OK")
</pallas_src>

<mosaic_0001>
module attributes {stable_mosaic.version = 11 : i64} {
  func.func @kernel(%arg0: i32, %arg1: memref<1x8x16xf32, #tpu.memory_space<vmem>>, %arg2: memref<1x8x8xf32, #tpu.memory_space<vmem>>, %arg3: memref<16x128xf32, #tpu.memory_space<vmem>>, %arg4: memref<1x128xf32, #tpu.memory_space<vmem>>, %arg5: memref<128x384xf32, #tpu.memory_space<vmem>>, %arg6: memref<1x384xf32, #tpu.memory_space<vmem>>, %arg7: memref<128x128xf32, #tpu.memory_space<vmem>>, %arg8: memref<1x128xf32, #tpu.memory_space<vmem>>, %arg9: memref<128x384xf32, #tpu.memory_space<vmem>>, %arg10: memref<1x384xf32, #tpu.memory_space<vmem>>, %arg11: memref<128x128xf32, #tpu.memory_space<vmem>>, %arg12: memref<1x128xf32, #tpu.memory_space<vmem>>, %arg13: memref<128x128xf32, #tpu.memory_space<vmem>>, %arg14: memref<1x128xf32, #tpu.memory_space<vmem>>, %arg15: memref<1x8x128xf32, #tpu.memory_space<vmem>>) attributes {dimension_semantics = [#tpu.dimension_semantics<parallel>], iteration_bounds = array<i64: 2>, scalar_prefetch = 0 : i64, scratch_operands = 0 : i64, tpu.core_type = #tpu.core_type<tc>, window_params = [{transform_indices = @transform_0, window_bounds = array<i64: 1, 8, 16>}, {transform_indices = @transform_1, window_bounds = array<i64: 1, 8, 8>}, {pipeline_mode = #tpu.pipeline_mode<synchronous>, transform_indices = @transform_2, window_bounds = array<i64: 16, 128>}, {pipeline_mode = #tpu.pipeline_mode<synchronous>, transform_indices = @transform_3, window_bounds = array<i64: 1, 128>}, {pipeline_mode = #tpu.pipeline_mode<synchronous>, transform_indices = @transform_4, window_bounds = array<i64: 128, 384>}, {pipeline_mode = #tpu.pipeline_mode<synchronous>, transform_indices = @transform_5, window_bounds = array<i64: 1, 384>}, {pipeline_mode = #tpu.pipeline_mode<synchronous>, transform_indices = @transform_6, window_bounds = array<i64: 128, 128>}, {pipeline_mode = #tpu.pipeline_mode<synchronous>, transform_indices = @transform_7, window_bounds = array<i64: 1, 128>}, {pipeline_mode = #tpu.pipeline_mode<synchronous>, transform_indices = @transform_8, window_bounds = array<i64: 128, 384>}, {pipeline_mode = #tpu.pipeline_mode<synchronous>, transform_indices = @transform_9, window_bounds = array<i64: 1, 384>}, {pipeline_mode = #tpu.pipeline_mode<synchronous>, transform_indices = @transform_10, window_bounds = array<i64: 128, 128>}, {pipeline_mode = #tpu.pipeline_mode<synchronous>, transform_indices = @transform_11, window_bounds = array<i64: 1, 128>}, {pipeline_mode = #tpu.pipeline_mode<synchronous>, transform_indices = @transform_12, window_bounds = array<i64: 128, 128>}, {pipeline_mode = #tpu.pipeline_mode<synchronous>, transform_indices = @transform_13, window_bounds = array<i64: 1, 128>}, {transform_indices = @transform_14, window_bounds = array<i64: 1, 8, 128>}]} {
    %c0 = arith.constant 0 : index
    %c0_0 = arith.constant 0 : index
    %c0_1 = arith.constant 0 : index
    %0 = vector.load %arg1[%c0, %c0_0, %c0_1] : memref<1x8x16xf32, #tpu.memory_space<vmem>>, vector<1x8x16xf32>
    %1 = vector.shape_cast %0 : vector<1x8x16xf32> to vector<8x16xf32>
    %c0_2 = arith.constant 0 : index
    %c0_3 = arith.constant 0 : index
    %c0_4 = arith.constant 0 : index
    %2 = vector.load %arg2[%c0_2, %c0_3, %c0_4] : memref<1x8x8xf32, #tpu.memory_space<vmem>>, vector<1x8x8xf32>
    %c0_5 = arith.constant 0 : index
    %c0_6 = arith.constant 0 : index
    %3 = vector.load %arg3[%c0_5, %c0_6] : memref<16x128xf32, #tpu.memory_space<vmem>>, vector<16x128xf32>
    %cst = arith.constant dense<0.000000e+00> : vector<8x128xf32>
    %4 = tpu.matmul %1, %3, %cst {dimension_numbers = #tpu.dot_dimension_numbers<[1], [0], [0], [1], [0, 0, 1, 1], [], []>, precision = #tpu.contract_precision<fp32>} : vector<8x16xf32>, vector<16x128xf32>, vector<8x128xf32> -> vector<8x128xf32>
    %c0_7 = arith.constant 0 : index
    %c0_8 = arith.constant 0 : index
    %5 = vector.load %arg4[%c0_7, %c0_8] : memref<1x128xf32, #tpu.memory_space<vmem>>, vector<1x128xf32>
    %6 = vector.broadcast %5 : vector<1x128xf32> to vector<8x128xf32>
    %7 = arith.addf %4, %6 : vector<8x128xf32>
    %cst_9 = arith.constant 0.000000e+00 : f32
    %8 = vector.broadcast %cst_9 : f32 to vector<8x128xf32>
    %9 = arith.maximumf %7, %8 : vector<8x128xf32>
    %c0_10 = arith.constant 0 : index
    %c0_11 = arith.constant 0 : index
    %10 = vector.load %arg5[%c0_10, %c0_11] : memref<128x384xf32, #tpu.memory_space<vmem>>, vector<128x384xf32>
    %cst_12 = arith.constant dense<0.000000e+00> : vector<8x384xf32>
    %11 = tpu.matmul %9, %10, %cst_12 {dimension_numbers = #tpu.dot_dimension_numbers<[1], [0], [0], [1], [0, 0, 1, 1], [], []>, precision = #tpu.contract_precision<fp32>} : vector<8x128xf32>, vector<128x384xf32>, vector<8x384xf32> -> vector<8x384xf32>
    %c0_13 = arith.constant 0 : index
    %c0_14 = arith.constant 0 : index
    %12 = vector.load %arg6[%c0_13, %c0_14] : memref<1x384xf32, #tpu.memory_space<vmem>>, vector<1x384xf32>
    %13 = vector.broadcast %12 : vector<1x384xf32> to vector<8x384xf32>
    %14 = arith.addf %11, %13 : vector<8x384xf32>
    %cst_15 = arith.constant 0.000000e+00 : f32
    %15 = vector.broadcast %cst_15 : f32 to vector<8x384xf32>
    %16 = arith.maximumf %14, %15 : vector<8x384xf32>
    %17 = vector.extract_strided_slice %16 {offsets = [0, 0], sizes = [8, 128], strides = [1, 1]} : vector<8x384xf32> to vector<8x128xf32>
    %18 = vector.shape_cast %17 : vector<8x128xf32> to vector<1x8x128xf32>
    %19 = vector.extract_strided_slice %16 {offsets = [0, 128], sizes = [8, 128], strides = [1, 1]} : vector<8x384xf32> to vector<8x128xf32>
    %20 = vector.shape_cast %19 : vector<8x128xf32> to vector<1x8x128xf32>
    %21 = vector.extract_strided_slice %16 {offsets = [0, 256], sizes = [8, 128], strides = [1, 1]} : vector<8x384xf32> to vector<8x128xf32>
    %22 = vector.shape_cast %21 : vector<8x128xf32> to vector<1x8x128xf32>
    "tpu.trace_start"() <{level = 10 : i32, message = "bnh,bmh->bnm"}> : () -> ()
    %cst_16 = arith.constant dense<0.000000e+00> : vector<1x8x8xf32>
    %23 = tpu.matmul %20, %22, %cst_16 {dimension_numbers = #tpu.dot_dimension_numbers<[2], [2], [1], [1], [0, 0, 0, 1, 1, 1], [0], [0]>, precision = #tpu.contract_precision<fp32>} : vector<1x8x128xf32>, vector<1x8x128xf32>, vector<1x8x8xf32> -> vector<1x8x8xf32>
    %cst_17 = arith.constant 0.000000e+00 : f32
    "tpu.trace_stop"() : () -> ()
    %24 = vector.broadcast %cst_17 : f32 to vector<1x8x8xf32>
    %25 = arith.cmpf one, %2, %24 : vector<1x8x8xf32>
    %cst_18 = arith.constant -9.000000e+15 : f32
    %26 = vector.broadcast %cst_18 : f32 to vector<1x8x8xf32>
    %27 = arith.select %25, %23, %26 : vector<1x8x8xi1>, vector<1x8x8xf32>
    %cst_19 = arith.constant dense<0xFF800000> : vector<1x8xf32>
    %28 = vector.multi_reduction <maximumf>, %27, %cst_19 [2] : vector<1x8x8xf32> to vector<1x8xf32>
    %29 = vector.shape_cast %28 : vector<1x8xf32> to vector<1x8x1xf32>
    %30 = vector.broadcast %29 : vector<1x8x1xf32> to vector<1x8x8xf32>
    %31 = arith.subf %27, %30 : vector<1x8x8xf32>
    %32 = math.exp %31 : vector<1x8x8xf32>
    %cst_20 = arith.constant dense<0.000000e+00> : vector<1x8xf32>
    %33 = vector.multi_reduction <add>, %32, %cst_20 [2] : vector<1x8x8xf32> to vector<1x8xf32>
    %34 = vector.shape_cast %33 : vector<1x8xf32> to vector<1x8x1xf32>
    %35 = vector.broadcast %34 : vector<1x8x1xf32> to vector<1x8x8xf32>
    %36 = arith.divf %32, %35 : vector<1x8x8xf32>
    "tpu.trace_start"() <{level = 10 : i32, message = "bnm,bmh->bnh"}> : () -> ()
    %cst_21 = arith.constant dense<0.000000e+00> : vector<1x8x128xf32>
    %37 = tpu.matmul %36, %18, %cst_21 {dimension_numbers = #tpu.dot_dimension_numbers<[2], [1], [1], [2], [0, 0, 0, 1, 1, 2], [0], [0]>, precision = #tpu.contract_precision<fp32>} : vector<1x8x8xf32>, vector<1x8x128xf32>, vector<1x8x128xf32> -> vector<1x8x128xf32>
    "tpu.trace_stop"() : () -> ()
    %38 = vector.shape_cast %37 : vector<1x8x128xf32> to vector<8x128xf32>
    %c0_22 = arith.constant 0 : index
    %c0_23 = arith.constant 0 : index
    %39 = vector.load %arg7[%c0_22, %c0_23] : memref<128x128xf32, #tpu.memory_space<vmem>>, vector<128x128xf32>
    %cst_24 = arith.constant dense<0.000000e+00> : vector<8x128xf32>
    %40 = tpu.matmul %38, %39, %cst_24 {dimension_numbers = #tpu.dot_dimension_numbers<[1], [0], [0], [1], [0, 0, 1, 1], [], []>, precision = #tpu.contract_precision<fp32>} : vector<8x128xf32>, vector<128x128xf32>, vector<8x128xf32> -> vector<8x128xf32>
    %c0_25 = arith.constant 0 : index
    %c0_26 = arith.constant 0 : index
    %41 = vector.load %arg8[%c0_25, %c0_26] : memref<1x128xf32, #tpu.memory_space<vmem>>, vector<1x128xf32>
    %42 = vector.broadcast %41 : vector<1x128xf32> to vector<8x128xf32>
    %43 = arith.addf %40, %42 : vector<8x128xf32>
    %cst_27 = arith.constant 0.000000e+00 : f32
    %44 = vector.broadcast %cst_27 : f32 to vector<8x128xf32>
    %45 = arith.maximumf %43, %44 : vector<8x128xf32>
    %c0_28 = arith.constant 0 : index
    %c0_29 = arith.constant 0 : index
    %46 = vector.load %arg9[%c0_28, %c0_29] : memref<128x384xf32, #tpu.memory_space<vmem>>, vector<128x384xf32>
    %cst_30 = arith.constant dense<0.000000e+00> : vector<8x384xf32>
    %47 = tpu.matmul %45, %46, %cst_30 {dimension_numbers = #tpu.dot_dimension_numbers<[1], [0], [0], [1], [0, 0, 1, 1], [], []>, precision = #tpu.contract_precision<fp32>} : vector<8x128xf32>, vector<128x384xf32>, vector<8x384xf32> -> vector<8x384xf32>
    %c0_31 = arith.constant 0 : index
    %c0_32 = arith.constant 0 : index
    %48 = vector.load %arg10[%c0_31, %c0_32] : memref<1x384xf32, #tpu.memory_space<vmem>>, vector<1x384xf32>
    %49 = vector.broadcast %48 : vector<1x384xf32> to vector<8x384xf32>
    %50 = arith.addf %47, %49 : vector<8x384xf32>
    %cst_33 = arith.constant 0.000000e+00 : f32
    %51 = vector.broadcast %cst_33 : f32 to vector<8x384xf32>
    %52 = arith.maximumf %50, %51 : vector<8x384xf32>
    %53 = vector.extract_strided_slice %52 {offsets = [0, 0], sizes = [8, 128], strides = [1, 1]} : vector<8x384xf32> to vector<8x128xf32>
    %54 = vector.shape_cast %53 : vector<8x128xf32> to vector<1x8x128xf32>
    %55 = vector.extract_strided_slice %52 {offsets = [0, 128], sizes = [8, 128], strides = [1, 1]} : vector<8x384xf32> to vector<8x128xf32>
    %56 = vector.shape_cast %55 : vector<8x128xf32> to vector<1x8x128xf32>
    %57 = vector.extract_strided_slice %52 {offsets = [0, 256], sizes = [8, 128], strides = [1, 1]} : vector<8x384xf32> to vector<8x128xf32>
    %58 = vector.shape_cast %57 : vector<8x128xf32> to vector<1x8x128xf32>
    "tpu.trace_start"() <{level = 10 : i32, message = "bnh,bmh->bnm"}> : () -> ()
    %cst_34 = arith.constant dense<0.000000e+00> : vector<1x8x8xf32>
    %59 = tpu.matmul %56, %58, %cst_34 {dimension_numbers = #tpu.dot_dimension_numbers<[2], [2], [1], [1], [0, 0, 0, 1, 1, 1], [0], [0]>, precision = #tpu.contract_precision<fp32>} : vector<1x8x128xf32>, vector<1x8x128xf32>, vector<1x8x8xf32> -> vector<1x8x8xf32>
    %cst_35 = arith.constant 0.000000e+00 : f32
    "tpu.trace_stop"() : () -> ()
    %60 = vector.broadcast %cst_35 : f32 to vector<1x8x8xf32>
    %61 = arith.cmpf one, %2, %60 : vector<1x8x8xf32>
    %cst_36 = arith.constant -9.000000e+15 : f32
    %62 = vector.broadcast %cst_36 : f32 to vector<1x8x8xf32>
    %63 = arith.select %61, %59, %62 : vector<1x8x8xi1>, vector<1x8x8xf32>
    %cst_37 = arith.constant dense<0xFF800000> : vector<1x8xf32>
    %64 = vector.multi_reduction <maximumf>, %63, %cst_37 [2] : vector<1x8x8xf32> to vector<1x8xf32>
    %65 = vector.shape_cast %64 : vector<1x8xf32> to vector<1x8x1xf32>
    %66 = vector.broadcast %65 : vector<1x8x1xf32> to vector<1x8x8xf32>
    %67 = arith.subf %63, %66 : vector<1x8x8xf32>
    %68 = math.exp %67 : vector<1x8x8xf32>
    %cst_38 = arith.constant dense<0.000000e+00> : vector<1x8xf32>
    %69 = vector.multi_reduction <add>, %68, %cst_38 [2] : vector<1x8x8xf32> to vector<1x8xf32>
    %70 = vector.shape_cast %69 : vector<1x8xf32> to vector<1x8x1xf32>
    %71 = vector.broadcast %70 : vector<1x8x1xf32> to vector<1x8x8xf32>
    %72 = arith.divf %68, %71 : vector<1x8x8xf32>
    "tpu.trace_start"() <{level = 10 : i32, message = "bnm,bmh->bnh"}> : () -> ()
    %cst_39 = arith.constant dense<0.000000e+00> : vector<1x8x128xf32>
    %73 = tpu.matmul %72, %54, %cst_39 {dimension_numbers = #tpu.dot_dimension_numbers<[2], [1], [1], [2], [0, 0, 0, 1, 1, 2], [0], [0]>, precision = #tpu.contract_precision<fp32>} : vector<1x8x8xf32>, vector<1x8x128xf32>, vector<1x8x128xf32> -> vector<1x8x128xf32>
    "tpu.trace_stop"() : () -> ()
    %74 = vector.shape_cast %73 : vector<1x8x128xf32> to vector<8x128xf32>
    %c0_40 = arith.constant 0 : index
    %c0_41 = arith.constant 0 : index
    %75 = vector.load %arg11[%c0_40, %c0_41] : memref<128x128xf32, #tpu.memory_space<vmem>>, vector<128x128xf32>
    %cst_42 = arith.constant dense<0.000000e+00> : vector<8x128xf32>
    %76 = tpu.matmul %74, %75, %cst_42 {dimension_numbers = #tpu.dot_dimension_numbers<[1], [0], [0], [1], [0, 0, 1, 1], [], []>, precision = #tpu.contract_precision<fp32>} : vector<8x128xf32>, vector<128x128xf32>, vector<8x128xf32> -> vector<8x128xf32>
    %c0_43 = arith.constant 0 : index
    %c0_44 = arith.constant 0 : index
    %77 = vector.load %arg12[%c0_43, %c0_44] : memref<1x128xf32, #tpu.memory_space<vmem>>, vector<1x128xf32>
    %78 = vector.broadcast %77 : vector<1x128xf32> to vector<8x128xf32>
    %79 = arith.addf %76, %78 : vector<8x128xf32>
    %cst_45 = arith.constant 0.000000e+00 : f32
    %80 = vector.broadcast %cst_45 : f32 to vector<8x128xf32>
    %81 = arith.maximumf %79, %80 : vector<8x128xf32>
    %c0_46 = arith.constant 0 : index
    %c0_47 = arith.constant 0 : index
    %82 = vector.load %arg13[%c0_46, %c0_47] : memref<128x128xf32, #tpu.memory_space<vmem>>, vector<128x128xf32>
    %cst_48 = arith.constant dense<0.000000e+00> : vector<8x128xf32>
    %83 = tpu.matmul %81, %82, %cst_48 {dimension_numbers = #tpu.dot_dimension_numbers<[1], [0], [0], [1], [0, 0, 1, 1], [], []>, precision = #tpu.contract_precision<fp32>} : vector<8x128xf32>, vector<128x128xf32>, vector<8x128xf32> -> vector<8x128xf32>
    %c0_49 = arith.constant 0 : index
    %c0_50 = arith.constant 0 : index
    %84 = vector.load %arg14[%c0_49, %c0_50] : memref<1x128xf32, #tpu.memory_space<vmem>>, vector<1x128xf32>
    %85 = vector.broadcast %84 : vector<1x128xf32> to vector<8x128xf32>
    %86 = arith.addf %83, %85 : vector<8x128xf32>
    %87 = vector.shape_cast %86 : vector<8x128xf32> to vector<1x8x128xf32>
    %c0_51 = arith.constant 0 : index
    %c0_52 = arith.constant 0 : index
    %c0_53 = arith.constant 0 : index
    %88 = vector.load %arg15[%c0_51, %c0_52, %c0_53] : memref<1x8x128xf32, #tpu.memory_space<vmem>>, vector<1x8x128xf32>
    tpu.vector_store %arg15[%c0_51, %c0_52, %c0_53], %87 {strides = array<i32>} : memref<1x8x128xf32, #tpu.memory_space<vmem>>, vector<1x8x128xf32>,
    return
  }
  func.func @transform_0(%arg0: i32) -> (i32, i32, i32) {
    %c0_i32 = arith.constant 0 : i32
    %c0_i32_0 = arith.constant 0 : i32
    %c0_i32_1 = arith.constant 0 : i32
    return %arg0, %c0_i32, %c0_i32_0 : i32, i32, i32
  }
  func.func @transform_1(%arg0: i32) -> (i32, i32, i32) {
    %c0_i32 = arith.constant 0 : i32
    %c0_i32_0 = arith.constant 0 : i32
    %c0_i32_1 = arith.constant 0 : i32
    return %arg0, %c0_i32, %c0_i32_0 : i32, i32, i32
  }
  func.func @transform_2(%arg0: i32) -> (i32, i32) {
    %c0_i32 = arith.constant 0 : i32
    %c0_i32_0 = arith.constant 0 : i32
    %c0_i32_1 = arith.constant 0 : i32
    return %c0_i32, %c0_i32_0 : i32, i32
  }
  func.func @transform_3(%arg0: i32) -> (i32, i32) {
    %c0_i32 = arith.constant 0 : i32
    %c0_i32_0 = arith.constant 0 : i32
    %c0_i32_1 = arith.constant 0 : i32
    return %c0_i32, %c0_i32_0 : i32, i32
  }
  func.func @transform_4(%arg0: i32) -> (i32, i32) {
    %c0_i32 = arith.constant 0 : i32
    %c0_i32_0 = arith.constant 0 : i32
    %c0_i32_1 = arith.constant 0 : i32
    return %c0_i32, %c0_i32_0 : i32, i32
  }
  func.func @transform_5(%arg0: i32) -> (i32, i32) {
    %c0_i32 = arith.constant 0 : i32
    %c0_i32_0 = arith.constant 0 : i32
    %c0_i32_1 = arith.constant 0 : i32
    return %c0_i32, %c0_i32_0 : i32, i32
  }
  func.func @transform_6(%arg0: i32) -> (i32, i32) {
    %c0_i32 = arith.constant 0 : i32
    %c0_i32_0 = arith.constant 0 : i32
    %c0_i32_1 = arith.constant 0 : i32
    return %c0_i32, %c0_i32_0 : i32, i32
  }
  func.func @transform_7(%arg0: i32) -> (i32, i32) {
    %c0_i32 = arith.constant 0 : i32
    %c0_i32_0 = arith.constant 0 : i32
    %c0_i32_1 = arith.constant 0 : i32
    return %c0_i32, %c0_i32_0 : i32, i32
  }
  func.func @transform_8(%arg0: i32) -> (i32, i32) {
    %c0_i32 = arith.constant 0 : i32
    %c0_i32_0 = arith.constant 0 : i32
    %c0_i32_1 = arith.constant 0 : i32
    return %c0_i32, %c0_i32_0 : i32, i32
  }
  func.func @transform_9(%arg0: i32) -> (i32, i32) {
    %c0_i32 = arith.constant 0 : i32
    %c0_i32_0 = arith.constant 0 : i32
    %c0_i32_1 = arith.constant 0 : i32
    return %c0_i32, %c0_i32_0 : i32, i32
  }
  func.func @transform_10(%arg0: i32) -> (i32, i32) {
    %c0_i32 = arith.constant 0 : i32
    %c0_i32_0 = arith.constant 0 : i32
    %c0_i32_1 = arith.constant 0 : i32
    return %c0_i32, %c0_i32_0 : i32, i32
  }
  func.func @transform_11(%arg0: i32) -> (i32, i32) {
    %c0_i32 = arith.constant 0 : i32
    %c0_i32_0 = arith.constant 0 : i32
    %c0_i32_1 = arith.constant 0 : i32
    return %c0_i32, %c0_i32_0 : i32, i32
  }
  func.func @transform_12(%arg0: i32) -> (i32, i32) {
    %c0_i32 = arith.constant 0 : i32
    %c0_i32_0 = arith.constant 0 : i32
    %c0_i32_1 = arith.constant 0 : i32
    return %c0_i32, %c0_i32_0 : i32, i32
  }
  func.func @transform_13(%arg0: i32) -> (i32, i32) {
    %c0_i32 = arith.constant 0 : i32
    %c0_i32_0 = arith.constant 0 : i32
    %c0_i32_1 = arith.constant 0 : i32
    return %c0_i32, %c0_i32_0 : i32, i32
  }
  func.func @transform_14(%arg0: i32) -> (i32, i32, i32) {
    %c0_i32 = arith.constant 0 : i32
    %c0_i32_0 = arith.constant 0 : i32
    %c0_i32_1 = arith.constant 0 : i32
    return %arg0, %c0_i32, %c0_i32_0 : i32, i32, i32
  }
}

</mosaic_0001>

<bundles_post_ra>
// kernel: dgn_forward.1
= control target key start
LH: loop header
LB: loop body
LE: loop exit
PB: predicated region body
PF: predicated region fallthrough
CT: control target
= control target key end

     0   :  { %s11117_s29 = smov 0   ;;  %s14338_s0 = inlined_call_operand.vmem [shape: f32[2,8,16], index: 0, kind: input, shape index: {}]   ;;  %s14339_s1 = inlined_call_operand.vmem [shape: f32[2,8,8], index: 1, kind: input, shape index: {}]   ;;  %s14340_s2 = inlined_call_operand.vmem [shape: f32[16,128], index: 2, kind: input, shape index: {}]   ;;  %s14341_s3 = inlined_call_operand.vmem [shape: f32[1,128], index: 3, kind: input, shape index: {}]   ;;  %s14342_s4 = inlined_call_operand.vmem [shape: f32[128,384], index: 4, kind: input, shape index: {}]   ;;  %s14343_s5 = inlined_call_operand.vmem [shape: f32[1,384], index: 5, kind: input, shape index: {}]   ;;  %s14344_s6 = inlined_call_operand.vmem [shape: f32[128,128], index: 6, kind: input, shape index: {}]   ;;  %s14345_s7 = inlined_call_operand.vmem [shape: f32[1,128], index: 7, kind: input, shape index: {}]   ;;  %s14346_s8 = inlined_call_operand.vmem [shape: f32[128,384], index: 8, kind: input, shape index: {}]   ;;  %s14347_s9 = inlined_call_operand.vmem [shape: f32[1,384], index: 9, kind: input, shape index: {}]   ;;  %s14348_s10 = inlined_call_operand.vmem [shape: f32[128,128], index: 10, kind: input, shape index: {}]   ;;  %s14349_s11 = inlined_call_operand.vmem [shape: f32[1,128], index: 11, kind: input, shape index: {}]   ;;  %s14350_s12 = inlined_call_operand.vmem [shape: f32[128,128], index: 12, kind: input, shape index: {}]   ;;  %s14351_s13 = inlined_call_operand.vmem [shape: f32[1,128], index: 13, kind: input, shape index: {}]   ;;  %s14352_s14 = inlined_call_operand.vmem [shape: f32[2,8,128], index: 14, kind: output, shape index: {}]  }
   0x1 LB: > { %s7959_s30 = sadd.s32 4294967295, %s11037_s29   ;;  %p7963_p0 = scmp.ge.s32.totalorder %s11037_s29, 1  ;;  %s11037_s29 = sphi %s11117_s29, %s24_s29  }
   0x2   : > { %p420_p1 = scmp.lt.s32.totalorder %s11037_s29, 3 }
   0x4   : > { %p421_p2 = pnand %p7963_p0, %p420_p1 }
   0x6   : > { %424 = sbr.rel (%p421_p2) target bundleno = 3946 (0xf6a), region = 76 }
   0xd   : > { %v482_v0 = vld [vmem:[%s14340_s2] sm:$0xff]  ;;  %v483_v1 = vld [vmem:[%s14340_s2 + $0x8] sm:$0xff]  ;;  %p468_p3 = scmp.lt.s32.totalorder %s7959_s30, 1  ;;  %v14368_v2 = vmov 0.0|0.0   ;;  %vm11040_vm0 = vmmov 0   ;;  %v14370_v5 = vmov 0.0  }
   0xe   : > { %9764 = vmatprep.subr.bf16.mxu0 %v14368_v2  ;;  %v496_v3 = vand.u32 4294901760, %v482_v0  ;;  %v499_v4 = vand.u32 4294901760, %v483_v1  ;;  %8560 = vmatprep.mubr.msk.f32.mxu0 %vm11040_vm0, %v14370_v5  ;;  %v11137_v6 = vld [vmem:[%s14342_s4 + $0x8] sm:$0xff]  ;;  %v11142_v7 = vld [vmem:[%s14342_s4 + $0x20] sm:$0xff]  ;;  %v11163_v14 = vld [vmem:[%s14342_s4 + $0x18] sm:$0xff]  ;;  %vm491_vm1 = vcmask 130048  }
   0xf   : > { %s14901_s30 = smov (!%p468_p3, %s7959_s30), 1  ;;  %9761 = vmatprep.subr.bf16.mxu1 %v14368_v2  ;;  %8553 = vmatprep.mubr.msk.f32.mxu1 %vm11040_vm0, %v14370_v5  ;;  %v1020_v8 = vand.u32 4294901760, %v11137_v6  ;;  %v1024_v9 = vand.u32 4294901760, %v11142_v7  ;;  %v11158_v13 = vld [vmem:[%s14342_s4] sm:$0xff]  ;;  %v11180_v17 = vld [vmem:[%s14342_s4 + $0x38] sm:$0xff]  ;;  %v11192_v20 = vld [vmem:[%s14342_s4 + $0x50] sm:$0xff] }
  0x10   : > { %v11149_v10 = vsub.f32 %v482_v0, %v496_v3  ;;  %v11151_v11 = vsub.f32 %v483_v1, %v499_v4  ;;  %v11153_v12 = vpack.c.bf16 %v499_v4, %v496_v3  ;;  %s11165_s27 = sshll.u32 %s14901_s30, 3  ;;  %v1022_v23 = vand.u32 4294901760, %v11158_v13  ;;  %v11211_v31 = vld [vmem:[%s14342_s4 + $0x30] sm:$0xff]  ;;  %v11216_v32 = vld [vmem:[%s14342_s4 + $0x48] sm:$0xff]  ;;  %v11226_v36 = vld [vmem:[%s14342_s4 + $0x80] sm:$0xff] }
  0x11   : > { %v11170_v15 = vsub.f32 %v11137_v6, %v1020_v8  ;;  %v11175_v16 = vsub.f32 %v11142_v7, %v1024_v9  ;;  %s471_s17 = scalar_lea.vmem %s14338_s0, %s11165_s27  ;;  %v14367_v24 = vand.u32 4294901760, %v11163_v14  ;;  %v14366_v28 = vand.u32 4294901760, %v11180_v17  ;;  %v11221_v35 = vld [vmem:[%s14342_s4 + $0x68] sm:$0xff]  ;;  %v11251_v44 = vld [vmem:[%s14342_s4 + $0x60] sm:$0xff]  ;;  %v11256_v45 = vld [vmem:[%s14342_s4 + $0x78] sm:$0xff]  ;;  %s475_s26 = scalar_lea.vmem %s14339_s1, %s11165_s27 }
  0x12   : > { %v575_v18 = vand.u32 4294901760, %v11149_v10  ;;  %v582_v19 = vand.u32 4294901760, %v11151_v11  ;;  %9763 = vmatpush3.bf16.msra.mxu1 %v11153_v12  ;;  %v480_v21 = vld [vmem:[%s471_s17] sm:$0xff]  ;;  %v14363_v30 = vand.u32 4294901760, %v11192_v20  ;;  %v11234_v38 = vsub.f32 %v11158_v13, %v1022_v23  ;;  %v11269_v50 = vld [vmem:[%s14342_s4 + $0x98] sm:$0xff]  ;;  %v11274_v51 = vld [vmem:[%s14342_s4 + $0xb0] sm:$0xff]  ;;  %s479_s19 = scalar_lea.vmem %s14352_s14, %s11165_s27 }
  0x13   : > { %v9843_v22 = vpack.c.bf16 %v11175_v16, %v11170_v15  ;;  %v493_v27 = vsel %vm491_vm1, %v480_v21, 0  ;;  %v11239_v39 = vsub.f32 %v11163_v14, %v14367_v24  ;;  %v11244_v41 = vsub.f32 %v11180_v17, %v14366_v28  ;;  %v11301_v61 = vld [vmem:[%s14342_s4 + $0x90] sm:$0xff]  ;;  %v11319_v3 = vld [vmem:[%s14342_s4 + $0xa8] sm:$0xff]  ;;  %v11331_v21 = vld [vmem:[%s14342_s4 + $0xe0] sm:$0xff] }
  0x14   : > { %v576_v25 = vsub.f32 %v11149_v10, %v575_v18  ;;  %v583_v26 = vsub.f32 %v11151_v11, %v582_v19  ;;  %v11205_v29 = vand.u32 4294901760, %v493_v27  ;;  %v14360_v42 = vand.u32 4294901760, %v11211_v31  ;;  %v11326_v4 = vld [vmem:[%s14342_s4 + $0xc8] sm:$0xff] }
  0x15   : > { %9844 = vmatprep.subr.bf16.mxu1 %v9843_v22  ;;  %v14359_v43 = vand.u32 4294901760, %v11216_v32  ;;  %v11262_v47 = vsub.f32 %v11192_v20, %v14363_v30  ;;  %v14358_v48 = vand.u32 4294901760, %v11221_v35  ;;  %v14357_v49 = vand.u32 4294901760, %v11226_v36 }
  0x16   : > { %v577_v33 = vand.u32 4294901760, %v576_v25  ;;  %v584_v34 = vand.u32 4294901760, %v583_v26  ;;  %v11229_v37 = vsub.f32 %v493_v27, %v11205_v29  ;;  %v9768_v52 = vpack.c.bf16 %v11151_v11, %v11149_v10 }
  0x17   : > { %v9845_v54 = vpack.c.bf16 %v11239_v39, %v11234_v38  ;;  %v14356_v55 = vand.u32 4294901760, %v11251_v44  ;;  %v14355_v56 = vand.u32 4294901760, %v11256_v45  ;;  %v11289_v57 = vsub.f32 %v11211_v31, %v14360_v42 }
  0x18   : > { %v9765_v40 = vpack.c.bf16 %v584_v34, %v577_v33  ;;  %v564_v46 = vand.u32 4294901760, %v11229_v37  ;;  %v11294_v58 = vsub.f32 %v11216_v32, %v14359_v43  ;;  %v14354_v59 = vand.u32 4294901760, %v11269_v50 }
  0x19   : > { %v14353_v60 = vand.u32 4294901760, %v11274_v51  ;;  %v9847_v63 = vpack.c.bf16 %v11262_v47, %v11244_v41  ;;  %v11309_v0 = vsub.f32 %v11221_v35, %v14358_v48  ;;  %v11314_v1 = vsub.f32 %v11226_v36, %v14357_v49 }
  0x1a   : > { %9766 = vmatpush3.bf16.msra.mxu0 %v9765_v40  ;;  %v565_v53 = vsub.f32 %v11229_v37, %v564_v46  ;;  %v11337_v22 = vsub.f32 %v11251_v44, %v14356_v55  ;;  %v11342_v25 = vsub.f32 %v11256_v45, %v14355_v56  ;;  %v14361_v26 = vand.u32 4294901760, %v11301_v61 }
  0x1b   : > { %9767 = vmatprep.subr.bf16.mxu0 %v14368_v2  ;;  %v9849_v27 = vpack.c.bf16 %v11294_v58, %v11289_v57  ;;  %v11350_v33 = vsub.f32 %v11269_v50, %v14354_v59  ;;  %v11355_v34 = vsub.f32 %v11274_v51, %v14353_v60  ;;  %v14362_v40 = vand.u32 4294901760, %v11319_v3  ;;  %v11370_v60 = vld [vmem:[%s14342_s4 + $0xd8] sm:$0xff]  ;;  %v11381_v59 = vld [vmem:[%s14342_s4 + $0x110] sm:$0xff] }
  0x1c   : > { %v566_v62 = vand.u32 4294901760, %v565_v53  ;;  %v14364_v53 = vand.u32 4294901760, %v11326_v4  ;;  %v9853_v56 = vpack.c.bf16 %v11342_v25, %v11337_v22  ;;  %v11388_v55 = vsub.f32 %v11301_v61, %v14361_v26 }
  0x1d   : > { %8561 = vmatmul.mubr.f32.vlgmr.msra.gmra.mrb[0].mxu0 %v11205_v29  ;;  %v9855_v49 = vpack.c.bf16 %v11355_v34, %v11350_v33  ;;  %v11395_v48 = vsub.f32 %v11319_v3, %v14362_v40  ;;  %v1058_v42 = vand.u32 4294901760, %v11370_v60  ;;  %v1064_v30 = vand.u32 4294901760, %v11381_v59 }
  0x1e   : > { %9769 = vmatpush3.bf16.msra.mxu0 %v9768_v52  ;;  %8567 = vmatprep.mubr.msk.f32.mxu0 %vm11040_vm0, %v14370_v5  ;;  %v9851_v52 = vpack.c.bf16 %v11314_v1, %v11309_v0  ;;  %v11403_v26 = vsub.f32 %v11326_v4, %v14364_v53  ;;  %v11453_v10 = vpack.c.bf16 %v1024_v9, %v1020_v8  ;;  %v14562_v11 = vand.u32 4294901760, %v11163_v14 }
  0x1f   : > { %9770 = vmatprep.subr.bf16.mxu0 %v14368_v2  ;;  %8554 = vmatmul.mubr.f32.vlgmr.msra.gmra.mrb[0].mxu1 %v566_v62  ;;  %v11365_v62 = vld [vmem:[%s14342_s4 + $0xc0] sm:$0xff]  ;;  %v14564_v6 = vand.u32 4294901760, %v11180_v17  ;;  %v14565_v7 = vand.u32 4294901760, %v11192_v20  ;;  %v14567_v9 = vand.u32 4294901760, %v11211_v31  ;;  %v14569_v13 = vand.u32 4294901760, %v11221_v35 }
  0x20   : > { %9846 = vmatpush1.bf16.msra.mxu1 %v9845_v54  ;;  %v14365_v54 = vand.u32 4294901760, %v11331_v21  ;;  %1488 = vmatprep.mubr.f32.mxu1 %v14370_v5  ;;  %v1054_v43 = vand.u32 4294901760, %v11365_v62  ;;  %14561 = vst [vmem:[#allocation2_spill] sm:$0xff] %v11453_v10  ;;  %v14570_v14 = vand.u32 4294901760, %v11226_v36  ;;  %v14571_v20 = vand.u32 4294901760, %v11251_v44  ;;  %v985_v44 = vld [vmem:[%s14342_s4 + $0xf0] sm:$0xff] }
  0x21   : > { %9848 = vmatprep.subr.bf16.mxu1 %v9847_v63  ;;  %v11376_v63 = vld [vmem:[%s14342_s4 + $0xf8] sm:$0xff]  ;;  %v11470_v8 = vpack.c.bf16 %v14565_v7, %v14564_v6  ;;  %v14574_v31 = vand.u32 4294901760, %v11274_v51  ;;  %v14575_v35 = vand.u32 4294901760, %v11301_v61  ;;  %v14576_v36 = vand.u32 4294901760, %v11319_v3 }
  0x22   : > { %v1060_v40 = vand.u32 4294901760, %v11376_v63  ;;  %v11419_v53 = vsub.f32 %v11365_v62, %v1054_v43  ;;  %v11486_v17 = vpack.c.bf16 %v14570_v14, %v14569_v13  ;;  %v11523_v61 = vpack.c.bf16 %v1058_v42, %v1054_v43  ;;  %v994_v6 = vld [vmem:[%s14342_s4 + $0x138] sm:$0xff] }
  0x23   : > { %14566 = vst [vmem:[#allocation4_spill] sm:$0xff] %v11470_v8  ;;  %v1062_v3 = vand.u32 4294901760, %v985_v44  ;;  %vm2967_vm3 = vcmask 64512  }
  0x24   : > { %9850 = vmatpush1.bf16.msra.mxu1 %v9849_v27  ;;  %v11408_v27 = vsub.f32 %v11331_v21, %v14365_v54  ;;  %v11422_v54 = vsub.f32 %v11370_v60, %v1058_v42  ;;  %v11429_v24 = vsub.f32 %v11376_v63, %v1060_v40  ;;  %v9774_v60 = vpack.c.bf16 %v582_v19, %v575_v18  ;;  %v995_v42 = vld [vmem:[%s14342_s4 + $0x140] sm:$0xff] }
  0x25   : > { %8568 = vmatmul.mubr.f32.vlgmr.msra.gmra.mrb[0].mxu0 %v11229_v37  ;;  %9852 = vmatprep.subr.bf16.mxu1 %v9851_v52  ;;  %v9857_v52 = vpack.c.bf16 %v11395_v48, %v11388_v55  ;;  %v11464_v18 = vpack.c.bf16 %v14562_v11, %v1022_v23  ;;  %v14572_v23 = vand.u32 4294901760, %v11256_v45  ;;  %v11507_v37 = vpack.c.bf16 %v14576_v36, %v14575_v35  ;;  %v988_v45 = vld [vmem:[%s14342_s4 + $0x108] sm:$0xff]  ;;  %v991_v11 = vld [vmem:[%s14342_s4 + $0x120] sm:$0xff] }
  0x26   : > { %9772 = vmatpush3.bf16.msra.mxu0 %v11153_v12  ;;  %8574 = vmatprep.mubr.msk.f32.mxu0 %vm11040_vm0, %v14370_v5  ;;  %v9859_v28 = vpack.c.bf16 %v11408_v27, %v11403_v26  ;;  %v1070_v7 = vand.u32 4294901760, %v991_v11 }
  0x27   : > { %9773 = vmatprep.subr.bf16.mxu0 %v14368_v2  ;;  %14563 = vst [vmem:[#allocation3_spill] sm:$0xff] %v11464_v18 }
  0x28   : > { %9854 = vmatpush1.bf16.msra.mxu1 %v9853_v56  ;;  %v11434_v56 = vsub.f32 %v11381_v59, %v1064_v30  ;;  %v11549_v14 = vsub.f32 %v991_v11, %v1070_v7 }
  0x29   : > { %9856 = vmatprep.subr.bf16.mxu1 %v9855_v49  ;;  %v9861_v49 = vpack.c.bf16 %v11422_v54, %v11419_v53 }
  0x2a   : > { %v9863_v62 = vpack.c.bf16 %v11434_v56, %v11429_v24 }
  0x2c   : > { %9858 = vmatpush1.bf16.msra.mxu1 %v9857_v52  ;;  %v1066_v52 = vand.u32 4294901760, %v988_v45 }
  0x2d   : > { %8575 = vmatmul.mubr.f32.vlgmr.msra.gmra.mrb[0].mxu0 %v564_v46  ;;  %9860 = vmatprep.subr.bf16.mxu1 %v9859_v28  ;;  %v11493_v28 = vpack.c.bf16 %v14572_v23, %v14571_v20  ;;  %v14577_v46 = vand.u32 4294901760, %v11326_v4  ;;  %v992_v4 = vld [vmem:[%s14342_s4 + $0x128] sm:$0xff]  ;;  %v998_v23 = vld [vmem:[%s14342_s4 + $0x158] sm:$0xff] }
  0x2e   : > { %9775 = vmatpush3.bf16.msra.mxu0 %v9774_v60  ;;  %8581 = vmatprep.mubr.msk.f32.mxu0 %vm11040_vm0, %v14370_v5  ;;  %v11526_v60 = vsub.f32 %v985_v44, %v1062_v3  ;;  %v1068_v43 = vand.u32 4294901760, %v992_v4  ;;  %v1076_v35 = vand.u32 4294901760, %v998_v23  ;;  %v997_v44 = vld [vmem:[%s14342_s4 + $0x150] sm:$0xff] }
  0x2f   : > { %9776 = vmatprep.subr.bf16.mxu0 %v14368_v2 }
  0x30   : > { %9862 = vmatpush1.bf16.msra.mxu1 %v9861_v49  ;;  %v11528_v49 = vsub.f32 %v988_v45, %v1066_v52  ;;  %v1000_v45 = vld [vmem:[%s14342_s4 + $0x168] sm:$0xff] }
  0x31   : > { %9864 = vmatprep.subr.bf16.mxu1 %v9863_v62 }
  0x32   : > { %v9865_v62 = vpack.c.bf16 %v11528_v49, %v11526_v60 }
  0x34   : > { %9866 = vmatpush1.bf16.msra.mxu1 %v9865_v62  ;;  %v1082_v62 = vand.u32 4294901760, %v1000_v45 }
  0x35   : > { %8582 = vmatmul.mubr.f32.vlgmr.msra.gmra.mrb[0].mxu0 %v11205_v29 }
  0x36   : > { %9778 = vmatpush3.bf16.msra.mxu0 %v11153_v12  ;;  %8588 = vmatprep.mubr.msk.f32.mxu0 %vm11040_vm0, %v14370_v5  ;;  %v14568_v12 = vand.u32 4294901760, %v11216_v32 }
  0x37   : > { %9780 = vmatprep.subr.bf16.mxu0 %v11453_v10 }
  0x38   : > { %v11478_v19 = vpack.c.bf16 %v14568_v12, %v14567_v9  ;;  %v1074_v9 = vand.u32 4294901760, %v994_v6  ;;  %v11545_v12 = vsub.f32 %v992_v4, %v1068_v43  ;;  %v11573_v4 = vpack.c.bf16 %v1064_v30, %v1060_v40 }
  0x3a   : > { %v11551_v20 = vsub.f32 %v994_v6, %v1074_v9  ;;  %v11579_v6 = vpack.c.bf16 %v1066_v52, %v1062_v3  ;;  %v11593_v40 = vpack.c.bf16 %v1074_v9, %v1070_v7  ;;  %v1130_v3 = vand.u32 4294901760, %v11170_v15 }
  0x3b   : > { %v1142_v52 = vand.u32 4294901760, %v11175_v16 }
  0x3c   : > { %14579 = vst [vmem:[#allocation5_spill] sm:$0xff] %v11593_v40 }
  0x3d   : > { %8589 = vmatmul.mubr.f32.vlgmr.msra.gmra.mrb[0].mxu0 %v11205_v29  ;;  %v14573_v29 = vand.u32 4294901760, %v11269_v50  ;;  %v14578_v50 = vand.u32 4294901760, %v11331_v21  ;;  %v1072_v21 = vand.u32 4294901760, %v995_v42 }
  0x3e   : > { %9782 = vmatpush1.bf16.msra.mxu0 %v11464_v18  ;;  %1116 = vmatprep.mubr.f32.mxu0 %v14370_v5  ;;  %v11583_v5 = vsub.f32 %v1000_v45, %v1082_v62  ;;  %v1268_v45 = vand.u32 4294901760, %v11528_v49 }
  0x3f   : > { %9784 = vmatprep.subr.bf16.mxu0 %v11470_v8  ;;  %v11500_v32 = vpack.c.bf16 %v14574_v31, %v14573_v29  ;;  %v11521_v51 = vpack.c.bf16 %v14578_v50, %v14577_v46  ;;  %v11547_v13 = vsub.f32 %v995_v42, %v1072_v21  ;;  %v1001_v29 = vld [vmem:[%s14342_s4 + $0x170] sm:$0xff]  ;;  %v9869_v46 = vpack.c.bf16 %v11551_v20, %v11549_v14 }
  0x40   : > { %v1080_v36 = vand.u32 4294901760, %v1001_v29  ;;  %v1078_v50 = vand.u32 4294901760, %v997_v44  ;;  %v11575_v42 = vsub.f32 %v998_v23, %v1076_v35  ;;  %v11591_v59 = vpack.c.bf16 %v1072_v21, %v1068_v43 }
  0x41   : > { %v9867_v31 = vpack.c.bf16 %v11547_v13, %v11545_v12  ;;  %v1143_v43 = vsub.f32 %v11175_v16, %v1142_v52  ;;  %v1274_v16 = vand.u32 4294901760, %v11545_v12 }
  0x42   : > { %9786 = vmatpush1.bf16.msra.mxu0 %v11478_v19  ;;  %v11577_v11 = vsub.f32 %v1001_v29, %v1080_v36  ;;  %v11581_v2 = vsub.f32 %v997_v44, %v1078_v50  ;;  %v11600_v23 = vpack.c.bf16 %v1080_v36, %v1076_v35  ;;  %v1131_v29 = vsub.f32 %v11170_v15, %v1130_v3 }
  0x43   : > { %9788 = vmatprep.subr.bf16.mxu0 %v11486_v17  ;;  %9868 = vmatprep.subr.bf16.mxu1 %v9867_v31  ;;  %v11604_v21 = vpack.c.bf16 %v1082_v62, %v1078_v50  ;;  %v1144_v9 = vand.u32 4294901760, %v1143_v43  ;;  %v1256_v44 = vand.u32 4294901760, %v11526_v60  ;;  %v1269_v15 = vsub.f32 %v11528_v49, %v1268_v45 }
  0x44   : > { %9870 = vmatpush1.bf16.msra.mxu1 %v9869_v46  ;;  %v9871_v63 = vpack.c.bf16 %v11577_v11, %v11575_v42  ;;  %v9873_v30 = vpack.c.bf16 %v11583_v5, %v11581_v2  ;;  %14580 = vst [vmem:[#allocation6_spill] sm:$0xff] %v11600_v23  ;;  %v1132_v7 = vand.u32 4294901760, %v1131_v29  ;;  %v1286_v36 = vand.u32 4294901760, %v11547_v13 }
  0x45   : > { %14581 = vst [vmem:[#allocation7_spill] sm:$0xff] %v11604_v21  ;;  %v1257_v35 = vsub.f32 %v11526_v60, %v1256_v44  ;;  %v1270_v50 = vand.u32 4294901760, %v1269_v15  ;;  %v1280_v62 = vand.u32 4294901760, %v11549_v14 }
  0x46   : > { %9790 = vmatpush1.bf16.msra.mxu0 %v11493_v28  ;;  %9872 = vmatprep.subr.bf16.mxu1 %v9871_v63  ;;  %v9811_v31 = vpack.c.bf16 %v1144_v9, %v1132_v7  ;;  %v1292_v63 = vand.u32 4294901760, %v11551_v20  ;;  %v1287_v29 = vsub.f32 %v11547_v13, %v1286_v36 }
  0x47   : > { %9792 = vmatprep.subr.bf16.mxu0 %v11500_v32  ;;  %v1258_v46 = vand.u32 4294901760, %v1257_v35  ;;  %v1281_v60 = vsub.f32 %v11549_v14, %v1280_v62  ;;  %v1310_v35 = vand.u32 4294901760, %v11577_v11 }
  0x48   : > { %9874 = vmatpush1.bf16.msra.mxu1 %v9873_v30  ;;  %v1275_v30 = vsub.f32 %v11545_v12, %v1274_v16  ;;  %v1293_v49 = vsub.f32 %v11551_v20, %v1292_v63  ;;  %v1288_v9 = vand.u32 4294901760, %v1287_v29  ;;  %v1316_v12 = vand.u32 4294901760, %v11583_v5 }
  0x49   : > { %9876 = vmatprep.subr.bf16.mxu1 %v11453_v10  ;;  %v11618_v43 = vpack.c.bf16 %v1270_v50, %v1258_v46  ;;  %v1282_v15 = vand.u32 4294901760, %v1281_v60  ;;  %v1311_v14 = vsub.f32 %v11577_v11, %v1310_v35 }
  0x4a   : > { %9794 = vmatpush1.bf16.msra.mxu0 %v11507_v37  ;;  %v1276_v7 = vand.u32 4294901760, %v1275_v30  ;;  %v1294_v10 = vand.u32 4294901760, %v1293_v49  ;;  %v1317_v50 = vsub.f32 %v11583_v5, %v1316_v12  ;;  %v11634_v30 = vpack.c.bf16 %v1142_v52, %v1130_v3  ;;  %v7967_v52 = vld [vmem:[%s14341_s3] ss:$0 sm:$0xff] }
  0x4b   : > { %9796 = vmatprep.subr.bf16.mxu0 %v11521_v51  ;;  %14582 = vst [vmem:[#allocation8_spill] sm:$0xff] %v11618_v43  ;;  %v1312_v60 = vand.u32 4294901760, %v1311_v14 }
  0x4c   : > { %v11630_v46 = vpack.c.bf16 %v1294_v10, %v1282_v15  ;;  %v1318_v43 = vand.u32 4294901760, %v1317_v50  ;;  %v11644_v10 = vpack.c.bf16 %v1292_v63, %v1280_v62  ;;  %v14380_v62 = vand.u32 4294901760, %v11262_v47 }
  0x4d   : > { %v14381_v63 = vand.u32 4294901760, %v11294_v58 }
  0x4e   : > { %9798 = vmatpush1.bf16.msra.mxu0 %v11523_v61 }
  0x4f   : > { %9800 = vmatprep.subr.bf16.mxu0 %v11573_v4 }
  0x52   : > { %9802 = vmatpush1.bf16.msra.mxu0 %v11579_v6 }
  0x53   : > { %9804 = vmatprep.subr.bf16.mxu0 %v11591_v59 }
  0x56   : > { %9806 = vmatpush1.bf16.msra.mxu0 %v11593_v40 }
  0x57   : > { %9808 = vmatprep.subr.bf16.mxu0 %v11600_v23  ;;  %v11626_v23 = vpack.c.bf16 %v1288_v9, %v1276_v7  ;;  %v11640_v9 = vpack.c.bf16 %v1268_v45, %v1256_v44  ;;  %v14384_v44 = vand.u32 4294901760, %v11239_v39 }
  0x5a   : > { %9810 = vmatpush1.bf16.msra.mxu0 %v11604_v21  ;;  %v1304_v21 = vand.u32 4294901760, %v11581_v2 }
  0x5b   : > { %9812 = vmatprep.subr.bf16.mxu0 %v9811_v31  ;;  %v1298_v31 = vand.u32 4294901760, %v11575_v42 }
  0x5c   : > { %v1305_v20 = vsub.f32 %v11581_v2, %v1304_v21  ;;  %v11648_v2 = vpack.c.bf16 %v1316_v12, %v1304_v21  ;;  %v14379_v21 = vand.u32 4294901760, %v11289_v57  ;;  %v14386_v12 = vand.u32 4294901760, %v11314_v1 }
  0x5d   : > { %v1299_v13 = vsub.f32 %v11575_v42, %v1298_v31  ;;  %v11642_v42 = vpack.c.bf16 %v1286_v36, %v1274_v16  ;;  %v11646_v11 = vpack.c.bf16 %v1310_v35, %v1298_v31  ;;  %v14382_v36 = vand.u32 4294901760, %v11244_v41 }
  0x5e   : > { %v1306_v49 = vand.u32 4294901760, %v1305_v20  ;;  %14584 = vst [vmem:[#allocation10_spill] sm:$0xff] %v11648_v2  ;;  %v14383_v31 = vand.u32 4294901760, %v11309_v0  ;;  %v1149_v20 = vsub.f32 %v11239_v39, %v14384_v44 }
  0x5f   : > { %v1300_v29 = vand.u32 4294901760, %v1299_v13  ;;  %14583 = vst [vmem:[#allocation9_spill] sm:$0xff] %v11646_v11  ;;  %v14391_v11 = vand.u32 4294901760, %v11403_v26 }
  0x60   : > { %v11638_v7 = vpack.c.bf16 %v1318_v43, %v1306_v49  ;;  %v14385_v43 = vand.u32 4294901760, %v11234_v38  ;;  %v1161_v49 = vsub.f32 %v11289_v57, %v14379_v21  ;;  %v1150_v21 = vand.u32 4294901760, %v1149_v20 }
  0x61   : > { %v11636_v40 = vpack.c.bf16 %v1312_v60, %v1300_v29  ;;  %v1155_v29 = vsub.f32 %v11244_v41, %v14382_v36  ;;  %v1167_v60 = vsub.f32 %v11262_v47, %v14380_v62  ;;  %v14390_v62 = vand.u32 4294901760, %v11350_v33 }
  0x62   : > { %v1137_v14 = vsub.f32 %v11234_v38, %v14385_v43  ;;  %v1162_v43 = vand.u32 4294901760, %v1161_v49  ;;  %v14586_v20 = vand.u32 4294901760, %v11342_v25 }
  0x63   : > { %v1168_v44 = vand.u32 4294901760, %v1167_v60 }
  0xf2   : > { %v568_v5 = vpop.f32.mrb[0].mxu1 }
  0xf3   : > { %v8555_v3 = vpop.f32.mrb[1].mxu1  ;;  %v569_v15 = vadd.f32 %v7967_v52, %v568_v5  ;;  %v1173_v5 = vsub.f32 %v11294_v58, %v14381_v63  ;;  %v14387_v52 = vand.u32 4294901760, %v11337_v22  ;;  %v14587_v63 = vmov 0.0  }
  0xf4   : > { %v1179_v3 = vsub.f32 %v11309_v0, %v14383_v31  ;;  %v1156_v31 = vand.u32 4294901760, %v1155_v29 }
 0x110   : > { %v950_v13 = vpop.f32.mrb[0].mxu0 }
 0x111   : > { %v10884_v45 = vadd.f32 %v950_v13, %v569_v15  ;;  %v8590_v16 = vpop.f32.mrb[1].mxu0  ;;  %v1180_v15 = vand.u32 4294901760, %v1179_v3 }
 0x112   : > { %v1138_v16 = vand.u32 4294901760, %v1137_v14  ;;  %v1185_v14 = vsub.f32 %v11337_v22, %v14387_v52  ;;  %v1203_v52 = vsub.f32 %v11350_v33, %v14390_v62  ;;  %v14589_v62 = vand.u32 4294901760, %v11388_v55 }
 0x113   : > { %v954_v35 = vmax.f32 %v10884_v45, 0.0  ;;  %v1191_v45 = vsub.f32 %v11314_v1, %v14386_v12  ;;  %v1197_v12 = vsub.f32 %v11342_v25, %v14586_v20 }
 0x114   : > { %v9813_v3 = vpack.c.bf16 %v1150_v21, %v1138_v16 }
 0x115   : > { %v11667_v50 = vand.u32 4294901760, %v954_v35  ;;  %v1192_v60 = vand.u32 4294901760, %v1191_v45  ;;  %v1198_v16 = vand.u32 4294901760, %v1197_v12  ;;  %v1227_v12 = vsub.f32 %v11403_v26, %v14391_v11 }
 0x117   : > { %v11687_v13 = vsub.f32 %v954_v35, %v11667_v50  ;;  %v1174_v35 = vand.u32 4294901760, %v1173_v5  ;;  %v1186_v5 = vand.u32 4294901760, %v1185_v14  ;;  %v9819_v21 = vpack.c.bf16 %v1192_v60, %v1180_v15 }
 0x118   : > { %v1250_v14 = vand.u32 4294901760, %v11429_v24  ;;  %v1228_v11 = vand.u32 4294901760, %v1227_v12 }
 0x119   : > { %14585 = vst [vmem:[#allocation11_spill] sm:$0xff] %v11687_v13  ;;  %v11695_v36 = vand.u32 4294901760, %v11687_v13  ;;  %1491 = vmatmul.mubr.f32.vlgmr.msra.gmra.mrb[2].mxu1 %v11687_v13  ;;  %v9817_v49 = vpack.c.bf16 %v1174_v35, %v1162_v43  ;;  %v1232_v43 = vand.u32 4294901760, %v11419_v53  ;;  %v1244_v35 = vand.u32 4294901760, %v11422_v54 }
 0x11a   : > { %9878 = vmatpush1.bf16.msra.mxu1 %v11464_v18  ;;  %1593 = vmatprep.mubr.f32.mxu1 %v14587_v63  ;;  %v14588_v18 = vand.u32 4294901760, %v11355_v34  ;;  %v9821_v60 = vpack.c.bf16 %v1198_v16, %v1186_v5  ;;  %v14592_v5 = vand.u32 4294901760, %v11434_v56 }
 0x11b   : > { %9880 = vmatprep.subr.bf16.mxu1 %v11470_v8  ;;  %v1120_v29 = vsub.f32 %v11687_v13, %v11695_v36  ;;  %v9815_v8 = vpack.c.bf16 %v1168_v44, %v1156_v31  ;;  %v14590_v44 = vand.u32 4294901760, %v11395_v48  ;;  %v1251_v13 = vsub.f32 %v11429_v24, %v1250_v14  ;;  %v11880_v24 = vld [vmem:[%s14342_s4 + $0x118] sm:$0xff] }
 0x11c   : > { %v1215_v20 = vsub.f32 %v11355_v34, %v14588_v18  ;;  %v1209_v18 = vsub.f32 %v11388_v55, %v14589_v62  ;;  %v14591_v62 = vand.u32 4294901760, %v11408_v27 }
 0x11d   : > { %v11717_v2 = vand.u32 4294901760, %v1120_v29  ;;  %v1221_v31 = vsub.f32 %v11395_v48, %v14590_v44  ;;  %v1204_v29 = vand.u32 4294901760, %v1203_v52  ;;  %v1233_v44 = vsub.f32 %v11419_v53, %v1232_v43  ;;  %v11875_v53 = vld [vmem:[%s14342_s4 + $0x100] sm:$0xff] }
 0x11e   : > { %9882 = vmatpush1.bf16.msra.mxu1 %v11478_v19  ;;  %v1216_v45 = vand.u32 4294901760, %v1215_v20  ;;  %v1239_v15 = vsub.f32 %v11408_v27, %v14591_v62  ;;  %v1245_v62 = vsub.f32 %v11422_v54, %v1244_v35 }
 0x11f   : > { %1122 = vmatmul.mubr.f32.vlgmr.msra.gmra.mrb[2].mxu0 %v11717_v2  ;;  %9884 = vmatprep.subr.bf16.mxu1 %v11486_v17  ;;  %v1222_v20 = vand.u32 4294901760, %v1221_v31  ;;  %v1234_v16 = vand.u32 4294901760, %v1233_v44  ;;  %v1252_v31 = vand.u32 4294901760, %v1251_v13  ;;  %v957_v13 = vld [vmem:[%s14342_s4 + $0x10] sm:$0xff]  ;;  %v14598_v44 = vand.u32 4294901760, %v11239_v39  ;;  %v966_v39 = vld [vmem:[%s14342_s4 + $0x58] sm:$0xff] }
 0x120   : > { %9814 = vmatpush1.bf16.msra.mxu0 %v9813_v3  ;;  %1352 = vmatprep.mubr.f32.mxu0 %v14587_v63  ;;  %v1210_v3 = vand.u32 4294901760, %v1209_v18  ;;  %v1240_v52 = vand.u32 4294901760, %v1239_v15  ;;  %v1246_v18 = vand.u32 4294901760, %v1245_v62 }
 0x121   : > { %9816 = vmatprep.subr.bf16.mxu0 %v9815_v8  ;;  %v9823_v8 = vpack.c.bf16 %v1216_v45, %v1204_v29 }
 0x122   : > { %9886 = vmatpush1.bf16.msra.mxu1 %v11493_v28  ;;  %v9825_v45 = vpack.c.bf16 %v1222_v20, %v1210_v3  ;;  %v9829_v12 = vpack.c.bf16 %v1246_v18, %v1234_v16  ;;  %v14594_v3 = vld [vmem:[#allocation6_spill] sm:$0xff]  ;;  %v14597_v20 = vand.u32 4294901760, %v11234_v38 }
 0x123   : > { %9888 = vmatprep.subr.bf16.mxu1 %v11500_v32  ;;  %v963_v38 = vld [vmem:[%s14342_s4 + $0x40] sm:$0xff] }
 0x124   : > { %9818 = vmatpush1.bf16.msra.mxu0 %v9817_v49  ;;  %v1263_v49 = vsub.f32 %v11434_v56, %v14592_v5  ;;  %v9909_v62 = vpack.c.bf16 %v14598_v44, %v14597_v20  ;;  %v14599_v5 = vand.u32 4294901760, %v11244_v41  ;;  %v14601_v41 = vand.u32 4294901760, %v11289_v57  ;;  %v969_v57 = vld [vmem:[%s14342_s4 + $0x70] sm:$0xff] }
 0x125   : > { %9820 = vmatprep.subr.bf16.mxu0 %v9819_v21  ;;  %v9827_v21 = vpack.c.bf16 %v1240_v52, %v1228_v11  ;;  %v14595_v11 = vld [vmem:[#allocation8_spill] sm:$0xff]  ;;  %v960_v52 = vld [vmem:[%s14342_s4 + $0x28] sm:$0xff] }
 0x126   : > { %9890 = vmatpush1.bf16.msra.mxu1 %v11507_v37  ;;  %v1264_v29 = vand.u32 4294901760, %v1263_v49  ;;  %v1879_v16 = vand.u32 4294901760, %v960_v52 }
 0x127   : > { %9892 = vmatprep.subr.bf16.mxu1 %v11521_v51 }
 0x128   : > { %9822 = vmatpush1.bf16.msra.mxu0 %v9821_v60  ;;  %v9831_v15 = vpack.c.bf16 %v1264_v29, %v1252_v31  ;;  %v14593_v60 = vld [vmem:[#allocation5_spill] sm:$0xff]  ;;  %v1882_v31 = vand.u32 4294901760, %v963_v38  ;;  %v1885_v29 = vand.u32 4294901760, %v966_v39 }
 0x129   : > { %9824 = vmatprep.subr.bf16.mxu0 %v9823_v8  ;;  %v14596_v8 = vld [vmem:[#allocation7_spill] sm:$0xff] }
 0x12a   : > { %9894 = vmatpush1.bf16.msra.mxu1 %v11523_v61  ;;  %v11821_v44 = vpack.c.bf16 %v1885_v29, %v1882_v31 }
 0x12b   : > { %9896 = vmatprep.subr.bf16.mxu1 %v11573_v4 }
 0x12c   : > { %9826 = vmatpush1.bf16.msra.mxu0 %v9825_v45  ;;  %v1876_v45 = vand.u32 4294901760, %v957_v13 }
 0x12d   : > { %9828 = vmatprep.subr.bf16.mxu0 %v9827_v21 }
 0x12e   : > { %9898 = vmatpush1.bf16.msra.mxu1 %v11579_v6  ;;  %v11800_v21 = vpack.c.bf16 %v1879_v16, %v1876_v45  ;;  %v11882_v54 = vsub.f32 %v957_v13, %v1876_v45  ;;  %v11900_v13 = vld [vmem:[%s14342_s4 + $0x148] sm:$0xff]  ;;  %v11905_v45 = vsub.f32 %v966_v39, %v1885_v29  ;;  %v14615_v39 = vld [vmem:[#allocation9_spill] sm:$0xff] }
 0x12f   : > { %9900 = vmatprep.subr.bf16.mxu1 %v11591_v59 }
 0x130   : > { %9830 = vmatpush1.bf16.msra.mxu0 %v9829_v12  ;;  %v14605_v12 = vmov 0.0|0.0  }
 0x131   : > { %9832 = vmatprep.subr.bf16.mxu0 %v9831_v15  ;;  %v14608_v15 = vand.u32 4294901760, %v11350_v33  ;;  %v14610_v33 = vand.u32 4294901760, %v11388_v55  ;;  %v11856_v55 = vld [vmem:[%s14342_s4 + $0xe8] sm:$0xff] }
 0x132   : > { %9902 = vmatpush1.bf16.msra.mxu1 %v14593_v60 }
 0x133   : > { %9904 = vmatprep.subr.bf16.mxu1 %v14594_v3 }
 0x134   : > { %9834 = vmatpush1.bf16.msra.mxu0 %v14595_v11  ;;  %v14609_v11 = vand.u32 4294901760, %v11355_v34  ;;  %v14611_v34 = vand.u32 4294901760, %v11395_v48  ;;  %v11851_v48 = vld [vmem:[%s14342_s4 + $0xd0] sm:$0xff] }
 0x135   : > { %9836 = vmatprep.subr.bf16.mxu0 %v11626_v23  ;;  %v14600_v23 = vand.u32 4294901760, %v11262_v47  ;;  %v14602_v47 = vand.u32 4294901760, %v11294_v58  ;;  %v11809_v58 = vld [vmem:[%s14342_s4 + $0x88] sm:$0xff] }
 0x136   : > { %9906 = vmatpush1.bf16.msra.mxu1 %v14596_v8  ;;  %v9919_v20 = vpack.c.bf16 %v14609_v11, %v14608_v15  ;;  %v11895_v15 = vld [vmem:[%s14342_s4 + $0x130] sm:$0xff] }
 0x137   : > { %9908 = vmatprep.subr.bf16.mxu1 %v11634_v30  ;;  %v9911_v49 = vpack.c.bf16 %v14600_v23, %v14599_v5  ;;  %v14603_v30 = vand.u32 4294901760, %v11309_v0  ;;  %v14606_v0 = vand.u32 4294901760, %v11337_v22  ;;  %v1891_v5 = vand.u32 4294901760, %v11809_v58  ;;  %v975_v22 = vld [vmem:[%s14342_s4 + $0xa0] sm:$0xff] }
 0x138   : > { %9838 = vmatpush1.bf16.msra.mxu0 %v11630_v46  ;;  %v9913_v46 = vpack.c.bf16 %v14602_v47, %v14601_v41  ;;  %v9921_v23 = vpack.c.bf16 %v14611_v34, %v14610_v33  ;;  %v14613_v41 = vand.u32 4294901760, %v11408_v27  ;;  %v14614_v27 = vand.u32 4294901760, %v11434_v56 }
 0x139   : > { %1597 = vmatmul.mubr.f32.vlgmr.msra.gmra.mrb[2].mxu1 %v11695_v36  ;;  %9840 = vmatprep.subr.bf16.mxu0 %v11636_v40  ;;  %v14604_v40 = vand.u32 4294901760, %v11314_v1  ;;  %v14607_v1 = vand.u32 4294901760, %v11342_v25  ;;  %v11833_v25 = vld [vmem:[%s14342_s4 + $0xb8] sm:$0xff]  ;;  %v11884_v56 = vsub.f32 %v960_v52, %v1879_v16  ;;  %v11903_v52 = vsub.f32 %v963_v38, %v1882_v31 }
 0x13a   : > { %9910 = vmatpush1.bf16.msra.mxu1 %v9909_v62  ;;  %1763 = vmatprep.mubr.f32.mxu1 %v14587_v63  ;;  %v1888_v62 = vand.u32 4294901760, %v969_v57  ;;  %v14396_v16 = vand.u32 4294901760, %v11882_v54  ;;  %v1912_v33 = vand.u32 4294901760, %v11895_v15  ;;  %v1915_v34 = vand.u32 4294901760, %v11900_v13 }
 0x13b   : > { %9912 = vmatprep.subr.bf16.mxu1 %v9911_v49  ;;  %v9915_v18 = vpack.c.bf16 %v14604_v40, %v14603_v30  ;;  %v14612_v49 = vand.u32 4294901760, %v11403_v26  ;;  %v1894_v30 = vand.u32 4294901760, %v975_v22  ;;  %v1897_v40 = vand.u32 4294901760, %v11833_v25 }
 0x13c   : > { %9842 = vmatpush1.bf16.msra.mxu0 %v11638_v7  ;;  %v9917_v7 = vpack.c.bf16 %v14607_v1, %v14606_v0  ;;  %v9925_v26 = vpack.c.bf16 %v1244_v35, %v1232_v43  ;;  %v1900_v1 = vand.u32 4294901760, %v11851_v48  ;;  %v1906_v35 = vand.u32 4294901760, %v11875_v53 }
 0x13d   : > { %9971 = vmatprep.subr.bf16.mxu0 %v14605_v12  ;;  %v9923_v47 = vpack.c.bf16 %v14613_v41, %v14612_v49  ;;  %v11867_v0 = vpack.c.bf16 %v1897_v40, %v1894_v30  ;;  %v14393_v11 = vand.u32 4294901760, %v11884_v56  ;;  %v11926_v38 = vsub.f32 %v969_v57, %v1888_v62 }
 0x13e   : > { %9914 = vmatpush1.bf16.msra.mxu1 %v9913_v46  ;;  %v11844_v46 = vpack.c.bf16 %v1891_v5, %v1888_v62  ;;  %v1970_v31 = vsub.f32 %v11882_v54, %v14396_v16  ;;  %v14394_v49 = vand.u32 4294901760, %v11905_v45  ;;  %v11939_v41 = vsub.f32 %v11809_v58, %v1891_v5 }
 0x13f   : > { %1354 = vmatmul.mubr.f32.vlgmr.msra.gmra.mrb[2].mxu0 %v11667_v50  ;;  %9916 = vmatprep.subr.bf16.mxu1 %v9915_v18  ;;  %v9927_v18 = vpack.c.bf16 %v14614_v27, %v1250_v14  ;;  %v1909_v14 = vand.u32 4294901760, %v11880_v24  ;;  %v1977_v29 = vsub.f32 %v11884_v56, %v14393_v11  ;;  %v14617_v27 = vld [vmem:[#allocation2_spill] sm:$0xff]  ;;  %v11960_v11 = vsub.f32 %v11833_v25, %v1897_v40  ;;  %v14619_v40 = vld [vmem:[#allocation4_spill] sm:$0xff] }
 0x140   : > { %9973 = vmatpush3.bf16.msra.mxu0 %v11800_v21  ;;  %8623 = vmatprep.mubr.msk.f32.mxu0 %vm11040_vm0, %v14587_v63  ;;  %v1971_v58 = vand.u32 4294901760, %v1970_v31  ;;  %v2004_v31 = vand.u32 4294901760, %v11939_v41 }
 0x141   : > { %9974 = vmatprep.subr.bf16.mxu0 %v14605_v12  ;;  %v1978_v5 = vand.u32 4294901760, %v1977_v29  ;;  %v11972_v29 = vsub.f32 %v11851_v48, %v1900_v1 }
 0x142   : > { %9918 = vmatpush1.bf16.msra.mxu1 %v9917_v7  ;;  %v1903_v7 = vand.u32 4294901760, %v11856_v55  ;;  %v2005_v48 = vsub.f32 %v11939_v41, %v2004_v31 }
 0x143   : > { %9920 = vmatprep.subr.bf16.mxu1 %v9919_v20  ;;  %v11911_v20 = vpack.c.bf16 %v1909_v14, %v1906_v35 }
 0x144   : > { %9976 = vmatpush3.bf16.msra.mxu0 %v11821_v44  ;;  %v11887_v43 = vpack.c.bf16 %v1903_v7, %v1900_v1  ;;  %v11977_v25 = vsub.f32 %v11856_v55, %v1903_v7  ;;  %v2018_v55 = vand.u32 4294901760, %v11960_v11  ;;  %v11991_v7 = vsub.f32 %v11875_v53, %v1906_v35 }
 0x145   : > { %9977 = vmatprep.subr.bf16.mxu0 %v14605_v12 }
 0x146   : > { %9922 = vmatpush1.bf16.msra.mxu1 %v9921_v23  ;;  %v14395_v23 = vand.u32 4294901760, %v11903_v52  ;;  %v2039_v35 = vand.u32 4294901760, %v11991_v7 }
 0x147   : > { %9924 = vmatprep.subr.bf16.mxu1 %v9923_v47  ;;  %v11949_v47 = vsub.f32 %v975_v22, %v1894_v30  ;;  %v1997_v30 = vand.u32 4294901760, %v11926_v38 }
 0x148   : > { %9979 = vmatpush3.bf16.msra.mxu0 %v11844_v46 }
 0x149   : > { %9980 = vmatprep.subr.bf16.mxu0 %v14605_v12  ;;  %v1998_v16 = vsub.f32 %v11926_v38, %v1997_v30  ;;  %v2011_v1 = vand.u32 4294901760, %v11949_v47 }
 0x14a   : > { %9926 = vmatpush1.bf16.msra.mxu1 %v9925_v26  ;;  %v14616_v26 = vld [vmem:[#allocation10_spill] sm:$0xff] }
 0x14b   : > { %9928 = vmatprep.subr.bf16.mxu1 %v9927_v18  ;;  %v1984_v18 = vsub.f32 %v11903_v52, %v14395_v23  ;;  %v2012_v53 = vsub.f32 %v11949_v47, %v2011_v1 }
 0x14c   : > { %9982 = vmatpush3.bf16.msra.mxu0 %v11867_v0 }
 0x14d   : > { %9983 = vmatprep.subr.bf16.mxu0 %v14605_v12 }
 0x14e   : > { %9930 = vmatpush1.bf16.msra.mxu1 %v11640_v9  ;;  %v11919_v9 = vld [vmem:[%s14342_s4 + $0x160] sm:$0xff] }
 0x14f   : > { %9932 = vmatprep.subr.bf16.mxu1 %v11642_v42  ;;  %v11924_v42 = vld [vmem:[%s14342_s4 + $0x178] sm:$0xff]  ;;  %v1918_v57 = vand.u32 4294901760, %v11919_v9 }
 0x150   : > { %9985 = vmatpush3.bf16.msra.mxu0 %v11887_v43  ;;  %v1921_v62 = vand.u32 4294901760, %v11924_v42 }
 0x151   : > { %9986 = vmatprep.subr.bf16.mxu0 %v14605_v12 }
 0x152   : > { %9934 = vmatpush1.bf16.msra.mxu1 %v11644_v10  ;;  %v11944_v10 = vpack.c.bf16 %v1915_v34, %v1912_v33  ;;  %v11965_v22 = vpack.c.bf16 %v1921_v62, %v1918_v57 }
 0x153   : > { %9936 = vmatprep.subr.bf16.mxu1 %v14615_v39  ;;  %v1991_v39 = vsub.f32 %v11905_v45, %v14394_v49  ;;  %v1985_v49 = vand.u32 4294901760, %v1984_v18  ;;  %v2025_v18 = vand.u32 4294901760, %v11972_v29 }
 0x154   : > { %9988 = vmatpush3.bf16.msra.mxu0 %v11911_v20 }
 0x155   : > { %9989 = vmatprep.subr.bf16.mxu0 %v14605_v12  ;;  %v1992_v23 = vand.u32 4294901760, %v1991_v39  ;;  %v2032_v39 = vand.u32 4294901760, %v11977_v25 }
 0x156   : > { %9938 = vmatpush1.bf16.msra.mxu1 %v14616_v26  ;;  %v14618_v26 = vld [vmem:[#allocation3_spill] sm:$0xff] }
 0x157   : > { %9940 = vmatprep.subr.bf16.mxu1 %v14617_v27  ;;  %v9996_v27 = vpack.c.bf16 %v1978_v5, %v1971_v58  ;;  %v11995_v58 = vsub.f32 %v11880_v24, %v1909_v14  ;;  %v9999_v5 = vpack.c.bf16 %v1992_v23, %v1985_v49  ;;  %v2033_v24 = vsub.f32 %v11977_v25, %v2032_v39 }
 0x158   : > { %9991 = vmatpush3.bf16.msra.mxu0 %v11944_v10 }
 0x159   : > { %1765 = vmatmul.mubr.f32.vlgmr.msra.gmra.mrb[2].mxu1 %v11667_v50  ;;  %9992 = vmatprep.subr.bf16.mxu0 %v14605_v12  ;;  %v2046_v14 = vand.u32 4294901760, %v11995_v58  ;;  %v2034_v49 = vand.u32 4294901760, %v2033_v24 }
 0x15a   : > { %9942 = vmatpush1.bf16.msra.mxu1 %v14618_v26  ;;  %1867 = vmatprep.mubr.f32.mxu1 %v14587_v63  ;;  %v1999_v26 = vand.u32 4294901760, %v1998_v16 }
 0x15b   : > { %9944 = vmatprep.subr.bf16.mxu1 %v14619_v40  ;;  %v2006_v40 = vand.u32 4294901760, %v2005_v48 }
 0x15c   : > { %9994 = vmatpush3.bf16.msra.mxu0 %v11965_v22 }
 0x15d   : > { %9995 = vmatprep.subr.bf16.mxu0 %v14605_v12 }
 0x15e   : > { %9946 = vmatpush1.bf16.msra.mxu1 %v11478_v19  ;;  %v2019_v19 = vsub.f32 %v11960_v11, %v2018_v55 }
 0x15f   : > { %8624 = vmatmul.mubr.f32.vlgmr.msra.gmra.mrb[4].mxu0 %v11717_v2  ;;  %9948 = vmatprep.subr.bf16.mxu1 %v11486_v17  ;;  %v12011_v17 = vsub.f32 %v11895_v15, %v1912_v33  ;;  %v2026_v2 = vsub.f32 %v11972_v29, %v2025_v18  ;;  %v12026_v15 = vsub.f32 %v11900_v13, %v1915_v34 }
 0x160   : > { %9997 = vmatpush3.bf16.msra.mxu0 %v9996_v27  ;;  %8658 = vmatprep.mubr.msk.f32.mxu0 %vm11040_vm0, %v14587_v63  ;;  %v2020_v16 = vand.u32 4294901760, %v2019_v19  ;;  %v12030_v33 = vsub.f32 %v11919_v9, %v1918_v57  ;;  %v2040_v13 = vsub.f32 %v11991_v7, %v2039_v35  ;;  %v2047_v34 = vsub.f32 %v11995_v58, %v2046_v14 }
 0x161   : > { %9998 = vmatprep.subr.bf16.mxu0 %v14605_v12  ;;  %v2027_v23 = vand.u32 4294901760, %v2026_v2  ;;  %v12043_v27 = vsub.f32 %v11924_v42, %v1921_v62 }
 0x162   : > { %9950 = vmatpush1.bf16.msra.mxu1 %v11493_v28  ;;  %v10002_v28 = vpack.c.bf16 %v2006_v40, %v1999_v26  ;;  %v2041_v48 = vand.u32 4294901760, %v2040_v13  ;;  %v2067_v26 = vand.u32 4294901760, %v12030_v33 }
 0x163   : > { %9952 = vmatprep.subr.bf16.mxu1 %v11500_v32  ;;  %v2013_v32 = vand.u32 4294901760, %v2012_v53  ;;  %v10008_v57 = vpack.c.bf16 %v2034_v49, %v2027_v23  ;;  %v2074_v40 = vand.u32 4294901760, %v12043_v27  ;;  %v10035_v23 = vpack.c.bf16 %v11995_v58, %v11991_v7 }
 0x164   : > { %10000 = vmatpush3.bf16.msra.mxu0 %v9999_v5  ;;  %v2048_v5 = vand.u32 4294901760, %v2047_v34  ;;  %v2068_v19 = vsub.f32 %v12030_v33, %v2067_v26  ;;  %v10038_v49 = vpack.c.bf16 %v12026_v15, %v12011_v17  ;;  %v10041_v13 = vpack.c.bf16 %v12043_v27, %v12030_v33  ;;  %v14620_v34 = vld [vmem:[#allocation11_spill] sm:$0xff] }
 0x165   : > { %10001 = vmatprep.subr.bf16.mxu0 %v14605_v12  ;;  %v10005_v9 = vpack.c.bf16 %v2020_v16, %v2013_v32  ;;  %v2075_v2 = vsub.f32 %v12043_v27, %v2074_v40  ;;  %v10029_v32 = vpack.c.bf16 %v11960_v11, %v11949_v47  ;;  %v10032_v16 = vpack.c.bf16 %v11977_v25, %v11972_v29 }
 0x166   : > { %9954 = vmatpush1.bf16.msra.mxu1 %v11507_v37  ;;  %v2053_v37 = vand.u32 4294901760, %v12011_v17  ;;  %v10089_v11 = vpack.c.bf16 %v2074_v40, %v2067_v26 }
 0x167   : > { %9956 = vmatprep.subr.bf16.mxu1 %v11521_v51  ;;  %v2060_v51 = vand.u32 4294901760, %v12026_v15  ;;  %v2076_v24 = vand.u32 4294901760, %v2075_v2 }
 0x168   : > { %10003 = vmatpush3.bf16.msra.mxu0 %v10002_v28  ;;  %v2054_v42 = vsub.f32 %v12011_v17, %v2053_v37 }
 0x169   : > { %10004 = vmatprep.subr.bf16.mxu0 %v14605_v12  ;;  %v2061_v62 = vsub.f32 %v12026_v15, %v2060_v51 }
 0x16a   : > { %9958 = vmatpush1.bf16.msra.mxu1 %v11523_v61  ;;  %v10011_v61 = vpack.c.bf16 %v2048_v5, %v2041_v48  ;;  %v14623_v5 = vand.u32 4294901760, %v11903_v52 }
 0x16b   : > { %9960 = vmatprep.subr.bf16.mxu1 %v11573_v4  ;;  %v2055_v4 = vand.u32 4294901760, %v2054_v42  ;;  %v2062_v53 = vand.u32 4294901760, %v2061_v62  ;;  %v14624_v42 = vand.u32 4294901760, %v11905_v45 }
 0x16c   : > { %10006 = vmatpush3.bf16.msra.mxu0 %v10005_v9  ;;  %v14621_v9 = vand.u32 4294901760, %v11882_v54 }
 0x16d   : > { %10007 = vmatprep.subr.bf16.mxu0 %v14605_v12  ;;  %v10071_v62 = vpack.c.bf16 %v14624_v42, %v14623_v5 }
 0x16e   : > { %9962 = vmatpush1.bf16.msra.mxu1 %v11579_v6  ;;  %v10014_v6 = vpack.c.bf16 %v2062_v53, %v2055_v4  ;;  %v12234_v53 = vld [vmem:[%s475_s26] sm:$0xff] }
 0x16f   : > { %9964 = vmatprep.subr.bf16.mxu1 %v11591_v59  ;;  %v2069_v59 = vand.u32 4294901760, %v2068_v19  ;;  %14626 = vst [vmem:[#allocation6_spill] sm:$0xff] %v12234_v53  ;;  %vm2965_vm2 = vcmp.ne.f32.partialorder %v12234_v53, 0.0  ;;  %v12628_v53 = vld [vmem:[%s14346_s8 + $0xa0] sm:$0xff] }
 0x170   : > { %10009 = vmatpush3.bf16.msra.mxu0 %v10008_v57  ;;  %v14622_v57 = vand.u32 4294901760, %v11884_v56 }
 0x171   : > { %10010 = vmatprep.subr.bf16.mxu0 %v14605_v12  ;;  %v10017_v28 = vpack.c.bf16 %v2076_v24, %v2069_v59 }
 0x172   : > { %9966 = vmatpush1.bf16.msra.mxu1 %v14593_v60  ;;  %v10020_v60 = vpack.c.bf16 %v11884_v56, %v11882_v54  ;;  %v10068_v48 = vpack.c.bf16 %v14622_v57, %v14621_v9  ;;  %v10074_v54 = vpack.c.bf16 %v2004_v31, %v1997_v30  ;;  %v10080_v56 = vpack.c.bf16 %v2032_v39, %v2025_v18  ;;  %v3432_v57 = vld [vmem:[%s14344_s6 + $0x20] sm:$0xff] }
 0x173   : > { %9968 = vmatprep.subr.bf16.mxu1 %v14594_v3  ;;  %v10023_v3 = vpack.c.bf16 %v11905_v45, %v11903_v52  ;;  %v10083_v52 = vpack.c.bf16 %v2046_v14, %v2039_v35  ;;  %v10086_v45 = vpack.c.bf16 %v2060_v51, %v2053_v37  ;;  %v3464_v42 = vand.u32 4294901760, %v3432_v57 }
 0x174   : > { %10012 = vmatpush3.bf16.msra.mxu0 %v10011_v61 }
 0x175   : > { %10013 = vmatprep.subr.bf16.mxu0 %v14605_v12 }
 0x176   : > { %9970 = vmatpush1.bf16.msra.mxu1 %v14596_v8  ;;  %v10026_v8 = vpack.c.bf16 %v11939_v41, %v11926_v38 }
 0x177   : > { %8801 = vmatprep.subr.mxu1 %v14587_v63 }
 0x178   : > { %10015 = vmatpush3.bf16.msra.mxu0 %v10014_v6 }
 0x179   : > { %1869 = vmatmul.mubr.f32.vlgmr.msra.gmra.mrb[2].mxu1 %v11667_v50  ;;  %10016 = vmatprep.subr.bf16.mxu0 %v14605_v12 }
 0x17a   : > { %8803 = vmatprep.mubr.msk.f32.mxu1 %vm11040_vm0, %v14587_v63 }
 0x17c   : > { %10018 = vmatpush3.bf16.msra.mxu0 %v10017_v28 }
 0x17d   : > { %10019 = vmatprep.subr.bf16.mxu0 %v14605_v12 }
 0x17f   : > { %8659 = vmatmul.mubr.f32.vlgmr.msra.gmra.mrb[4].mxu0 %v11667_v50 }
 0x180   : > { %10021 = vmatpush3.bf16.msra.mxu0 %v10020_v60  ;;  %8693 = vmatprep.mubr.msk.f32.mxu0 %vm11040_vm0, %v14587_v63 }
 0x181   : > { %10022 = vmatprep.subr.bf16.mxu0 %v14605_v12 }
 0x184   : > { %10024 = vmatpush3.bf16.msra.mxu0 %v10023_v3 }
 0x185   : > { %10025 = vmatprep.subr.bf16.mxu0 %v14605_v12 }
 0x188   : > { %10027 = vmatpush3.bf16.msra.mxu0 %v10026_v8 }
 0x189   : > { %10028 = vmatprep.subr.bf16.mxu0 %v14605_v12 }
 0x18c   : > { %10030 = vmatpush3.bf16.msra.mxu0 %v10029_v32  ;;  %v3428_v32 = vld [vmem:[%s14344_s6] sm:$0xff] }
 0x18d   : > { %10031 = vmatprep.subr.bf16.mxu0 %v14605_v12 }
 0x190   : > { %10033 = vmatpush3.bf16.msra.mxu0 %v10032_v16  ;;  %v3429_v16 = vld [vmem:[%s14344_s6 + $0x8] sm:$0xff] }
 0x191   : > { %10034 = vmatprep.subr.bf16.mxu0 %v14605_v12 }
 0x194   : > { %10036 = vmatpush3.bf16.msra.mxu0 %v10035_v23  ;;  %v3430_v23 = vld [vmem:[%s14344_s6 + $0x10] sm:$0xff] }
 0x195   : > { %10037 = vmatprep.subr.bf16.mxu0 %v14605_v12  ;;  %v3458_v9 = vand.u32 4294901760, %v3430_v23 }
 0x198   : > { %10039 = vmatpush3.bf16.msra.mxu0 %v10038_v49  ;;  %v3452_v49 = vand.u32 4294901760, %v3428_v32 }
 0x199   : > { %10040 = vmatprep.subr.bf16.mxu0 %v14605_v12 }
 0x19c   : > { %10042 = vmatpush3.bf16.msra.mxu0 %v10041_v13  ;;  %v3455_v13 = vand.u32 4294901760, %v3429_v16 }
 0x19d   : > { %10043 = vmatprep.subr.bf16.mxu0 %v14605_v12 }
 0x19f   : > { %8694 = vmatmul.mubr.f32.vlgmr.msra.gmra.mrb[4].mxu0 %v14620_v34  ;;  %v3431_v34 = vld [vmem:[%s14344_s6 + $0x18] sm:$0xff] }
 0x1a0   : > { %10045 = vmatpush3.bf16.msra.mxu0 %v11800_v21  ;;  %8728 = vmatprep.mubr.msk.f32.mxu0 %vm11040_vm0, %v14587_v63  ;;  %v3461_v5 = vand.u32 4294901760, %v3431_v34 }
 0x1a1   : > { %10046 = vmatprep.subr.bf16.mxu0 %v14605_v12 }
 0x1a4   : > { %10048 = vmatpush3.bf16.msra.mxu0 %v11821_v44 }
 0x1a5   : > { %10049 = vmatprep.subr.bf16.mxu0 %v14605_v12 }
 0x1a8   : > { %10051 = vmatpush3.bf16.msra.mxu0 %v11844_v46 }
 0x1a9   : > { %10052 = vmatprep.subr.bf16.mxu0 %v14605_v12 }
 0x1ac   : > { %10054 = vmatpush3.bf16.msra.mxu0 %v11867_v0 }
 0x1ad   : > { %10055 = vmatprep.subr.bf16.mxu0 %v14605_v12 }
 0x1b0   : > { %10057 = vmatpush3.bf16.msra.mxu0 %v11887_v43 }
 0x1b1   : > { %10058 = vmatprep.subr.bf16.mxu0 %v14605_v12 }
 0x1b4   : > { %10060 = vmatpush3.bf16.msra.mxu0 %v11911_v20 }
 0x1b5   : > { %10061 = vmatprep.subr.bf16.mxu0 %v14605_v12 }
 0x1b8   : > { %10063 = vmatpush3.bf16.msra.mxu0 %v11944_v10 }
 0x1b9   : > { %10064 = vmatprep.subr.bf16.mxu0 %v14605_v12 }
 0x1bc   : > { %10066 = vmatpush3.bf16.msra.mxu0 %v11965_v22 }
 0x1bd   : > { %10067 = vmatprep.subr.bf16.mxu0 %v14605_v12 }
 0x1bf   : > { %8729 = vmatmul.mubr.f32.vlgmr.msra.gmra.mrb[4].mxu0 %v11695_v36  ;;  %v10077_v36 = vpack.c.bf16 %v2018_v55, %v2011_v1 }
 0x1c0   : > { %10069 = vmatpush3.bf16.msra.mxu0 %v10068_v48  ;;  %8763 = vmatprep.mubr.msk.f32.mxu0 %vm11040_vm0, %v14587_v63  ;;  %v3433_v48 = vld [vmem:[%s14344_s6 + $0x28] sm:$0xff] }
 0x1c1   : > { %10070 = vmatprep.subr.bf16.mxu0 %v14605_v12 }
 0x1c4   : > { %10072 = vmatpush3.bf16.msra.mxu0 %v10071_v62  ;;  %v3467_v62 = vand.u32 4294901760, %v3433_v48 }
 0x1c5   : > { %10073 = vmatprep.subr.bf16.mxu0 %v14605_v12 }
 0x1c8   : > { %10075 = vmatpush3.bf16.msra.mxu0 %v10074_v54  ;;  %v3434_v54 = vld [vmem:[%s14344_s6 + $0x30] sm:$0xff] }
 0x1c9   : > { %10076 = vmatprep.subr.bf16.mxu0 %v14605_v12 }
 0x1cc   : > { %10078 = vmatpush3.bf16.msra.mxu0 %v10077_v36  ;;  %v3435_v36 = vld [vmem:[%s14344_s6 + $0x38] sm:$0xff] }
 0x1cd   : > { %10079 = vmatprep.subr.bf16.mxu0 %v14605_v12 }
 0x1d0   : > { %10081 = vmatpush3.bf16.msra.mxu0 %v10080_v56  ;;  %v3436_v56 = vld [vmem:[%s14344_s6 + $0x40] sm:$0xff] }
 0x1d1   : > { %10082 = vmatprep.subr.bf16.mxu0 %v14605_v12 }
 0x1d4   : > { %10084 = vmatpush3.bf16.msra.mxu0 %v10083_v52  ;;  %v12268_v52 = vpack.c.bf16 %v3455_v13, %v3452_v49 }
 0x1d5   : > { %10085 = vmatprep.subr.bf16.mxu0 %v14605_v12 }
 0x1d8   : > { %10087 = vmatpush3.bf16.msra.mxu0 %v10086_v45  ;;  %v12270_v45 = vsub.f32 %v3428_v32, %v3452_v49 }
 0x1d9   : > { %10088 = vmatprep.subr.bf16.mxu0 %v14605_v12 }
 0x1dc   : > { %10090 = vmatpush3.bf16.msra.mxu0 %v10089_v11  ;;  %v12272_v11 = vsub.f32 %v3429_v16, %v3455_v13  ;;  %v3443_v13 = vld [vmem:[%s14344_s6 + $0x78] sm:$0xff] }
 0x1dd   : > { %10091 = vmatprep.subr.bf16.mxu0 %v14605_v12 }
 0x1df   : > { %8764 = vmatmul.mubr.f32.vlgmr.msra.gmra.mrb[4].mxu0 %v11667_v50 }
 0x1e0   : > { %10093 = vmatpush3.bf16.msra.mxu0 %v11800_v21  ;;  %8798 = vmatprep.mubr.msk.f32.mxu0 %vm11040_vm0, %v14587_v63 }
 0x1e1   : > { %10094 = vmatprep.subr.bf16.mxu0 %v14605_v12 }
 0x1e4   : > { %10096 = vmatpush3.bf16.msra.mxu0 %v11821_v44 }
 0x1e5   : > { %10097 = vmatprep.subr.bf16.mxu0 %v14605_v12 }
 0x1e8   : > { %10099 = vmatpush3.bf16.msra.mxu0 %v11844_v46  ;;  %v1005_v46 = vlaneseq }
 0x1e9   : > { %10100 = vmatprep.subr.bf16.mxu0 %v14605_v12 }
 0x1ec   : > { %10102 = vmatpush3.bf16.msra.mxu0 %v11867_v0  ;;  %v12189_v0 = vshrl.u32 %v1005_v46, 7  ;;  %v3438_v46 = vld [vmem:[%s14344_s6 + $0x50] sm:$0xff] }
 0x1ed   : > { %10103 = vmatprep.subr.bf16.mxu0 %v14605_v12 }
 0x1ee   : > { %14625 = vst [vmem:[#allocation5_spill] sm:$0xff] %v12189_v0  ;;  %v14398_v38 = vsub.s32 1, %v12189_v0  ;;  %v14399_v58 = vsub.s32 2, %v12189_v0 }
 0x1f0   : > { %10105 = vmatpush3.bf16.msra.mxu0 %v11887_v43  ;;  %v14397_v43 = vsub.s32 0, %v12189_v0  ;;  %v4111_v0 = vld [vmem:[%s14346_s8 + $0x90] sm:$0xff] }
 0x1f1   : > { %10106 = vmatprep.subr.bf16.mxu0 %v14605_v12 }
 0x1f4   : > { %10108 = vmatpush3.bf16.msra.mxu0 %v11911_v20  ;;  %v1003_v20 = vld [vmem:[%s14343_s5] sm:$0x7] }
 0x1f5   : > { %10109 = vmatprep.subr.bf16.mxu0 %v14605_v12  ;;  %v1008_v41 = vrot.slane %v1003_v20, %v14397_v43  ;;  %v1016_v39 = vrot.slane %v1003_v20, %v14399_v58 }
 0x1f8   : > { %10111 = vmatpush3.bf16.msra.mxu0 %v11944_v10 }
 0x1f9   : > { %10112 = vmatprep.subr.bf16.mxu0 %v14605_v12 }
 0x1fc   : > { %10114 = vmatpush3.bf16.msra.mxu0 %v11965_v22 }
 0x1fd   : > { %8831 = vmatprep.subr.mxu0 %v14587_v63 }
 0x1ff   : > { %8799 = vmatmul.mubr.f32.vlgmr.msra.gmra.mrb[4].mxu0 %v11667_v50  ;;  %v1012_v50 = vrot.slane %v1003_v20, %v14398_v38  ;;  %v12282_v20 = vpack.c.bf16 %v3461_v5, %v3458_v9 }
 0x200   : > { %8833 = vmatprep.mubr.msk.f32.mxu0 %vm11040_vm0, %v14587_v63 }
 0x212   : > { %v1355_v21 = vpop.f32.mrb[2].mxu0 }
 0x213   : > { %v1357_v44 = vpop.f32.mrb[3].mxu0  ;;  %v10885_v10 = vadd.f32 %v1355_v21, %v1008_v41  ;;  %v12274_v21 = vsub.f32 %v3430_v23, %v3458_v9  ;;  %v12284_v41 = vsub.f32 %v3431_v34, %v3461_v5  ;;  %v3497_v9 = vand.u32 4294901760, %v3443_v13 }
 0x214   : > { %v10887_v47 = vadd.f32 %v1357_v44, %v1012_v50  ;;  %v3437_v44 = vld [vmem:[%s14344_s6 + $0x48] sm:$0xff]  ;;  %v12286_v50 = vsub.f32 %v3432_v57, %v3464_v42  ;;  %v14418_v57 = vand.u32 4294901760, %v12270_v45 }
 0x24c   : > { %v1870_v22 = vpop.f32.mrb[2].mxu1 }
 0x24d   : > { %v12200_v30 = vadd.f32 %v10885_v10, %v1870_v22  ;;  %v1872_v31 = vpop.f32.mrb[3].mxu1  ;;  %v3439_v10 = vld [vmem:[%s14344_s6 + $0x58] sm:$0xff]  ;;  %v3470_v22 = vand.u32 4294901760, %v3434_v54 }
 0x24e   : > { %v10888_v29 = vadd.f32 %v10887_v47, %v1872_v31  ;;  %v12292_v47 = vsub.f32 %v3433_v48, %v3467_v62  ;;  %v3473_v31 = vand.u32 4294901760, %v3435_v36  ;;  %v14417_v48 = vand.u32 4294901760, %v12272_v11 }
 0x24f   : > { %v2516_v25 = vmax.f32 %v12200_v30, 0.0  ;;  %v3440_v30 = vld [vmem:[%s14344_s6 + $0x60] sm:$0xff] }
 0x250   : > { %v2517_v55 = vmax.f32 %v10888_v29, 0.0  ;;  %v3476_v29 = vand.u32 4294901760, %v3436_v56 }
 0x251   : > { %v12205_v1 = vand.u32 4294901760, %v2516_v25 }
 0x252   : > { %v2585_v7 = vand.u32 4294901760, %v2517_v55 }
 0x253   : > { %8832 = vmatpush3.msra.mxu0 %v12205_v1 }
 0x254   : > { %8836 = vmatprep.subr.mxu0 %v14587_v63  ;;  %v2586_v18 = vsub.f32 %v2517_v55, %v2585_v7  ;;  %v3479_v55 = vand.u32 4294901760, %v3437_v44 }
 0x256   : > { %v2587_v17 = vand.u32 4294901760, %v2586_v18 }
 0x258   : > { %v2588_v27 = vsub.f32 %v2586_v18, %v2587_v17 }
 0x25a   : > { %v2589_v26 = vand.u32 4294901760, %v2588_v27 }
 0x2d2   : > { %v2512_v35 = vpop.f32.mrb[4].mxu0 }
 0x2d3   : > { %v10889_v14 = vadd.f32 %v2512_v35, %v1016_v39  ;;  %v8800_v15 = vpop.f32.mrb[5].mxu0  ;;  %v12297_v39 = vsub.f32 %v3435_v36, %v3473_v31  ;;  %v3485_v35 = vand.u32 4294901760, %v3439_v10 }
 0x2d5   : > { %v2518_v33 = vmax.f32 %v10889_v14, 0.0  ;;  %v12301_v14 = vsub.f32 %v3437_v44, %v3479_v55  ;;  %v12308_v27 = vsub.f32 %v3439_v10, %v3485_v35  ;;  %v14412_v44 = vand.u32 4294901760, %v12284_v41 }
 0x2d7   : > { %v2520_v37 = vand.u32 4294901760, %v2518_v33 }
 0x2d9   : > { %v2597_v51 = vsub.f32 %v2518_v33, %v2520_v37  ;;  %8802 = vmatpush3.xpose.msra.mxu1 %v2520_v37  ;;  %v12306_v33 = vpack.c.bf16 %v3467_v62, %v3464_v42  ;;  %v3546_v42 = vsub.f32 %v12270_v45, %v14418_v57  ;;  %v3553_v62 = vsub.f32 %v12272_v11, %v14417_v48 }
 0x2da   : > { %8806 = vmatprep.subr.mxu1 %v14587_v63 }
 0x2db   : > { %v2598_v40 = vand.u32 4294901760, %v2597_v51  ;;  %v3554_v36 = vand.u32 4294901760, %v3553_v62 }
 0x2dc   : > { %8804 = vmatmul.mubr.f32.vlgmr.msra.gmra.mrb[4].mxu1 %v2589_v26 }
 0x2dd   : > { %v2599_v61 = vsub.f32 %v2597_v51, %v2598_v40  ;;  %8808 = vmatprep.mubr.msk.f32.mxu1 %vm11040_vm0, %v14587_v63 }
 0x2df   : > { %v2600_v4 = vand.u32 4294901760, %v2599_v61 }
 0x2e1   : > { %8807 = vmatpush3.xpose.msra.mxu1 %v2600_v4  ;;  %v3060_v4 = vsub.f32 %v2516_v25, %v12205_v1  ;;  %v3441_v25 = vld [vmem:[%s14344_s6 + $0x68] sm:$0xff] }
 0x2e2   : > { %8811 = vmatprep.subr.mxu1 %v14587_v63  ;;  %v3491_v23 = vand.u32 4294901760, %v3441_v25 }
 0x2e4   : > { %8809 = vmatmul.mubr.f32.vlgmr.msra.gmra.mrb[4].mxu1 %v2585_v7  ;;  %v12377_v10 = vsub.f32 %v3441_v25, %v3491_v23 }
 0x2e5   : > { %8812 = vmatpush3.xpose.msra.mxu1 %v2597_v51  ;;  %8813 = vmatprep.mubr.msk.f32.mxu1 %vm11040_vm0, %v14587_v63  ;;  %v12316_v51 = vpack.c.bf16 %v3479_v55, %v3476_v29 }
 0x2e6   : > { %8816 = vmatprep.subr.mxu1 %v14587_v63 }
 0x2ec   : > { %8814 = vmatmul.mubr.f32.vlgmr.msra.gmra.mrb[4].mxu1 %v2586_v18  ;;  %v12295_v18 = vsub.f32 %v3434_v54, %v3470_v22  ;;  %v3547_v54 = vand.u32 4294901760, %v3546_v42 }
 0x2ed   : > { %8817 = vmatpush3.xpose.msra.mxu1 %v2520_v37  ;;  %8818 = vmatprep.mubr.msk.f32.mxu1 %vm11040_vm0, %v14587_v63 }
 0x2ee   : > { %8821 = vmatprep.subr.mxu1 %v14587_v63 }
 0x2f4   : > { %8819 = vmatmul.mubr.f32.vlgmr.msra.gmra.mrb[4].mxu1 %v2587_v17  ;;  %v12299_v17 = vsub.f32 %v3436_v56, %v3476_v29  ;;  %v14413_v56 = vand.u32 4294901760, %v12274_v21  ;;  %v12384_v29 = vpack.c.bf16 %v3554_v36, %v3547_v54  ;;  %v14404_v54 = vand.u32 4294901760, %v12308_v27 }
 0x2f5   : > { %8822 = vmatpush3.xpose.msra.mxu1 %v2598_v40  ;;  %8823 = vmatprep.mubr.msk.f32.mxu1 %vm11040_vm0, %v14587_v63 }
 0x2f6   : > { %8826 = vmatprep.subr.mxu1 %v14587_v63  ;;  %v3560_v55 = vsub.f32 %v12274_v21, %v14413_v56 }
 0x2fc   : > { %8824 = vmatmul.mubr.f32.vlgmr.msra.gmra.mrb[4].mxu1 %v2585_v7 }
 0x2fd   : > { %8827 = vmatpush3.xpose.msra.mxu1 %v2520_v37  ;;  %8828 = vmatprep.mubr.msk.f32.mxu1 %vm11040_vm0, %v14587_v63  ;;  %v12312_v37 = vpack.c.bf16 %v3473_v31, %v3470_v22  ;;  %v12381_v31 = vsub.f32 %v3443_v13, %v3497_v9 }
 0x2fe   : > { %10115 = vmatprep.subr.bf16.mxu1 %v14605_v12 }
 0x304   : > { %8829 = vmatmul.mubr.f32.vlgmr.msra.gmra.mrb[4].mxu1 %v2585_v7  ;;  %v3482_v7 = vand.u32 4294901760, %v3438_v46 }
 0x305   : > { %8893 = vmatprep.mubr.msk.f32.mxu1 %vm11040_vm0, %v14587_v63  ;;  %10117 = vmatpush3.bf16.msra.mxu1 %v12268_v52 }
 0x306   : > { %10118 = vmatprep.subr.bf16.mxu1 %v14605_v12  ;;  %v12303_v15 = vsub.f32 %v3438_v46, %v3482_v7  ;;  %v12320_v26 = vpack.c.bf16 %v3485_v35, %v3482_v7  ;;  %v3567_v7 = vsub.f32 %v12284_v41, %v14412_v44  ;;  %v3561_v35 = vand.u32 4294901760, %v3560_v55 }
 0x308   : > { %v14405_v62 = vand.u32 4294901760, %v12303_v15 }
 0x309   : > { %10120 = vmatpush3.bf16.msra.mxu1 %v12282_v20 }
 0x30a   : > { %10121 = vmatprep.subr.bf16.mxu1 %v14605_v12  ;;  %v3616_v55 = vsub.f32 %v12303_v15, %v14405_v62 }
 0x30d   : > { %10123 = vmatpush3.bf16.msra.mxu1 %v12306_v33 }
 0x30e   : > { %10124 = vmatprep.subr.bf16.mxu1 %v14605_v12 }
 0x311   : > { %10126 = vmatpush3.bf16.msra.mxu1 %v12312_v37 }
 0x312   : > { %10127 = vmatprep.subr.bf16.mxu1 %v14605_v12 }
 0x315   : > { %10129 = vmatpush3.bf16.msra.mxu1 %v12316_v51 }
 0x316   : > { %10130 = vmatprep.subr.bf16.mxu1 %v14605_v12 }
 0x319   : > { %10132 = vmatpush3.bf16.msra.mxu1 %v12320_v26 }
 0x31a   : > { %10133 = vmatprep.subr.bf16.mxu1 %v14605_v12 }
 0x3d7   : > { %v2961_v19 = vpop.f32.mrb[4].mxu1 }
 0x3d8   : > { %v2966_v2 = vsel %vm2965_vm2, %v2961_v19, -9e+15  ;;  %v8830_v6 = vpop.f32.mrb[5].mxu1 }
 0x3d9   : > { %v2968_v59 = vsel %vm2967_vm3, %v2966_v2, -inf }
 0x3da   : > { %2969 = vmax.xlane.f32.xlu0 %v2968_v59  ;;  %v3061_v59 = vand.u32 4294901760, %v3060_v4 }
 0x467   : > { %v2970_v24 = vpop.xlane.xlu0 %2969 }
 0x468   : > { %v2971_v28 = vsub.f32 %v2966_v2, %v2970_v24 }
 0x46a   : > { %v2972_v60 = vmul.f32 1.442695, %v2971_v28 }
 0x46c   : > { %11023 = vpow2.f32 %v2972_v60  ;;  %v3062_v60 = vsub.f32 %v3060_v4, %v3061_v59 }
 0x46e   : > { %v3063_v16 = vand.u32 4294901760, %v3062_v60  ;;  %v14408_v60 = vand.u32 4294901760, %v12297_v39 }
 0x476   : > { %v11024_v3 = vpop.eup %11023 }
 0x477   : > { %v2974_v8 = vsel %vm2967_vm3, %v11024_v3, 0.0 }
 0x478   : > { %2975 = vadd.xlane.f32.xlu0 %v2974_v8 }
 0x505   : > { %v2976_v40 = vpop.xlane.xlu0 %2975 }
 0x506   : > { %11025 = vrcp.f32 %v2976_v40  ;;  %v3568_v40 = vand.u32 4294901760, %v3567_v7  ;;  %v3623_v7 = vsub.f32 %v12308_v27, %v14404_v54  ;;  %v4099_v54 = vld [vmem:[%s14346_s8 + $0x30] sm:$0xff] }
 0x507   : > { %v4168_v56 = vand.u32 4294901760, %v4099_v54 }
 0x510   : > { %v11026_v61 = vpop.eup %11025 }
 0x511   : > { %v2978_v19 = vmul.f32 %v11026_v61, %v11024_v3  ;;  %v3488_v3 = vand.u32 4294901760, %v3440_v30  ;;  %v14411_v61 = vand.u32 4294901760, %v12286_v50 }
 0x513   : > { %v2980_v2 = vsel %vm2967_vm3, %v2978_v19, 0  ;;  %v12352_v49 = vpack.c.bf16 %v3491_v23, %v3488_v3  ;;  %v12375_v46 = vsub.f32 %v3440_v30, %v3488_v3  ;;  %v10143_v19 = vpack.c.bf16 %v3568_v40, %v3561_v35 }
 0x514   : > { %v3048_v6 = vand.u32 4294901760, %v2980_v2  ;;  %v14407_v3 = vand.u32 4294901760, %v12299_v17  ;;  %v14406_v23 = vand.u32 4294901760, %v12301_v14  ;;  %v3617_v35 = vand.u32 4294901760, %v3616_v55 }
 0x515   : > { %10135 = vmatpush3.bf16.msra.mxu1 %v12352_v49  ;;  %v3624_v40 = vand.u32 4294901760, %v3623_v7 }
 0x516   : > { %v3049_v24 = vsub.f32 %v2980_v2, %v3048_v6  ;;  %10136 = vmatprep.subr.bf16.mxu1 %v14605_v12  ;;  %v3574_v2 = vsub.f32 %v12286_v50, %v14411_v61  ;;  %v3602_v13 = vsub.f32 %v12299_v17, %v14407_v3  ;;  %v12532_v61 = vld [vmem:[%s14346_s8 + $0x58] sm:$0xff] }
 0x518   : > { %v3050_v28 = vand.u32 4294901760, %v3049_v24 }
 0x51a   : > { %v3051_v8 = vsub.f32 %v3049_v24, %v3050_v28 }
 0x51c   : > { %v3052_v32 = vand.u32 4294901760, %v3051_v8 }
 0x51e   : > { %8834 = vmatmul.mubr.f32.vlgmr.msra.gmra.mrb[6].mxu0 %v3052_v32 }
 0x51f   : > { %8837 = vmatpush3.msra.mxu0 %v3063_v16  ;;  %8838 = vmatprep.mubr.msk.f32.mxu0 %vm11040_vm0, %v14587_v63  ;;  %v3595_v16 = vsub.f32 %v12297_v39, %v14408_v60 }
 0x520   : > { %8841 = vmatprep.subr.mxu0 %v14587_v63 }
 0x521   : > { %v3596_v25 = vand.u32 4294901760, %v3595_v16 }
 0x526   : > { %8839 = vmatmul.mubr.f32.vlgmr.msra.gmra.mrb[6].mxu0 %v3048_v6 }
 0x527   : > { %8842 = vmatpush3.msra.mxu0 %v3060_v4  ;;  %8843 = vmatprep.mubr.msk.f32.mxu0 %vm11040_vm0, %v14587_v63  ;;  %v14410_v4 = vand.u32 4294901760, %v12292_v47 }
 0x528   : > { %8846 = vmatprep.subr.mxu0 %v14587_v63 }
 0x52e   : > { %8844 = vmatmul.mubr.f32.vlgmr.msra.gmra.mrb[6].mxu0 %v3049_v24 }
 0x52f   : > { %8847 = vmatpush3.msra.mxu0 %v12205_v1  ;;  %8848 = vmatprep.mubr.msk.f32.mxu0 %vm11040_vm0, %v14587_v63 }
 0x530   : > { %8851 = vmatprep.subr.mxu0 %v14587_v63 }
 0x536   : > { %8849 = vmatmul.mubr.f32.vlgmr.msra.gmra.mrb[6].mxu0 %v3050_v28  ;;  %v14409_v28 = vand.u32 4294901760, %v12295_v18 }
 0x537   : > { %8852 = vmatpush3.msra.mxu0 %v3061_v59  ;;  %8853 = vmatprep.mubr.msk.f32.mxu0 %vm11040_vm0, %v14587_v63  ;;  %v3575_v59 = vand.u32 4294901760, %v3574_v2  ;;  %v14403_v2 = vand.u32 4294901760, %v12375_v46 }
 0x538   : > { %8856 = vmatprep.subr.mxu0 %v14587_v63  ;;  %v3588_v32 = vsub.f32 %v12295_v18, %v14409_v28  ;;  %v4102_v28 = vld [vmem:[%s14346_s8 + $0x48] sm:$0xff] }
 0x53a   : > { %v3589_v30 = vand.u32 4294901760, %v3588_v32 }
 0x53e   : > { %8854 = vmatmul.mubr.f32.vlgmr.msra.gmra.mrb[6].mxu0 %v3048_v6 }
 0x53f   : > { %8857 = vmatpush3.msra.mxu0 %v12205_v1  ;;  %8858 = vmatprep.mubr.msk.f32.mxu0 %vm11040_vm0, %v14587_v63  ;;  %v3442_v1 = vld [vmem:[%s14344_s6 + $0x70] sm:$0xff] }
 0x540   : > { %v3494_v34 = vand.u32 4294901760, %v3442_v1 }
 0x542   : > { %v12364_v5 = vpack.c.bf16 %v3497_v9, %v3494_v34  ;;  %v12379_v22 = vsub.f32 %v3442_v1, %v3494_v34  ;;  %v10149_v1 = vpack.c.bf16 %v3596_v25, %v3589_v30  ;;  %v3609_v34 = vsub.f32 %v12301_v14, %v14406_v23 }
 0x543   : > { %v3603_v9 = vand.u32 4294901760, %v3602_v13  ;;  %v14400_v13 = vand.u32 4294901760, %v12381_v31 }
 0x544   : > { %10138 = vmatpush3.bf16.msra.mxu1 %v12364_v5  ;;  %v3610_v42 = vand.u32 4294901760, %v3609_v34  ;;  %v14401_v25 = vand.u32 4294901760, %v12379_v22 }
 0x545   : > { %10139 = vmatprep.subr.bf16.mxu1 %v14605_v12 }
 0x546   : > { %8859 = vmatmul.mubr.f32.vlgmr.msra.gmra.mrb[6].mxu0 %v3048_v6  ;;  %v3581_v6 = vsub.f32 %v12292_v47, %v14410_v4  ;;  %v10152_v36 = vpack.c.bf16 %v3610_v42, %v3603_v9  ;;  %v3644_v9 = vsub.f32 %v12379_v22, %v14401_v25  ;;  %v3651_v42 = vsub.f32 %v12381_v31, %v14400_v13  ;;  %v12527_v4 = vld [vmem:[%s14346_s8 + $0x40] sm:$0xff] }
 0x547   : > { %4254 = vmatprep.mubr.f32.mxu0 %v14587_v63 }
 0x548   : > { %v3582_v24 = vand.u32 4294901760, %v3581_v6  ;;  %v14402_v6 = vand.u32 4294901760, %v12377_v10  ;;  %v3645_v55 = vand.u32 4294901760, %v3644_v9  ;;  %v3652_v7 = vand.u32 4294901760, %v3651_v42  ;;  %v4108_v9 = vld [vmem:[%s14346_s8 + $0x78] sm:$0xff] }
 0x549   : > { %v12568_v42 = vsub.f32 %v4099_v54, %v4168_v56 }
 0x54a   : > { %v10146_v8 = vpack.c.bf16 %v3582_v24, %v3575_v59  ;;  %v10155_v59 = vpack.c.bf16 %v3624_v40, %v3617_v35  ;;  %v3630_v24 = vsub.f32 %v12375_v46, %v14403_v2  ;;  %v3637_v32 = vsub.f32 %v12377_v10, %v14402_v6  ;;  %v4103_v2 = vld [vmem:[%s14346_s8 + $0x50] sm:$0xff] }
 0x54b   : > { %v10161_v35 = vpack.c.bf16 %v3652_v7, %v3645_v55  ;;  %v10164_v40 = vpack.c.bf16 %v12272_v11, %v12270_v45  ;;  %v4170_v44 = vand.u32 4294901760, %v4103_v2 }
 0x54c   : > { %v3631_v16 = vand.u32 4294901760, %v3630_v24  ;;  %v3638_v30 = vand.u32 4294901760, %v3637_v32  ;;  %v10167_v24 = vpack.c.bf16 %v12284_v41, %v12274_v21  ;;  %v10170_v32 = vpack.c.bf16 %v12292_v47, %v12286_v50 }
 0x54d   : > { %v12566_v55 = vsub.f32 %v4103_v2, %v4170_v44 }
 0x54e   : > { %v10158_v34 = vpack.c.bf16 %v3638_v30, %v3631_v16  ;;  %v12576_v30 = vld [vmem:[%s14346_s8 + $0x70] sm:$0xff]  ;;  %v12581_v16 = vld [vmem:[%s14346_s8 + $0x88] sm:$0xff] }
 0x619   : > { %v3424_v7 = vpop.f32.mrb[6].mxu0 }
 0x61a   : > { %v12456_v43 = vand.u32 4294901760, %v3424_v7  ;;  %v8860_v38 = vpop.f32.mrb[7].mxu0 }
 0x61b   : > { %v4094_v38 = vld [vmem:[%s14346_s8 + $0x8] sm:$0xff] }
 0x61c   : > { %v12459_v58 = vsub.f32 %v3424_v7, %v12456_v43  ;;  %v4100_v7 = vld [vmem:[%s14346_s8 + $0x38] sm:$0xff] }
 0x61e   : > { %v14416_v13 = vand.u32 4294901760, %v12459_v58 }
 0x620   : > { %v3535_v25 = vsub.f32 %v12459_v58, %v14416_v13  ;;  %v4105_v13 = vld [vmem:[%s14346_s8 + $0x60] sm:$0xff] }
 0x622   : > { %v3536_v6 = vand.u32 4294901760, %v3535_v25  ;;  %v12499_v25 = vld [vmem:[%s14346_s8 + $0x28] sm:$0xff] }
 0x624   : > { %8894 = vmatmul.mubr.f32.vlgmr.msra.gmra.mrb[6].mxu1 %v3536_v6 }
 0x625   : > { %10141 = vmatpush3.bf16.msra.mxu1 %v12384_v29  ;;  %8928 = vmatprep.mubr.msk.f32.mxu1 %vm11040_vm0, %v14587_v63  ;;  %v4097_v29 = vld [vmem:[%s14346_s8 + $0x20] sm:$0xff] }
 0x626   : > { %10142 = vmatprep.subr.bf16.mxu1 %v14605_v12 }
 0x629   : > { %10144 = vmatpush3.bf16.msra.mxu1 %v10143_v19  ;;  %v4093_v19 = vld [vmem:[%s14346_s8] sm:$0xff] }
 0x62a   : > { %10145 = vmatprep.subr.bf16.mxu1 %v14605_v12  ;;  %v4160_v6 = vand.u32 4294901760, %v4093_v19 }
 0x62c   : > { %v12519_v60 = vsub.f32 %v4093_v19, %v4160_v6 }
 0x62d   : > { %10147 = vmatpush3.bf16.msra.mxu1 %v10146_v8  ;;  %v4158_v8 = vand.u32 4294901760, %v4094_v38 }
 0x62e   : > { %10148 = vmatprep.subr.bf16.mxu1 %v14605_v12 }
 0x62f   : > { %v12515_v23 = vsub.f32 %v4094_v38, %v4158_v8 }
 0x631   : > { %10150 = vmatpush3.bf16.msra.mxu1 %v10149_v1  ;;  %v4162_v1 = vand.u32 4294901760, %v4097_v29 }
 0x632   : > { %10151 = vmatprep.subr.bf16.mxu1 %v14605_v12 }
 0x633   : > { %v12513_v62 = vpack.c.bf16 %v4162_v1, %v4158_v8  ;;  %v12517_v3 = vsub.f32 %v4097_v29, %v4162_v1  ;;  %v4166_v1 = vand.u32 4294901760, %v4100_v7 }
 0x635   : > { %10153 = vmatpush3.bf16.msra.mxu1 %v10152_v36  ;;  %v4096_v36 = vld [vmem:[%s14346_s8 + $0x18] sm:$0xff]  ;;  %14627 = vst [vmem:[#allocation8_spill] sm:$0xff] %v12513_v62  ;;  %10260 = vmatprep.subr.bf16.mxu0 %v12513_v62  ;;  %v12562_v48 = vpack.c.bf16 %v4170_v44, %v4166_v1  ;;  %v12564_v57 = vsub.f32 %v4100_v7, %v4166_v1 }
 0x636   : > { %10154 = vmatprep.subr.bf16.mxu1 %v14605_v12 }
 0x637   : > { %14629 = vst [vmem:[#allocation9_spill] sm:$0xff] %v12562_v48 }
 0x639   : > { %10156 = vmatpush3.bf16.msra.mxu1 %v10155_v59  ;;  %v12494_v59 = vld [vmem:[%s14346_s8 + $0x10] sm:$0xff] }
 0x63a   : > { %10157 = vmatprep.subr.bf16.mxu1 %v14605_v12 }
 0x63d   : > { %10159 = vmatpush3.bf16.msra.mxu1 %v10158_v34  ;;  %v4164_v34 = vand.u32 4294901760, %v4096_v36 }
 0x63e   : > { %10160 = vmatprep.subr.bf16.mxu1 %v14605_v12 }
 0x63f   : > { %v12534_v38 = vpack.c.bf16 %v4164_v34, %v4160_v6  ;;  %v12536_v29 = vsub.f32 %v4096_v36, %v4164_v34  ;;  %v4106_v36 = vld [vmem:[%s14346_s8 + $0x68] sm:$0xff]  ;;  %v4172_v6 = vand.u32 4294901760, %v4102_v28  ;;  %v14420_v34 = vand.u32 4294901760, %v12532_v61 }
 0x641   : > { %10162 = vmatpush3.bf16.msra.mxu1 %v10161_v35  ;;  %v14415_v35 = vand.u32 4294901760, %v12494_v59  ;;  %14628 = vst [vmem:[#allocation7_spill] sm:$0xff] %v12534_v38  ;;  %10262 = vmatpush1.bf16.msra.mxu0 %v12534_v38  ;;  %v12583_v7 = vpack.c.bf16 %v4172_v6, %v4168_v56  ;;  %v12585_v44 = vsub.f32 %v4102_v28, %v4172_v6  ;;  %v4176_v28 = vand.u32 4294901760, %v4105_v13  ;;  %v4112_v6 = vld [vmem:[%s14346_s8 + $0x98] sm:$0xff] }
 0x642   : > { %10163 = vmatprep.subr.bf16.mxu1 %v14605_v12  ;;  %10264 = vmatprep.subr.bf16.mxu0 %v12562_v48  ;;  %v12599_v2 = vsub.f32 %v12532_v61, %v14420_v34 }
 0x643   : > { %v12541_v19 = vsub.f32 %v12494_v59, %v14415_v35  ;;  %v4174_v35 = vand.u32 4294901760, %v4106_v36  ;;  %14630 = vst [vmem:[#allocation10_spill] sm:$0xff] %v12583_v7  ;;  %14631 = vst [vmem:[#allocation2_spill] sm:$0xff] %v12585_v44  ;;  %v12620_v62 = vsub.f32 %v4105_v13, %v4176_v28  ;;  %v12642_v13 = vld [vmem:[%s14346_s8 + $0xb8] sm:$0xff] }
 0x644   : > { %8929 = vmatmul.mubr.f32.vlgmr.msra.gmra.mrb[6].mxu1 %v12456_v43  ;;  %14633 = vst [vmem:[#allocation4_spill] sm:$0xff] %v12599_v2 }
 0x645   : > { %10165 = vmatpush3.bf16.msra.mxu1 %v10164_v40  ;;  %8963 = vmatprep.mubr.msk.f32.mxu1 %vm11040_vm0, %v14587_v63  ;;  %v14414_v40 = vand.u32 4294901760, %v12499_v25  ;;  %v12601_v1 = vsub.f32 %v4106_v36, %v4174_v35  ;;  %v4182_v36 = vand.u32 4294901760, %v4112_v6  ;;  %14637 = vst [vmem:[#allocation14_spill] sm:$0xff] %v12620_v62 }
 0x646   : > { %10166 = vmatprep.subr.bf16.mxu1 %v14605_v12  ;;  %10266 = vmatpush1.bf16.msra.mxu0 %v12583_v7  ;;  %v4114_v7 = vld [vmem:[%s14346_s8 + $0xa8] sm:$0xff] }
 0x647   : > { %v12547_v8 = vsub.f32 %v12499_v25, %v14414_v40  ;;  %v4109_v40 = vld [vmem:[%s14346_s8 + $0x80] sm:$0xff]  ;;  %14634 = vst [vmem:[#allocation11_spill] sm:$0xff] %v12601_v1 }
 0x648   : > { %v4178_v56 = vand.u32 4294901760, %v4109_v40 }
 0x649   : > { %10168 = vmatpush3.bf16.msra.mxu1 %v10167_v24  ;;  %v14419_v24 = vand.u32 4294901760, %v12527_v4 }
 0x64a   : > { %10169 = vmatprep.subr.bf16.mxu1 %v14605_v12  ;;  %v12616_v48 = vpack.c.bf16 %v4178_v56, %v4174_v35  ;;  %v12618_v38 = vsub.f32 %v4109_v40, %v4178_v56  ;;  %v14640_v35 = vand.u32 4294901760, %v12576_v30  ;;  %v14642_v56 = vpack.c.bf16 %v12297_v39, %v12295_v18 }
 0x64b   : > { %v12590_v54 = vsub.f32 %v12527_v4, %v14419_v24  ;;  %v4115_v24 = vld [vmem:[%s14346_s8 + $0xb0] sm:$0xff] }
 0x64c   : > { %14635 = vst [vmem:[#allocation12_spill] sm:$0xff] %v12616_v48  ;;  %14636 = vst [vmem:[#allocation13_spill] sm:$0xff] %v12618_v38  ;;  %v4186_v1 = vand.u32 4294901760, %v4115_v24  ;;  %v12637_v40 = vsub.f32 %v12576_v30, %v14640_v35  ;;  %10268 = vmatprep.subr.bf16.mxu0 %v12616_v48  ;;  %v12655_v35 = vsub.f32 %v4112_v6, %v4182_v36  ;;  %v4117_v6 = vld [vmem:[%s14346_s8 + $0xc0] sm:$0xff] }
 0x64d   : > { %14632 = vst [vmem:[#allocation3_spill] sm:$0xff] %v12590_v54  ;;  %10171 = vmatpush3.bf16.msra.mxu1 %v10170_v32  ;;  %v4180_v32 = vand.u32 4294901760, %v4108_v9 }
 0x64e   : > { %10172 = vmatprep.subr.bf16.mxu1 %v14605_v12  ;;  %14641 = vst [vmem:[#allocation17_spill] sm:$0xff] %v12637_v40  ;;  %14646 = vst [vmem:[#allocation20_spill] sm:$0xff] %v12655_v35  ;;  %v4184_v40 = vand.u32 4294901760, %v4111_v0  ;;  %v12665_v48 = vsub.f32 %v4115_v24, %v4186_v1  ;;  %v4120_v24 = vld [vmem:[%s14346_s8 + $0xd8] sm:$0xff]  ;;  %v4192_v35 = vand.u32 4294901760, %v4117_v6 }
 0x64f   : > { %v12630_v34 = vpack.c.bf16 %v4180_v32, %v4176_v28  ;;  %v12632_v2 = vsub.f32 %v4108_v9, %v4180_v32  ;;  %v14643_v28 = vand.u32 4294901760, %v12581_v16  ;;  %v12653_v32 = vpack.c.bf16 %v4186_v1, %v4182_v36  ;;  %v12681_v1 = vld [vmem:[%s14346_s8 + $0xd0] sm:$0xff] }
 0x650   : > { %14647 = vst [vmem:[#allocation21_spill] sm:$0xff] %v12665_v48  ;;  %v12672_v36 = vsub.f32 %v4111_v0, %v4184_v40  ;;  %v14651_v0 = vand.u32 4294901760, %v12628_v53  ;;  %v14653_v48 = vpack.c.bf16 %v12301_v14, %v12299_v17  ;;  %v12713_v54 = vsub.f32 %v4117_v6, %v4192_v35 }
 0x651   : > { %14638 = vst [vmem:[#allocation15_spill] sm:$0xff] %v12630_v34  ;;  %14639 = vst [vmem:[#allocation16_spill] sm:$0xff] %v12632_v2  ;;  %10174 = vmatpush3.bf16.msra.mxu1 %v14642_v56  ;;  %v12651_v9 = vsub.f32 %v12581_v16, %v14643_v28  ;;  %v4118_v2 = vld [vmem:[%s14346_s8 + $0xc8] sm:$0xff]  ;;  %v4121_v56 = vld [vmem:[%s14346_s8 + $0xe0] sm:$0xff]  ;;  %10270 = vmatpush1.bf16.msra.mxu0 %v12630_v34  ;;  %v4188_v28 = vand.u32 4294901760, %v4114_v7  ;;  %v14662_v6 = vand.u32 4294901760, %v12272_v11 }
 0x652   : > { %14645 = vst [vmem:[#allocation19_spill] sm:$0xff] %v12653_v32  ;;  %10175 = vmatprep.subr.bf16.mxu1 %v14605_v12  ;;  %10272 = vmatprep.subr.bf16.mxu0 %v12653_v32  ;;  %14648 = vst [vmem:[#allocation22_spill] sm:$0xff] %v12672_v36  ;;  %v4190_v62 = vand.u32 4294901760, %v4118_v2  ;;  %v4194_v38 = vand.u32 4294901760, %v4121_v56  ;;  %v12690_v32 = vsub.f32 %v12628_v53, %v14651_v0  ;;  %v12695_v36 = vld [vmem:[%s14346_s8 + $0xe8] sm:$0xff]  ;;  %v14667_v11 = vand.u32 4294901760, %v12292_v47 }
 0x653   : > { %14644 = vst [vmem:[#allocation18_spill] sm:$0xff] %v12651_v9  ;;  %v12683_v9 = vpack.c.bf16 %v4188_v28, %v4184_v40  ;;  %v12685_v34 = vsub.f32 %v4114_v7, %v4188_v28  ;;  %v14654_v40 = vand.u32 4294901760, %v12642_v13  ;;  %v14673_v47 = vand.u32 4294901760, %v12308_v27 }
 0x654   : > { %14652 = vst [vmem:[#allocation25_spill] sm:$0xff] %v12690_v32  ;;  %v12705_v28 = vpack.c.bf16 %v4194_v38, %v4190_v62  ;;  %v12709_v0 = vsub.f32 %v4121_v56, %v4194_v38  ;;  %v4196_v32 = vand.u32 4294901760, %v4120_v24  ;;  %v14658_v38 = vpack.c.bf16 %v12308_v27, %v12303_v15 }
 0x655   : > { %14649 = vst [vmem:[#allocation23_spill] sm:$0xff] %v12683_v9  ;;  %14650 = vst [vmem:[#allocation24_spill] sm:$0xff] %v12685_v34  ;;  %10177 = vmatpush3.bf16.msra.mxu1 %v14653_v48  ;;  %v12703_v7 = vsub.f32 %v12642_v13, %v14654_v40  ;;  %v12707_v34 = vsub.f32 %v4118_v2, %v4190_v62  ;;  %10274 = vmatpush1.bf16.msra.mxu0 %v12683_v9  ;;  %v5038_v48 = vand.u32 4294901760, %v12681_v1 }
 0x656   : > { %14656 = vst [vmem:[#allocation27_spill] sm:$0xff] %v12705_v28  ;;  %10178 = vmatprep.subr.bf16.mxu1 %v14605_v12  ;;  %10276 = vmatprep.subr.bf16.mxu0 %v12705_v28  ;;  %v14453_v40 = vand.u32 4294901760, %v12695_v36  ;;  %v12720_v44 = vsub.f32 %v4120_v24, %v4196_v32  ;;  %v14661_v56 = vand.u32 4294901760, %v12270_v45  ;;  %v14666_v45 = vand.u32 4294901760, %v12286_v50 }
 0x657   : > { %14655 = vst [vmem:[#allocation26_spill] sm:$0xff] %v12703_v7  ;;  %v12718_v7 = vpack.c.bf16 %v4196_v32, %v4192_v35  ;;  %v12725_v62 = vsub.f32 %v12681_v1, %v5038_v48  ;;  %v14659_v32 = vpack.c.bf16 %v12377_v10, %v12375_v46  ;;  %v14660_v35 = vpack.c.bf16 %v12381_v31, %v12379_v22 }
 0x658   : > { %v12733_v2 = vsub.f32 %v12695_v36, %v14453_v40  ;;  %v10212_v24 = vpack.c.bf16 %v14662_v6, %v14661_v56  ;;  %v10218_v56 = vpack.c.bf16 %v14667_v11, %v14666_v45  ;;  %v14670_v6 = vand.u32 4294901760, %v12299_v17 }
 0x659   : > { %14657 = vst [vmem:[#allocation28_spill] sm:$0xff] %v12718_v7  ;;  %10180 = vmatpush3.bf16.msra.mxu1 %v14658_v38  ;;  %10278 = vmatpush1.bf16.msra.mxu0 %v12718_v7  ;;  %v14663_v38 = vand.u32 4294901760, %v12459_v58  ;;  %v14672_v50 = vand.u32 4294901760, %v12303_v15  ;;  %v14676_v17 = vand.u32 4294901760, %v12379_v22  ;;  %v14682_v27 = vand.u32 4294901760, %v12532_v61 }
 0x65a   : > { %10181 = vmatprep.subr.bf16.mxu1 %v14605_v12 }
 0x65d   : > { %10183 = vmatpush3.bf16.msra.mxu1 %v14659_v32  ;;  %v14664_v32 = vand.u32 4294901760, %v12274_v21  ;;  %v14669_v21 = vand.u32 4294901760, %v12297_v39  ;;  %v14675_v39 = vand.u32 4294901760, %v12377_v10  ;;  %v14690_v10 = vand.u32 4294901760, %v12695_v36  ;;  %v4128_v36 = vld [vmem:[%s14346_s8 + $0x118] sm:$0xff] }
 0x65e   : > { %10184 = vmatprep.subr.bf16.mxu1 %v14605_v12  ;;  %v5047_v45 = vand.u32 4294901760, %v4128_v36 }
 0x65f   : > { %v12865_v22 = vpack.c.bf16 %v14690_v10, %v5038_v48 }
 0x661   : > { %10186 = vmatpush3.bf16.msra.mxu1 %v14660_v35  ;;  %v14665_v35 = vand.u32 4294901760, %v12284_v41  ;;  %14691 = vst [vmem:[#allocation33_spill] sm:$0xff] %v12865_v22 }
 0x662   : > { %10187 = vmatprep.subr.bf16.mxu1 %v14605_v12 }
 0x663   : > { %v10215_v40 = vpack.c.bf16 %v14665_v35, %v14664_v32 }
 0x664   : > { %8964 = vmatmul.mubr.f32.vlgmr.msra.gmra.mrb[6].mxu1 %v12459_v58  ;;  %v14668_v58 = vand.u32 4294901760, %v12295_v18  ;;  %v14674_v18 = vand.u32 4294901760, %v12375_v46 }
 0x665   : > { %10189 = vmatpush3.bf16.msra.mxu1 %v12268_v52  ;;  %8998 = vmatprep.mubr.msk.f32.mxu1 %vm11040_vm0, %v14587_v63 }
 0x666   : > { %10190 = vmatprep.subr.bf16.mxu1 %v14605_v12  ;;  %v10221_v41 = vpack.c.bf16 %v14669_v21, %v14668_v58  ;;  %v10230_v32 = vpack.c.bf16 %v14675_v39, %v14674_v18  ;;  %v4133_v58 = vld [vmem:[%s14346_s8 + $0x140] sm:$0xff]  ;;  %v4134_v18 = vld [vmem:[%s14346_s8 + $0x148] sm:$0xff] }
 0x669   : > { %10192 = vmatpush3.bf16.msra.mxu1 %v12282_v20 }
 0x66a   : > { %10193 = vmatprep.subr.bf16.mxu1 %v14605_v12 }
 0x66d   : > { %10195 = vmatpush3.bf16.msra.mxu1 %v12306_v33 }
 0x66e   : > { %10196 = vmatprep.subr.bf16.mxu1 %v14605_v12 }
 0x671   : > { %10198 = vmatpush3.bf16.msra.mxu1 %v12312_v37 }
 0x672   : > { %10199 = vmatprep.subr.bf16.mxu1 %v14605_v12 }
 0x675   : > { %10201 = vmatpush3.bf16.msra.mxu1 %v12316_v51 }
 0x676   : > { %10202 = vmatprep.subr.bf16.mxu1 %v14605_v12 }
 0x679   : > { %10204 = vmatpush3.bf16.msra.mxu1 %v12320_v26 }
 0x67a   : > { %10205 = vmatprep.subr.bf16.mxu1 %v14605_v12 }
 0x67d   : > { %10207 = vmatpush3.bf16.msra.mxu1 %v12352_v49 }
 0x67e   : > { %10208 = vmatprep.subr.bf16.mxu1 %v14605_v12 }
 0x681   : > { %10210 = vmatpush3.bf16.msra.mxu1 %v12364_v5 }
 0x682   : > { %10211 = vmatprep.subr.bf16.mxu1 %v14605_v12 }
 0x684   : > { %8999 = vmatmul.mubr.f32.vlgmr.msra.gmra.mrb[6].mxu1 %v14663_v38  ;;  %v10227_v38 = vpack.c.bf16 %v14673_v47, %v14672_v50  ;;  %v4131_v50 = vld [vmem:[%s14346_s8 + $0x130] sm:$0xff] }
 0x685   : > { %10213 = vmatpush3.bf16.msra.mxu1 %v10212_v24  ;;  %9033 = vmatprep.mubr.msk.f32.mxu1 %vm11040_vm0, %v14587_v63  ;;  %v5050_v39 = vand.u32 4294901760, %v4131_v50 }
 0x686   : > { %10214 = vmatprep.subr.bf16.mxu1 %v14605_v12 }
 0x689   : > { %10216 = vmatpush3.bf16.msra.mxu1 %v10215_v40  ;;  %v14671_v40 = vand.u32 4294901760, %v12301_v14  ;;  %v14677_v14 = vand.u32 4294901760, %v12381_v31  ;;  %v4127_v31 = vld [vmem:[%s14346_s8 + $0x110] sm:$0xff] }
 0x68a   : > { %10217 = vmatprep.subr.bf16.mxu1 %v14605_v12 }
 0x68b   : > { %v10224_v24 = vpack.c.bf16 %v14671_v40, %v14670_v6  ;;  %v10233_v35 = vpack.c.bf16 %v14677_v14, %v14676_v17  ;;  %v4210_v6 = vand.u32 4294901760, %v4133_v58  ;;  %v4129_v40 = vld [vmem:[%s14346_s8 + $0x120] sm:$0xff]  ;;  %v5053_v17 = vand.u32 4294901760, %v4134_v18 }
 0x68c   : > { %v4208_v47 = vand.u32 4294901760, %v4129_v40 }
 0x68d   : > { %10219 = vmatpush3.bf16.msra.mxu1 %v10218_v56  ;;  %v4130_v56 = vld [vmem:[%s14346_s8 + $0x128] sm:$0xff] }
 0x68e   : > { %10220 = vmatprep.subr.bf16.mxu1 %v14605_v12 }
 0x691   : > { %10222 = vmatpush3.bf16.msra.mxu1 %v10221_v41  ;;  %v4206_v41 = vand.u32 4294901760, %v4130_v56 }
 0x692   : > { %10223 = vmatprep.subr.bf16.mxu1 %v14605_v12 }
 0x695   : > { %10225 = vmatpush3.bf16.msra.mxu1 %v10224_v24  ;;  %v4132_v24 = vld [vmem:[%s14346_s8 + $0x138] sm:$0xff] }
 0x696   : > { %10226 = vmatprep.subr.bf16.mxu1 %v14605_v12 }
 0x699   : > { %10228 = vmatpush3.bf16.msra.mxu1 %v10227_v38  ;;  %v4212_v38 = vand.u32 4294901760, %v4132_v24 }
 0x69a   : > { %10229 = vmatprep.subr.bf16.mxu1 %v14605_v12 }
 0x69b   : > { %v12918_v14 = vpack.c.bf16 %v4212_v38, %v4208_v47 }
 0x69d   : > { %10231 = vmatpush3.bf16.msra.mxu1 %v10230_v32  ;;  %v12915_v32 = vpack.c.bf16 %v4210_v6, %v4206_v41  ;;  %14696 = vst [vmem:[#allocation38_spill] sm:$0xff] %v12918_v14 }
 0x69e   : > { %10232 = vmatprep.subr.bf16.mxu1 %v14605_v12 }
 0x69f   : > { %14695 = vst [vmem:[#allocation37_spill] sm:$0xff] %v12915_v32 }
 0x6a1   : > { %10234 = vmatpush3.bf16.msra.mxu1 %v10233_v35  ;;  %v4136_v35 = vld [vmem:[%s14346_s8 + $0x158] sm:$0xff] }
 0x6a2   : > { %10235 = vmatprep.subr.bf16.mxu1 %v14605_v12 }
 0x6a4   : > { %9034 = vmatmul.mubr.f32.vlgmr.msra.gmra.mrb[6].mxu1 %v12456_v43 }
 0x6a5   : > { %10237 = vmatpush3.bf16.msra.mxu1 %v12268_v52  ;;  %9068 = vmatprep.mubr.msk.f32.mxu1 %vm11040_vm0, %v14587_v63  ;;  %v14678_v52 = vand.u32 4294901760, %v12494_v59  ;;  %v4125_v59 = vld [vmem:[%s14346_s8 + $0x100] sm:$0xff] }
 0x6a6   : > { %10238 = vmatprep.subr.bf16.mxu1 %v14605_v12  ;;  %v5044_v1 = vand.u32 4294901760, %v4125_v59 }
 0x6a8   : > { %v12899_v21 = vpack.c.bf16 %v5047_v45, %v5044_v1 }
 0x6a9   : > { %10240 = vmatpush3.bf16.msra.mxu1 %v12282_v20  ;;  %v14679_v20 = vand.u32 4294901760, %v12499_v25 }
 0x6aa   : > { %10241 = vmatprep.subr.bf16.mxu1 %v14605_v12  ;;  %14694 = vst [vmem:[#allocation36_spill] sm:$0xff] %v12899_v21 }
 0x6ab   : > { %v12830_v15 = vpack.c.bf16 %v14679_v20, %v14678_v52  ;;  %v4139_v52 = vld [vmem:[%s14346_s8 + $0x170] sm:$0xff]  ;;  %v12927_v20 = vpack.c.bf16 %v5053_v17, %v5050_v39 }
 0x6ad   : > { %10243 = vmatpush3.bf16.msra.mxu1 %v12306_v33  ;;  %14680 = vst [vmem:[#allocation29_spill] sm:$0xff] %v12830_v15  ;;  %v14681_v33 = vand.u32 4294901760, %v12527_v4  ;;  %v4202_v4 = vand.u32 4294901760, %v4127_v31  ;;  %14697 = vst [vmem:[#allocation39_spill] sm:$0xff] %v12927_v20 }
 0x6ae   : > { %10244 = vmatprep.subr.bf16.mxu1 %v14605_v12 }
 0x6af   : > { %v12953_v9 = vsub.f32 %v4127_v31, %v4202_v4  ;;  %v12971_v31 = vsub.f32 %v4132_v24, %v4212_v38  ;;  %v14485_v38 = vand.u32 4294901760, %v12568_v42 }
 0x6b1   : > { %10246 = vmatpush3.bf16.msra.mxu1 %v12312_v37  ;;  %v12839_v37 = vpack.c.bf16 %v14682_v27, %v14681_v33  ;;  %v4214_v33 = vand.u32 4294901760, %v4136_v35  ;;  %v4218_v27 = vand.u32 4294901760, %v4139_v52 }
 0x6b2   : > { %10247 = vmatprep.subr.bf16.mxu1 %v14605_v12 }
 0x6b3   : > { %14683 = vst [vmem:[#allocation30_spill] sm:$0xff] %v12839_v37 }
 0x6b5   : > { %10249 = vmatpush3.bf16.msra.mxu1 %v12316_v51  ;;  %v14684_v51 = vand.u32 4294901760, %v12576_v30  ;;  %v4126_v30 = vld [vmem:[%s14346_s8 + $0x108] sm:$0xff] }
 0x6b6   : > { %10250 = vmatprep.subr.bf16.mxu1 %v14605_v12 }
 0x6b9   : > { %10252 = vmatpush3.bf16.msra.mxu1 %v12320_v26  ;;  %v14685_v26 = vand.u32 4294901760, %v12581_v16  ;;  %v4123_v16 = vld [vmem:[%s14346_s8 + $0xf0] sm:$0xff] }
 0x6ba   : > { %10253 = vmatprep.subr.bf16.mxu1 %v14605_v12  ;;  %v4200_v25 = vand.u32 4294901760, %v4123_v16 }
 0x6bd   : > { %10255 = vmatpush3.bf16.msra.mxu1 %v12352_v49  ;;  %v14687_v49 = vand.u32 4294901760, %v12628_v53  ;;  %v4124_v53 = vld [vmem:[%s14346_s8 + $0xf8] sm:$0xff] }
 0x6be   : > { %10256 = vmatprep.subr.bf16.mxu1 %v14605_v12  ;;  %v4198_v61 = vand.u32 4294901760, %v4124_v53 }
 0x6c0   : > { %v12888_v48 = vpack.c.bf16 %v4202_v4, %v4198_v61  ;;  %v12975_v4 = vsub.f32 %v4134_v18, %v5053_v17 }
 0x6c1   : > { %10258 = vmatpush3.bf16.msra.mxu1 %v12364_v5  ;;  %v14688_v5 = vand.u32 4294901760, %v12642_v13  ;;  %v4204_v13 = vand.u32 4294901760, %v4126_v30 }
 0x6c2   : > { %10451 = vmatprep.subr.bf16.mxu1 %v14605_v12  ;;  %14692 = vst [vmem:[#allocation34_spill] sm:$0xff] %v12888_v48  ;;  %10280 = vmatprep.subr.bf16.mxu0 %v12888_v48  ;;  %v12960_v48 = vsub.f32 %v4125_v59, %v5044_v1 }
 0x6c3   : > { %v12857_v46 = vpack.c.bf16 %v14688_v5, %v14687_v49  ;;  %v12890_v11 = vpack.c.bf16 %v4204_v13, %v4200_v25  ;;  %v4137_v49 = vld [vmem:[%s14346_s8 + $0x160] sm:$0xff]  ;;  %v14493_v5 = vand.u32 4294901760, %v12515_v23 }
 0x6c4   : > { %9069 = vmatmul.mubr.f32.vlgmr.msra.gmra.mrb[6].mxu1 %v12456_v43  ;;  %v12849_v43 = vpack.c.bf16 %v14685_v26, %v14684_v51  ;;  %v4135_v51 = vld [vmem:[%s14346_s8 + $0x150] sm:$0xff]  ;;  %v4138_v26 = vld [vmem:[%s14346_s8 + $0x168] sm:$0xff] }
 0x6c5   : > { %10453 = vmatpush3.bf16.msra.mxu1 %v12830_v15  ;;  %9103 = vmatprep.mubr.msk.f32.mxu1 %vm11040_vm0, %v14587_v63  ;;  %14689 = vst [vmem:[#allocation32_spill] sm:$0xff] %v12857_v46  ;;  %14693 = vst [vmem:[#allocation35_spill] sm:$0xff] %v12890_v11  ;;  %v4216_v10 = vand.u32 4294901760, %v4135_v51  ;;  %v4269_v28 = vsub.f32 %v12515_v23, %v14493_v5  ;;  %v12964_v15 = vsub.f32 %v4130_v56, %v4206_v41 }
 0x6c6   : > { %10454 = vmatprep.subr.bf16.mxu1 %v14605_v12  ;;  %14686 = vst [vmem:[#allocation31_spill] sm:$0xff] %v12849_v43  ;;  %10282 = vmatpush1.bf16.msra.mxu0 %v12890_v11  ;;  %v5056_v11 = vand.u32 4294901760, %v4137_v49  ;;  %v12966_v63 = vsub.f32 %v4133_v58, %v4210_v6  ;;  %v14702_v58 = vand.u32 4294901760, %v12517_v3 }
 0x6c7   : > { %10284 = vmatprep.subr.bf16.mxu0 %v12915_v32  ;;  %v4220_v32 = vand.u32 4294901760, %v4138_v26  ;;  %v4270_v56 = vand.u32 4294901760, %v4269_v28  ;;  %v14483_v28 = vand.u32 4294901760, %v12566_v55 }
 0x6c8   : > { %v12989_v1 = vsub.f32 %v4137_v49, %v5056_v11  ;;  %v4281_v41 = vsub.f32 %v12517_v3, %v14702_v58 }
 0x6c9   : > { %10456 = vmatpush3.bf16.msra.mxu1 %v12839_v37  ;;  %v12957_v37 = vsub.f32 %v4126_v30, %v4204_v13  ;;  %v12979_v30 = vsub.f32 %v4139_v52, %v4218_v27  ;;  %v12981_v59 = vpack.c.bf16 %v4220_v32, %v4216_v10  ;;  %v12985_v13 = vsub.f32 %v4138_v26, %v4220_v32 }
 0x6ca   : > { %10457 = vmatprep.subr.bf16.mxu1 %v14605_v12  ;;  %10286 = vmatpush1.bf16.msra.mxu0 %v12918_v14  ;;  %v14491_v14 = vand.u32 4294901760, %v12519_v60  ;;  %14701 = vst [vmem:[#allocation43_spill] sm:$0xff] %v12989_v1  ;;  %v4282_v24 = vand.u32 4294901760, %v4281_v41  ;;  %v4305_v17 = vsub.f32 %v12566_v55, %v14483_v28 }
 0x6cb   : > { %14699 = vst [vmem:[#allocation41_spill] sm:$0xff] %v12981_v59 }
 0x6cc   : > { %v4275_v6 = vsub.f32 %v12519_v60, %v14491_v14  ;;  %v4306_v58 = vand.u32 4294901760, %v4305_v17  ;;  %v14710_v17 = vld [vmem:[#allocation13_spill] sm:$0xff] }
 0x6cd   : > { %10459 = vmatpush3.bf16.msra.mxu1 %v12849_v43  ;;  %v12955_v43 = vsub.f32 %v4123_v16, %v4200_v25  ;;  %v12977_v16 = vsub.f32 %v4136_v35, %v4214_v33  ;;  %v12983_v25 = vsub.f32 %v4135_v51, %v4216_v10  ;;  %v10291_v35 = vpack.c.bf16 %v4282_v24, %v4270_v56  ;;  %v14705_v56 = vld [vmem:[#allocation3_spill] sm:$0xff] }
 0x6ce   : > { %10460 = vmatprep.subr.bf16.mxu1 %v14605_v12  ;;  %v14490_v24 = vand.u32 4294901760, %v14705_v56 }
 0x6d1   : > { %10462 = vmatpush3.bf16.msra.mxu1 %v12857_v46  ;;  %v12951_v46 = vsub.f32 %v4124_v53, %v4198_v61  ;;  %v12969_v53 = vsub.f32 %v4129_v40, %v4208_v47  ;;  %v12973_v61 = vsub.f32 %v4131_v50, %v5050_v39  ;;  %v14489_v40 = vand.u32 4294901760, %v12536_v29 }
 0x6d2   : > { %10463 = vmatprep.subr.bf16.mxu1 %v14605_v12  ;;  %v4276_v50 = vand.u32 4294901760, %v4275_v6 }
 0x6d3   : > { %v4287_v47 = vsub.f32 %v12536_v29, %v14489_v40 }
 0x6d5   : > { %10465 = vmatpush3.bf16.msra.mxu1 %v12865_v22  ;;  %v12945_v22 = vpack.c.bf16 %v4218_v27, %v4214_v33  ;;  %v4288_v52 = vand.u32 4294901760, %v4287_v47  ;;  %v4299_v33 = vsub.f32 %v12568_v42, %v14485_v38  ;;  %v14703_v27 = vld [vmem:[#allocation2_spill] sm:$0xff]  ;;  %v14708_v38 = vld [vmem:[#allocation4_spill] sm:$0xff] }
 0x6d6   : > { %10466 = vmatprep.subr.bf16.mxu1 %v14605_v12  ;;  %v14487_v51 = vand.u32 4294901760, %v14703_v27 }
 0x6d7   : > { %14698 = vst [vmem:[#allocation40_spill] sm:$0xff] %v12945_v22  ;;  %10288 = vmatprep.subr.bf16.mxu0 %v12945_v22  ;;  %v13027_v41 = vpack.c.bf16 %v4288_v52, %v4276_v50  ;;  %v4300_v6 = vand.u32 4294901760, %v4299_v33  ;;  %v5122_v50 = vsub.f32 %v14705_v56, %v14490_v24  ;;  %v14711_v52 = vld [vmem:[#allocation14_spill] sm:$0xff]  ;;  %v14716_v22 = vld [vmem:[#allocation20_spill] sm:$0xff] }
 0x6d8   : > { %10290 = vmatpush1.bf16.msra.mxu0 %v12981_v59  ;;  %v4311_v28 = vsub.f32 %v14703_v27, %v14487_v51  ;;  %v14503_v33 = vand.u32 4294901760, %v14711_v52  ;;  %v14713_v51 = vld [vmem:[#allocation17_spill] sm:$0xff] }
 0x6d9   : > { %10468 = vmatpush3.bf16.msra.mxu1 %v12899_v21  ;;  %v4140_v21 = vld [vmem:[%s14346_s8 + $0x178] sm:$0xff]  ;;  %10292 = vmatprep.subr.bf16.mxu0 %v10291_v35  ;;  %14704 = vst [vmem:[#allocation2_spill] sm:$0xff] %v13027_v41  ;;  %v14501_v35 = vand.u32 4294901760, %v14710_v17  ;;  %v5123_v40 = vand.u32 4294901760, %v5122_v50 }
 0x6da   : > { %10469 = vmatprep.subr.bf16.mxu1 %v14605_v12  ;;  %v5059_v7 = vand.u32 4294901760, %v4140_v21  ;;  %v4323_v14 = vsub.f32 %v14711_v52, %v14503_v33 }
 0x6db   : > { %v4329_v24 = vsub.f32 %v14710_v17, %v14501_v35  ;;  %v14507_v35 = vand.u32 4294901760, %v14716_v22 }
 0x6dc   : > { %v4324_v50 = vand.u32 4294901760, %v4323_v14 }
 0x6dd   : > { %10471 = vmatpush3.bf16.msra.mxu1 %v12927_v20  ;;  %v12962_v20 = vsub.f32 %v4128_v36, %v5047_v45  ;;  %v12987_v36 = vpack.c.bf16 %v5059_v7, %v5056_v11  ;;  %v12991_v45 = vsub.f32 %v4140_v21, %v5059_v7  ;;  %v14488_v11 = vand.u32 4294901760, %v12541_v19 }
 0x6de   : > { %10472 = vmatprep.subr.bf16.mxu1 %v14605_v12  ;;  %v14486_v7 = vand.u32 4294901760, %v12547_v8  ;;  %v14484_v21 = vand.u32 4294901760, %v12564_v57  ;;  %v4341_v14 = vsub.f32 %v14716_v22, %v14507_v35 }
 0x6df   : > { %14700 = vst [vmem:[#allocation42_spill] sm:$0xff] %v12987_v36  ;;  %v5108_v18 = vsub.f32 %v12541_v19, %v14488_v11 }
 0x6e0   : > { %v5115_v39 = vsub.f32 %v12547_v8, %v14486_v7  ;;  %v4293_v32 = vsub.f32 %v12564_v57, %v14484_v21  ;;  %v14492_v7 = vand.u32 4294901760, %v14708_v38 }
 0x6e1   : > { %10474 = vmatpush3.bf16.msra.mxu1 %v12987_v36  ;;  %v5109_v26 = vand.u32 4294901760, %v5108_v18  ;;  %v14709_v18 = vld [vmem:[#allocation11_spill] sm:$0xff]  ;;  %v14715_v36 = vld [vmem:[#allocation18_spill] sm:$0xff] }
 0x6e2   : > { %10475 = vmatprep.subr.bf16.mxu1 %v14605_v12  ;;  %v5116_v49 = vand.u32 4294901760, %v5115_v39  ;;  %v4294_v10 = vand.u32 4294901760, %v4293_v32  ;;  %v14494_v39 = vand.u32 4294901760, %v14709_v18  ;;  %v4312_v32 = vand.u32 4294901760, %v4311_v28 }
 0x6e3   : > { %v14505_v28 = vand.u32 4294901760, %v14713_v51  ;;  %v14506_v59 = vand.u32 4294901760, %v14715_v36 }
 0x6e4   : > { %v13033_v47 = vpack.c.bf16 %v5116_v49, %v5109_v26  ;;  %v13035_v21 = vpack.c.bf16 %v4306_v58, %v4294_v10  ;;  %v5129_v26 = vsub.f32 %v14708_v38, %v14492_v7  ;;  %v4317_v49 = vsub.f32 %v14709_v18, %v14494_v39  ;;  %v14712_v10 = vld [vmem:[#allocation16_spill] sm:$0xff] }
 0x6e5   : > { %v14504_v58 = vand.u32 4294901760, %v14712_v10  ;;  %v13052_v11 = vpack.c.bf16 %v4312_v32, %v4300_v6  ;;  %v5136_v6 = vsub.f32 %v14713_v51, %v14505_v28  ;;  %v4330_v32 = vand.u32 4294901760, %v4329_v24  ;;  %v14720_v24 = vld [vmem:[#allocation22_spill] sm:$0xff] }
 0x6e6   : > { %14706 = vst [vmem:[#allocation3_spill] sm:$0xff] %v13033_v47  ;;  %14707 = vst [vmem:[#allocation44_spill] sm:$0xff] %v13035_v21  ;;  %v5130_v7 = vand.u32 4294901760, %v5129_v26  ;;  %v4318_v5 = vand.u32 4294901760, %v4317_v49  ;;  %v14718_v26 = vld [vmem:[#allocation21_spill] sm:$0xff]  ;;  %v14509_v28 = vand.u32 4294901760, %v14720_v24 }
 0x6e7   : > { %14714 = vst [vmem:[#allocation4_spill] sm:$0xff] %v13052_v11  ;;  %v4335_v39 = vsub.f32 %v14712_v10, %v14504_v58  ;;  %v5137_v33 = vand.u32 4294901760, %v5136_v6  ;;  %v14508_v49 = vand.u32 4294901760, %v14718_v26  ;;  %v5143_v58 = vsub.f32 %v14715_v36, %v14506_v59 }
 0x6e8   : > { %v13068_v11 = vpack.c.bf16 %v5130_v7, %v5123_v40  ;;  %v13071_v21 = vpack.c.bf16 %v4330_v32, %v4318_v5  ;;  %v14722_v7 = vld [vmem:[#allocation24_spill] sm:$0xff]  ;;  %v14723_v5 = vld [vmem:[#allocation25_spill] sm:$0xff]  ;;  %v4347_v59 = vsub.f32 %v14720_v24, %v14509_v28  ;;  %v14515_v28 = vand.u32 4294901760, %v12709_v0 }
 0x6e9   : > { %v4336_v12 = vand.u32 4294901760, %v4335_v39  ;;  %v4353_v40 = vsub.f32 %v14718_v26, %v14508_v49  ;;  %v14512_v39 = vand.u32 4294901760, %v14722_v7  ;;  %v14513_v6 = vand.u32 4294901760, %v14723_v5 }
 0x6ea   : > { %14717 = vst [vmem:[#allocation11_spill] sm:$0xff] %v13068_v11  ;;  %14719 = vst [vmem:[#allocation13_spill] sm:$0xff] %v13071_v21  ;;  %v5144_v32 = vand.u32 4294901760, %v5143_v58  ;;  %v4342_v21 = vand.u32 4294901760, %v4341_v14  ;;  %v14724_v11 = vld [vmem:[#allocation26_spill] sm:$0xff]  ;;  %v14517_v49 = vand.u32 4294901760, %v12707_v34 }
 0x6eb   : > { %v13080_v47 = vpack.c.bf16 %v4336_v12, %v4324_v50  ;;  %v14514_v35 = vand.u32 4294901760, %v14724_v11  ;;  %v4354_v41 = vand.u32 4294901760, %v4353_v40  ;;  %v4359_v12 = vsub.f32 %v14722_v7, %v14512_v39 }
 0x6ec   : > { %v5150_v50 = vsub.f32 %v14723_v5, %v14513_v6  ;;  %v4348_v58 = vand.u32 4294901760, %v4347_v59  ;;  %v4365_v39 = vsub.f32 %v12707_v34, %v14517_v49  ;;  %v14516_v59 = vand.u32 4294901760, %v12713_v54 }
 0x6ed   : > { %14721 = vst [vmem:[#allocation14_spill] sm:$0xff] %v13080_v47  ;;  %v13098_v47 = vpack.c.bf16 %v5144_v32, %v5137_v33  ;;  %v5157_v14 = vsub.f32 %v14724_v11, %v14514_v35  ;;  %v13104_v40 = vpack.c.bf16 %v4354_v41, %v4342_v21  ;;  %v4360_v24 = vand.u32 4294901760, %v4359_v12 }
 0x6ee   : > { %v5151_v26 = vand.u32 4294901760, %v5150_v50  ;;  %v4377_v33 = vsub.f32 %v12709_v0, %v14515_v28  ;;  %v14518_v32 = vand.u32 4294901760, %v12720_v44  ;;  %v14519_v21 = vand.u32 4294901760, %v12725_v62 }
 0x6ef   : > { %14725 = vst [vmem:[#allocation16_spill] sm:$0xff] %v13098_v47  ;;  %14726 = vst [vmem:[#allocation17_spill] sm:$0xff] %v13104_v40  ;;  %v5158_v6 = vand.u32 4294901760, %v5157_v14  ;;  %v13114_v35 = vpack.c.bf16 %v4360_v24, %v4348_v58  ;;  %v4366_v47 = vand.u32 4294901760, %v4365_v39  ;;  %v14520_v41 = vand.u32 4294901760, %v12733_v2 }
 0x6f0   : > { %v4378_v50 = vand.u32 4294901760, %v4377_v33  ;;  %v4371_v14 = vsub.f32 %v12713_v54, %v14516_v59  ;;  %v4383_v28 = vsub.f32 %v12720_v44, %v14518_v32  ;;  %v5164_v24 = vsub.f32 %v12725_v62, %v14519_v21 }
 0x6f1   : > { %14727 = vst [vmem:[#allocation18_spill] sm:$0xff] %v13114_v35  ;;  %v13118_v12 = vpack.c.bf16 %v5158_v6, %v5151_v26  ;;  %v5171_v39 = vsub.f32 %v12733_v2, %v14520_v41  ;;  %v14521_v26 = vand.u32 4294901760, %v12951_v46  ;;  %v14523_v6 = vand.u32 4294901760, %v12953_v9 }
 0x6f2   : > { %v13134_v58 = vpack.c.bf16 %v4378_v50, %v4366_v47  ;;  %v4372_v33 = vand.u32 4294901760, %v4371_v14  ;;  %v4384_v59 = vand.u32 4294901760, %v4383_v28  ;;  %v14522_v49 = vand.u32 4294901760, %v12955_v43 }
 0x6f3   : > { %14728 = vst [vmem:[#allocation20_spill] sm:$0xff] %v13118_v12  ;;  %v5165_v12 = vand.u32 4294901760, %v5164_v24  ;;  %v5172_v32 = vand.u32 4294901760, %v5171_v39  ;;  %v4389_v21 = vsub.f32 %v12951_v46, %v14521_v26  ;;  %v4401_v41 = vsub.f32 %v12953_v9, %v14523_v6 }
 0x6f4   : > { %14729 = vst [vmem:[#allocation24_spill] sm:$0xff] %v13134_v58  ;;  %v13143_v35 = vpack.c.bf16 %v4384_v59, %v4372_v33  ;;  %v4395_v47 = vsub.f32 %v12955_v43, %v14522_v49  ;;  %v14524_v28 = vand.u32 4294901760, %v12957_v37  ;;  %v14525_v50 = vand.u32 4294901760, %v12960_v48 }
 0x6f5   : > { %v13150_v14 = vpack.c.bf16 %v5172_v32, %v5165_v12  ;;  %v4390_v24 = vand.u32 4294901760, %v4389_v21  ;;  %v4402_v39 = vand.u32 4294901760, %v4401_v41  ;;  %v14526_v26 = vand.u32 4294901760, %v12962_v20 }
 0x6f6   : > { %14730 = vst [vmem:[#allocation25_spill] sm:$0xff] %v13143_v35  ;;  %v4396_v58 = vand.u32 4294901760, %v4395_v47  ;;  %v4407_v59 = vsub.f32 %v12957_v37, %v14524_v28  ;;  %v5178_v33 = vsub.f32 %v12960_v48, %v14525_v50  ;;  %v14527_v49 = vand.u32 4294901760, %v12964_v15 }
 0x6f7   : > { %14731 = vst [vmem:[#allocation26_spill] sm:$0xff] %v13150_v14  ;;  %v13160_v6 = vpack.c.bf16 %v4402_v39, %v4390_v24  ;;  %v5185_v32 = vsub.f32 %v12962_v20, %v14526_v26  ;;  %v14528_v21 = vand.u32 4294901760, %v12966_v63  ;;  %v14529_v41 = vand.u32 4294901760, %v12969_v53 }
 0x6f8   : > { %v4408_v12 = vand.u32 4294901760, %v4407_v59  ;;  %v5179_v47 = vand.u32 4294901760, %v5178_v33  ;;  %v4413_v28 = vsub.f32 %v12964_v15, %v14527_v49  ;;  %v14530_v50 = vand.u32 4294901760, %v12971_v31 }
 0x6f9   : > { %14732 = vst [vmem:[#allocation45_spill] sm:$0xff] %v13160_v6  ;;  %v5186_v14 = vand.u32 4294901760, %v5185_v32  ;;  %v4425_v24 = vsub.f32 %v12966_v63, %v14528_v21  ;;  %v4419_v39 = vsub.f32 %v12969_v53, %v14529_v41  ;;  %v14533_v26 = vand.u32 4294901760, %v12973_v61 }
 0x6fa   : > { %v13178_v6 = vpack.c.bf16 %v4408_v12, %v4396_v58  ;;  %v4414_v59 = vand.u32 4294901760, %v4413_v28  ;;  %v4431_v33 = vsub.f32 %v12971_v31, %v14530_v50  ;;  %v14531_v49 = vand.u32 4294901760, %v12975_v4 }
 0x6fb   : > { %v13184_v32 = vpack.c.bf16 %v5186_v14, %v5179_v47  ;;  %v4426_v35 = vand.u32 4294901760, %v4425_v24  ;;  %v4420_v40 = vand.u32 4294901760, %v4419_v39  ;;  %v5192_v21 = vsub.f32 %v12973_v61, %v14533_v26  ;;  %v14740_v26 = vld [vmem:[#allocation2_spill] sm:$0xff] }
 0x6fc   : > { %14733 = vst [vmem:[#allocation46_spill] sm:$0xff] %v13178_v6  ;;  %v4432_v41 = vand.u32 4294901760, %v4431_v33  ;;  %v5199_v58 = vsub.f32 %v12975_v4, %v14531_v49  ;;  %v14532_v28 = vand.u32 4294901760, %v12977_v16  ;;  %v14534_v12 = vand.u32 4294901760, %v12979_v30 }
 0x6fd   : > { %v13194_v50 = vpack.c.bf16 %v4426_v35, %v4414_v59  ;;  %v5193_v6 = vand.u32 4294901760, %v5192_v21  ;;  %v14535_v14 = vand.u32 4294901760, %v12983_v25  ;;  %v14536_v47 = vand.u32 4294901760, %v12985_v13 }
 0x6fe   : > { %v13198_v24 = vpack.c.bf16 %v4432_v41, %v4420_v40  ;;  %v5200_v39 = vand.u32 4294901760, %v5199_v58  ;;  %v4437_v33 = vsub.f32 %v12977_v16, %v14532_v28  ;;  %v4449_v49 = vsub.f32 %v12979_v30, %v14534_v12 }
 0x6ff   : > { %14734 = vst [vmem:[#allocation47_spill] sm:$0xff] %v13194_v50  ;;  %v4443_v35 = vsub.f32 %v12983_v25, %v14535_v14  ;;  %v4455_v21 = vsub.f32 %v12985_v13, %v14536_v47  ;;  %v14537_v40 = vand.u32 4294901760, %v12989_v1  ;;  %v14538_v41 = vand.u32 4294901760, %v12991_v45 }
 0x700   : > { %14735 = vst [vmem:[#allocation48_spill] sm:$0xff] %v13198_v24  ;;  %v13214_v59 = vpack.c.bf16 %v5200_v39, %v5193_v6  ;;  %v4438_v58 = vand.u32 4294901760, %v4437_v33  ;;  %v4450_v28 = vand.u32 4294901760, %v4449_v49 }
 0x701   : > { %v4444_v12 = vand.u32 4294901760, %v4443_v35  ;;  %v4456_v24 = vand.u32 4294901760, %v4455_v21  ;;  %v5206_v14 = vsub.f32 %v12989_v1, %v14537_v40  ;;  %v5213_v47 = vsub.f32 %v12991_v45, %v14538_v41  ;;  %v14741_v1 = vld [vmem:[#allocation3_spill] sm:$0xff] }
 0x702   : > { %v13224_v50 = vpack.c.bf16 %v4450_v28, %v4438_v58 }
 0x703   : > { %v13232_v33 = vpack.c.bf16 %v4456_v24, %v4444_v12  ;;  %v5207_v35 = vand.u32 4294901760, %v5206_v14  ;;  %v5214_v21 = vand.u32 4294901760, %v5213_v47  ;;  %v14736_v12 = vld [vmem:[#allocation21_spill] sm:$0xff]  ;;  %v14737_v47 = vld [vmem:[#allocation22_spill] sm:$0xff] }
 0x704   : > { %v7968_v24 = vld [vmem:[%s14345_s7] ss:$0 sm:$0xff] }
 0x705   : > { %v10497_v39 = vpack.c.bf16 %v5214_v21, %v5207_v35 }
 0x797   : > { %v4088_v40 = vpop.f32.mrb[6].mxu1 }
 0x798   : > { %v10890_v14 = vadd.f32 %v7968_v24, %v4088_v40  ;;  %v9070_v49 = vpop.f32.mrb[7].mxu1  ;;  %v14742_v40 = vld [vmem:[#allocation44_spill] sm:$0xff]  ;;  %v14746_v24 = vld [vmem:[#allocation11_spill] sm:$0xff] }
 0x799   : > { %v14743_v49 = vmov 0.0|0.0  }
 0x79a   : > { %v4092_v28 = vmax.f32 %v10890_v14, 0.0  ;;  %v14744_v14 = vmov 0.0  }
 0x79c   : > { %v13277_v6 = vand.u32 4294901760, %v4092_v28 }
 0x79e   : > { %v13280_v58 = vsub.f32 %v4092_v28, %v13277_v6  ;;  %v14745_v28 = vld [vmem:[#allocation4_spill] sm:$0xff] }
 0x7a0   : > { %14738 = vst [vmem:[#allocation21_spill] sm:$0xff] %v13280_v58  ;;  %v13283_v41 = vand.u32 4294901760, %v13280_v58 }
 0x7a2   : > { %14739 = vst [vmem:[#allocation22_spill] sm:$0xff] %v13283_v41  ;;  %v4258_v35 = vsub.f32 %v13280_v58, %v13283_v41  ;;  %v14752_v41 = vld [vmem:[#allocation20_spill] sm:$0xff] }
 0x7a3   : > { %v14753_v58 = vld [vmem:[#allocation24_spill] sm:$0xff] }
 0x7a4   : > { %v4259_v21 = vand.u32 4294901760, %v4258_v35  ;;  %v14747_v35 = vld [vmem:[#allocation13_spill] sm:$0xff] }
 0x7a6   : > { %4260 = vmatmul.mubr.f32.vlgmr.msra.gmra.mrb[8].mxu0 %v4259_v21  ;;  %9104 = vmatmul.mubr.f32.vlgmr.msra.gmra.mrb[8].mxu1 %v4259_v21  ;;  %v14750_v21 = vld [vmem:[#allocation17_spill] sm:$0xff] }
 0x7a7   : > { %10294 = vmatpush1.bf16.msra.mxu0 %v14740_v26  ;;  %10477 = vmatpush3.bf16.msra.mxu1 %v14741_v1  ;;  %v14748_v26 = vld [vmem:[#allocation14_spill] sm:$0xff]  ;;  %v14749_v1 = vld [vmem:[#allocation16_spill] sm:$0xff] }
 0x7a8   : > { %10296 = vmatprep.subr.bf16.mxu0 %v14742_v40  ;;  %10478 = vmatprep.subr.bf16.mxu1 %v14743_v49  ;;  %v14751_v40 = vld [vmem:[#allocation18_spill] sm:$0xff] }
 0x7a9   : > { %4490 = vmatprep.mubr.f32.mxu0 %v14744_v14  ;;  %9138 = vmatprep.mubr.msk.f32.mxu1 %vm11040_vm0, %v14744_v14 }
 0x7ab   : > { %10298 = vmatpush1.bf16.msra.mxu0 %v14745_v28  ;;  %10480 = vmatpush3.bf16.msra.mxu1 %v14746_v24  ;;  %v14754_v28 = vld [vmem:[#allocation25_spill] sm:$0xff]  ;;  %v14755_v24 = vld [vmem:[#allocation26_spill] sm:$0xff] }
 0x7ac   : > { %10300 = vmatprep.subr.bf16.mxu0 %v14747_v35  ;;  %10481 = vmatprep.subr.bf16.mxu1 %v14743_v49  ;;  %v14756_v35 = vld [vmem:[#allocation45_spill] sm:$0xff] }
 0x7af   : > { %10302 = vmatpush1.bf16.msra.mxu0 %v14748_v26  ;;  %10483 = vmatpush3.bf16.msra.mxu1 %v14749_v1  ;;  %v14757_v26 = vld [vmem:[#allocation46_spill] sm:$0xff]  ;;  %v14758_v1 = vld [vmem:[#allocation47_spill] sm:$0xff] }
 0x7b0   : > { %10304 = vmatprep.subr.bf16.mxu0 %v14750_v21  ;;  %10484 = vmatprep.subr.bf16.mxu1 %v14743_v49  ;;  %v14766_v21 = vpack.c.bf16 %v14710_v17, %v14709_v18 }
 0x7b3   : > { %10306 = vmatpush1.bf16.msra.mxu0 %v14751_v40  ;;  %10486 = vmatpush3.bf16.msra.mxu1 %v14752_v41  ;;  %v14759_v41 = vld [vmem:[#allocation48_spill] sm:$0xff]  ;;  %v14767_v40 = vpack.c.bf16 %v14712_v10, %v14711_v52 }
 0x7b4   : > { %10308 = vmatprep.subr.bf16.mxu0 %v14753_v58  ;;  %10487 = vmatprep.subr.bf16.mxu1 %v14743_v49  ;;  %v14760_v58 = vpack.c.bf16 %v12517_v3, %v12515_v23 }
 0x7b7   : > { %10310 = vmatpush1.bf16.msra.mxu0 %v14754_v28  ;;  %10489 = vmatpush3.bf16.msra.mxu1 %v14755_v24  ;;  %v14768_v28 = vpack.c.bf16 %v14715_v36, %v14713_v51  ;;  %v14769_v24 = vpack.c.bf16 %v14736_v12, %v14716_v22 }
 0x7b8   : > { %10312 = vmatprep.subr.bf16.mxu0 %v14756_v35  ;;  %10490 = vmatprep.subr.bf16.mxu1 %v14743_v49  ;;  %v14770_v35 = vpack.c.bf16 %v14722_v7, %v14737_v47 }
 0x7bb   : > { %10314 = vmatpush1.bf16.msra.mxu0 %v14757_v26  ;;  %10492 = vmatpush3.bf16.msra.mxu1 %v13184_v32  ;;  %v14761_v32 = vpack.c.bf16 %v12536_v29, %v12519_v60  ;;  %v14771_v26 = vpack.c.bf16 %v14724_v11, %v14723_v5 }
 0x7bc   : > { %10316 = vmatprep.subr.bf16.mxu0 %v14758_v1  ;;  %10493 = vmatprep.subr.bf16.mxu1 %v14743_v49  ;;  %v14772_v1 = vpack.c.bf16 %v12709_v0, %v12707_v34 }
 0x7bf   : > { %10318 = vmatpush1.bf16.msra.mxu0 %v14759_v41  ;;  %10495 = vmatpush3.bf16.msra.mxu1 %v13214_v59  ;;  %v14763_v59 = vpack.c.bf16 %v12566_v55, %v12564_v57  ;;  %v14773_v41 = vpack.c.bf16 %v12720_v44, %v12713_v54 }
 0x7c0   : > { %10320 = vmatprep.subr.bf16.mxu0 %v13224_v50  ;;  %10496 = vmatprep.subr.bf16.mxu1 %v14743_v49  ;;  %v14762_v50 = vpack.c.bf16 %v12547_v8, %v12541_v19 }
 0x7c3   : > { %10322 = vmatpush1.bf16.msra.mxu0 %v13232_v33  ;;  %10498 = vmatpush3.bf16.msra.mxu1 %v10497_v39  ;;  %v14764_v39 = vpack.c.bf16 %v14703_v27, %v12568_v42  ;;  %v14765_v33 = vpack.c.bf16 %v14708_v38, %v14705_v56 }
 0x7c4   : > { %10324 = vmatprep.subr.bf16.mxu0 %v14760_v58  ;;  %10499 = vmatprep.subr.bf16.mxu1 %v14743_v49  ;;  %v14774_v58 = vpack.c.bf16 %v12733_v2, %v12725_v62 }
 0x7c6   : > { %4492 = vmatmul.mubr.f32.vlgmr.msra.gmra.mrb[8].mxu0 %v13277_v6  ;;  %9139 = vmatmul.mubr.f32.vlgmr.msra.gmra.mrb[8].mxu1 %v13277_v6 }
 0x7c7   : > { %10326 = vmatpush1.bf16.msra.mxu0 %v14761_v32  ;;  %10501 = vmatpush3.bf16.msra.mxu1 %v14762_v50  ;;  %v14775_v32 = vpack.c.bf16 %v12953_v9, %v12951_v46  ;;  %v14776_v50 = vpack.c.bf16 %v12957_v37, %v12955_v43 }
 0x7c8   : > { %10328 = vmatprep.subr.bf16.mxu0 %v14763_v59  ;;  %10502 = vmatprep.subr.bf16.mxu1 %v14743_v49  ;;  %v14777_v59 = vpack.c.bf16 %v12962_v20, %v12960_v48 }
 0x7c9   : > { %4626 = vmatprep.mubr.f32.mxu0 %v14744_v14  ;;  %9173 = vmatprep.mubr.msk.f32.mxu1 %vm11040_vm0, %v14744_v14 }
 0x7cb   : > { %10330 = vmatpush1.bf16.msra.mxu0 %v14764_v39  ;;  %10504 = vmatpush3.bf16.msra.mxu1 %v14765_v33  ;;  %v14778_v39 = vpack.c.bf16 %v12966_v63, %v12964_v15  ;;  %v14779_v33 = vpack.c.bf16 %v12971_v31, %v12969_v53 }
 0x7cc   : > { %10332 = vmatprep.subr.bf16.mxu0 %v14766_v21  ;;  %10505 = vmatprep.subr.bf16.mxu1 %v14743_v49  ;;  %v14780_v21 = vpack.c.bf16 %v12975_v4, %v12973_v61 }
 0x7cf   : > { %10334 = vmatpush1.bf16.msra.mxu0 %v14767_v40  ;;  %10507 = vmatpush3.bf16.msra.mxu1 %v14768_v28  ;;  %v14781_v40 = vpack.c.bf16 %v12979_v30, %v12977_v16  ;;  %v14782_v28 = vpack.c.bf16 %v12985_v13, %v12983_v25 }
 0x7d0   : > { %10336 = vmatprep.subr.bf16.mxu0 %v14769_v24  ;;  %10508 = vmatprep.subr.bf16.mxu1 %v14743_v49  ;;  %v14783_v24 = vld [vmem:[#allocation43_spill] sm:$0xff] }
 0x7d3   : > { %10338 = vmatpush1.bf16.msra.mxu0 %v14770_v35  ;;  %10510 = vmatpush3.bf16.msra.mxu1 %v14771_v26  ;;  %v14784_v35 = vpack.c.bf16 %v12991_v45, %v14783_v24  ;;  %v14785_v26 = vld [vmem:[#allocation8_spill] sm:$0xff] }
 0x7d4   : > { %10340 = vmatprep.subr.bf16.mxu0 %v14772_v1  ;;  %10511 = vmatprep.subr.bf16.mxu1 %v14743_v49  ;;  %v14786_v1 = vld [vmem:[#allocation21_spill] sm:$0xff] }
 0x7d7   : > { %10342 = vmatpush1.bf16.msra.mxu0 %v14773_v41  ;;  %10513 = vmatpush3.bf16.msra.mxu1 %v14774_v58  ;;  %v14787_v41 = vld [vmem:[#allocation7_spill] sm:$0xff]  ;;  %v14788_v58 = vld [vmem:[#allocation29_spill] sm:$0xff] }
 0x7d8   : > { %10344 = vmatprep.subr.bf16.mxu0 %v14775_v32  ;;  %10514 = vmatprep.subr.bf16.mxu1 %v14743_v49  ;;  %v14789_v32 = vld [vmem:[#allocation9_spill] sm:$0xff] }
 0x7db   : > { %10346 = vmatpush1.bf16.msra.mxu0 %v14776_v50  ;;  %10516 = vmatpush3.bf16.msra.mxu1 %v14777_v59  ;;  %v14790_v50 = vld [vmem:[#allocation10_spill] sm:$0xff] }
 0x7dc   : > { %10348 = vmatprep.subr.bf16.mxu0 %v14778_v39  ;;  %10517 = vmatprep.subr.bf16.mxu1 %v14743_v49  ;;  %v14791_v59 = vld [vmem:[#allocation30_spill] sm:$0xff]  ;;  %v14792_v39 = vld [vmem:[#allocation12_spill] sm:$0xff] }
 0x7df   : > { %10350 = vmatpush1.bf16.msra.mxu0 %v14779_v33  ;;  %10519 = vmatpush3.bf16.msra.mxu1 %v14780_v21  ;;  %v14793_v33 = vld [vmem:[#allocation15_spill] sm:$0xff] }
 0x7e0   : > { %10352 = vmatprep.subr.bf16.mxu0 %v14781_v40  ;;  %10520 = vmatprep.subr.bf16.mxu1 %v14743_v49  ;;  %v14794_v21 = vld [vmem:[#allocation31_spill] sm:$0xff] }
 0x7e1   : > { %v14795_v40 = vld [vmem:[#allocation19_spill] sm:$0xff] }
 0x7e3   : > { %10354 = vmatpush1.bf16.msra.mxu0 %v14782_v28  ;;  %10522 = vmatpush3.bf16.msra.mxu1 %v14784_v35  ;;  %v14796_v28 = vld [vmem:[#allocation23_spill] sm:$0xff]  ;;  %v14797_v35 = vld [vmem:[#allocation32_spill] sm:$0xff] }
 0x7e4   : > { %10356 = vmatprep.subr.bf16.mxu0 %v14785_v26  ;;  %10523 = vmatprep.subr.bf16.mxu1 %v14743_v49 }
 0x7e6   : > { %4629 = vmatmul.mubr.f32.vlgmr.msra.gmra.mrb[8].mxu0 %v14786_v1  ;;  %9174 = vmatmul.mubr.f32.vlgmr.msra.gmra.mrb[8].mxu1 %v14786_v1  ;;  %v14798_v1 = vld [vmem:[#allocation27_spill] sm:$0xff] }
 0x7e7   : > { %10358 = vmatpush1.bf16.msra.mxu0 %v14787_v41  ;;  %10525 = vmatpush3.bf16.msra.mxu1 %v14788_v58 }
 0x7e8   : > { %10360 = vmatprep.subr.bf16.mxu0 %v14789_v32  ;;  %10526 = vmatprep.subr.bf16.mxu1 %v14743_v49  ;;  %v14813_v32 = vand.u32 4294901760, %v12536_v29  ;;  %v14820_v29 = vand.u32 4294901760, %v14703_v27 }
 0x7e9   : > { %4731 = vmatprep.mubr.f32.mxu0 %v14744_v14  ;;  %9208 = vmatprep.mubr.msk.f32.mxu1 %vm11040_vm0, %v14744_v14 }
 0x7eb   : > { %10362 = vmatpush1.bf16.msra.mxu0 %v14790_v50  ;;  %10528 = vmatpush3.bf16.msra.mxu1 %v14791_v59  ;;  %v14799_v59 = vld [vmem:[#allocation28_spill] sm:$0xff]  ;;  %v14801_v50 = vld [vmem:[#allocation34_spill] sm:$0xff] }
 0x7ec   : > { %10364 = vmatprep.subr.bf16.mxu0 %v14792_v39  ;;  %10529 = vmatprep.subr.bf16.mxu1 %v14743_v49  ;;  %v14800_v39 = vld [vmem:[#allocation33_spill] sm:$0xff] }
 0x7ef   : > { %10366 = vmatpush1.bf16.msra.mxu0 %v14793_v33  ;;  %10531 = vmatpush3.bf16.msra.mxu1 %v14794_v21  ;;  %v14802_v21 = vld [vmem:[#allocation35_spill] sm:$0xff]  ;;  %v14804_v33 = vld [vmem:[#allocation37_spill] sm:$0xff] }
 0x7f0   : > { %10368 = vmatprep.subr.bf16.mxu0 %v14795_v40  ;;  %10532 = vmatprep.subr.bf16.mxu1 %v14743_v49  ;;  %v14803_v40 = vld [vmem:[#allocation36_spill] sm:$0xff] }
 0x7f3   : > { %10370 = vmatpush1.bf16.msra.mxu0 %v14796_v28  ;;  %10534 = vmatpush3.bf16.msra.mxu1 %v14797_v35  ;;  %v14805_v35 = vld [vmem:[#allocation38_spill] sm:$0xff]  ;;  %v14807_v28 = vld [vmem:[#allocation40_spill] sm:$0xff] }
 0x7f4   : > { %10372 = vmatprep.subr.bf16.mxu0 %v14798_v1  ;;  %10535 = vmatprep.subr.bf16.mxu1 %v14743_v49  ;;  %v14806_v1 = vld [vmem:[#allocation39_spill] sm:$0xff] }
 0x7f7   : > { %10374 = vmatpush1.bf16.msra.mxu0 %v14799_v59  ;;  %10537 = vmatpush3.bf16.msra.mxu1 %v14800_v39  ;;  %v14809_v39 = vand.u32 4294901760, %v12517_v3  ;;  %v14816_v3 = vand.u32 4294901760, %v12564_v57  ;;  %v14823_v57 = vand.u32 4294901760, %v14709_v18 }
 0x7f8   : > { %10376 = vmatprep.subr.bf16.mxu0 %v14801_v50  ;;  %10538 = vmatprep.subr.bf16.mxu1 %v14743_v49  ;;  %v14808_v50 = vand.u32 4294901760, %v12515_v23  ;;  %v14817_v23 = vand.u32 4294901760, %v12566_v55  ;;  %v14824_v55 = vand.u32 4294901760, %v14710_v17  ;;  %v14829_v17 = vand.u32 4294901760, %v14716_v22 }
 0x7f9   : > { %v14835_v22 = vand.u32 4294901760, %v12707_v34  ;;  %v14841_v34 = vand.u32 4294901760, %v12951_v46  ;;  %v14847_v46 = vand.u32 4294901760, %v12964_v15  ;;  %v14853_v15 = vand.u32 4294901760, %v12977_v16  ;;  %v14859_v16 = vld [vmem:[#allocation29_spill] sm:$0xff] }
 0x7fa   : > { %v10387_v59 = vpack.c.bf16 %v14809_v39, %v14808_v50  ;;  %v10391_v50 = vpack.c.bf16 %v14817_v23, %v14816_v3  ;;  %v14818_v39 = vld [vmem:[#allocation22_spill] sm:$0xff] }
 0x7fb   : > { %10378 = vmatpush1.bf16.msra.mxu0 %v14802_v21  ;;  %10540 = vmatpush3.bf16.msra.mxu1 %v14803_v40  ;;  %v14810_v21 = vld [vmem:[#allocation41_spill] sm:$0xff]  ;;  %v14811_v40 = vld [vmem:[#allocation42_spill] sm:$0xff] }
 0x7fc   : > { %10380 = vmatprep.subr.bf16.mxu0 %v14804_v33  ;;  %10541 = vmatprep.subr.bf16.mxu1 %v14743_v49  ;;  %v14812_v33 = vand.u32 4294901760, %v12519_v60  ;;  %v14819_v60 = vand.u32 4294901760, %v12568_v42  ;;  %v14825_v42 = vand.u32 4294901760, %v14711_v52  ;;  %v14831_v52 = vand.u32 4294901760, %v14737_v47 }
 0x7fd   : > { %v14837_v47 = vand.u32 4294901760, %v12713_v54  ;;  %v14843_v54 = vand.u32 4294901760, %v12955_v43  ;;  %v14849_v43 = vand.u32 4294901760, %v12969_v53  ;;  %v14855_v53 = vand.u32 4294901760, %v12983_v25  ;;  %v14861_v25 = vld [vmem:[#allocation10_spill] sm:$0xff] }
 0x7ff   : > { %10382 = vmatpush1.bf16.msra.mxu0 %v14805_v35  ;;  %10543 = vmatpush3.bf16.msra.mxu1 %v14806_v1  ;;  %v10389_v35 = vpack.c.bf16 %v14813_v32, %v14812_v33  ;;  %v14814_v1 = vand.u32 4294901760, %v12541_v19  ;;  %v10393_v19 = vpack.c.bf16 %v14820_v29, %v14819_v60  ;;  %v14822_v32 = vand.u32 4294901760, %v14708_v38 }
 0x800   : > { %10384 = vmatprep.subr.bf16.mxu0 %v14807_v28  ;;  %10544 = vmatprep.subr.bf16.mxu1 %v14743_v49  ;;  %v14815_v28 = vand.u32 4294901760, %v12547_v8  ;;  %v14821_v8 = vand.u32 4294901760, %v14705_v56  ;;  %v10395_v33 = vpack.c.bf16 %v14824_v55, %v14823_v57  ;;  %v14826_v38 = vand.u32 4294901760, %v14712_v10 }
 0x801   : > { %v14827_v56 = vand.u32 4294901760, %v14713_v51  ;;  %v14832_v10 = vand.u32 4294901760, %v14722_v7  ;;  %v14833_v51 = vand.u32 4294901760, %v14723_v5  ;;  %v14838_v7 = vand.u32 4294901760, %v12720_v44 }
 0x802   : > { %v10548_v58 = vpack.c.bf16 %v14815_v28, %v14814_v1  ;;  %v10397_v27 = vpack.c.bf16 %v14826_v38, %v14825_v42  ;;  %v14830_v28 = vand.u32 4294901760, %v14736_v12  ;;  %v14836_v12 = vand.u32 4294901760, %v12709_v0  ;;  %v14867_v42 = vld [vmem:[#allocation23_spill] sm:$0xff]  ;;  %v14868_v38 = vld [vmem:[#allocation32_spill] sm:$0xff] }
 0x803   : > { %10386 = vmatpush1.bf16.msra.mxu0 %v14810_v21  ;;  %10546 = vmatpush3.bf16.msra.mxu1 %v14811_v40  ;;  %v10401_v1 = vpack.c.bf16 %v14832_v10, %v14831_v52  ;;  %v14839_v5 = vand.u32 4294901760, %v12725_v62  ;;  %v14842_v0 = vand.u32 4294901760, %v12953_v9  ;;  %v14844_v44 = vand.u32 4294901760, %v12957_v37  ;;  %v14876_v52 = vld [vmem:[#allocation38_spill] sm:$0xff]  ;;  %v14877_v10 = vld [vmem:[#allocation39_spill] sm:$0xff] }
 0x804   : > { %10388 = vmatprep.subr.bf16.mxu0 %v10387_v59  ;;  %10547 = vmatprep.subr.bf16.mxu1 %v14743_v49  ;;  %v10551_v59 = vpack.c.bf16 %v14822_v32, %v14821_v8  ;;  %v10403_v23 = vpack.c.bf16 %v14836_v12, %v14835_v22  ;;  %v14845_v62 = vand.u32 4294901760, %v12960_v48  ;;  %v14848_v9 = vand.u32 4294901760, %v12966_v63 }
 0x805   : > { %v10407_v60 = vpack.c.bf16 %v14842_v0, %v14841_v34  ;;  %v10409_v29 = vpack.c.bf16 %v14844_v44, %v14843_v54  ;;  %v14850_v37 = vand.u32 4294901760, %v12971_v31  ;;  %v14851_v48 = vand.u32 4294901760, %v12973_v61 }
 0x806   : > { %4735 = vmatmul.mubr.f32.vlgmr.msra.gmra.mrb[8].mxu0 %v14818_v39  ;;  %9209 = vmatmul.mubr.f32.vlgmr.msra.gmra.mrb[8].mxu1 %v14818_v39  ;;  %v10411_v8 = vpack.c.bf16 %v14848_v9, %v14847_v46  ;;  %v14854_v63 = vand.u32 4294901760, %v12979_v30  ;;  %v14856_v31 = vand.u32 4294901760, %v12985_v13  ;;  %v14857_v61 = vand.u32 4294901760, %v14783_v24  ;;  %v14860_v30 = vld [vmem:[#allocation9_spill] sm:$0xff]  ;;  %v14862_v13 = vld [vmem:[#allocation30_spill] sm:$0xff]  ;;  %v14864_v24 = vld [vmem:[#allocation15_spill] sm:$0xff] }
 0x807   : > { %10390 = vmatpush1.bf16.msra.mxu0 %v10389_v35  ;;  %10549 = vmatpush3.bf16.msra.mxu1 %v10548_v58  ;;  %v14828_v58 = vand.u32 4294901760, %v14715_v36  ;;  %v10399_v35 = vpack.c.bf16 %v14830_v28, %v14829_v17  ;;  %v14834_v36 = vand.u32 4294901760, %v14724_v11  ;;  %v14840_v11 = vand.u32 4294901760, %v12733_v2  ;;  %v14873_v17 = vld [vmem:[#allocation35_spill] sm:$0xff]  ;;  %v14874_v28 = vld [vmem:[#allocation36_spill] sm:$0xff] }
 0x808   : > { %10392 = vmatprep.subr.bf16.mxu0 %v10391_v50  ;;  %10550 = vmatprep.subr.bf16.mxu1 %v14743_v49  ;;  %v10405_v50 = vpack.c.bf16 %v14838_v7, %v14837_v47  ;;  %v14846_v2 = vand.u32 4294901760, %v12962_v20  ;;  %v10413_v32 = vpack.c.bf16 %v14850_v37, %v14849_v43  ;;  %v14852_v20 = vand.u32 4294901760, %v12975_v4 }
 0x809   : > { %4901 = vmatprep.mubr.f32.mxu0 %v14744_v14  ;;  %9243 = vmatprep.mubr.msk.f32.mxu1 %vm11040_vm0, %v14744_v14  ;;  %v10554_v18 = vpack.c.bf16 %v14828_v58, %v14827_v56  ;;  %v10557_v3 = vpack.c.bf16 %v14834_v36, %v14833_v51  ;;  %v10560_v39 = vpack.c.bf16 %v14840_v11, %v14839_v5  ;;  %v14858_v4 = vand.u32 4294901760, %v12991_v45  ;;  %v14863_v45 = vld [vmem:[#allocation12_spill] sm:$0xff]  ;;  %v14871_v58 = vld [vmem:[#allocation33_spill] sm:$0xff] }
 0x80a   : > { %v10415_v57 = vpack.c.bf16 %v14854_v63, %v14853_v15  ;;  %v10417_v55 = vpack.c.bf16 %v14856_v31, %v14855_v53  ;;  %v14870_v56 = vld [vmem:[#allocation28_spill] sm:$0xff]  ;;  %v14879_v51 = vld [vmem:[#allocation5_spill] sm:$0xff] }
 0x80b   : > { %10394 = vmatpush1.bf16.msra.mxu0 %v10393_v19  ;;  %10552 = vmatpush3.bf16.msra.mxu1 %v10551_v59  ;;  %v10563_v19 = vpack.c.bf16 %v14846_v2, %v14845_v62  ;;  %v10566_v59 = vpack.c.bf16 %v14852_v20, %v14851_v48  ;;  %v14882_v46 = vsub.s32 0, %v14879_v51 }
 0x80c   : > { %10396 = vmatprep.subr.bf16.mxu0 %v10395_v33  ;;  %10553 = vmatprep.subr.bf16.mxu1 %v14743_v49  ;;  %v10569_v33 = vpack.c.bf16 %v14858_v4, %v14857_v61  ;;  %v13636_v61 = vld [vmem:[%s14348_s10] sm:$0xff]  ;;  %v13641_v4 = vld [vmem:[%s14348_s10 + $0x8] sm:$0xff] }
 0x80f   : > { %10398 = vmatpush1.bf16.msra.mxu0 %v10397_v27  ;;  %10555 = vmatpush3.bf16.msra.mxu1 %v10554_v18  ;;  %v14869_v27 = vld [vmem:[#allocation27_spill] sm:$0xff]  ;;  %v14872_v18 = vld [vmem:[#allocation34_spill] sm:$0xff] }
 0x810   : > { %10400 = vmatprep.subr.bf16.mxu0 %v10399_v35  ;;  %10556 = vmatprep.subr.bf16.mxu1 %v14743_v49  ;;  %v14875_v35 = vld [vmem:[#allocation37_spill] sm:$0xff] }
 0x813   : > { %10402 = vmatpush1.bf16.msra.mxu0 %v10401_v1  ;;  %10558 = vmatpush3.bf16.msra.mxu1 %v10557_v3  ;;  %v14878_v1 = vld [vmem:[#allocation40_spill] sm:$0xff]  ;;  %v14881_v3 = vsub.s32 1, %v14879_v51 }
 0x814   : > { %10404 = vmatprep.subr.bf16.mxu0 %v10403_v23  ;;  %10559 = vmatprep.subr.bf16.mxu1 %v14743_v49 }
 0x817   : > { %10406 = vmatpush1.bf16.msra.mxu0 %v10405_v50  ;;  %10561 = vmatpush3.bf16.msra.mxu1 %v10560_v39 }
 0x818   : > { %10408 = vmatprep.subr.bf16.mxu0 %v10407_v60  ;;  %10562 = vmatprep.subr.bf16.mxu1 %v14743_v49 }
 0x81b   : > { %10410 = vmatpush1.bf16.msra.mxu0 %v10409_v29  ;;  %10564 = vmatpush3.bf16.msra.mxu1 %v10563_v19 }
 0x81c   : > { %10412 = vmatprep.subr.bf16.mxu0 %v10411_v8  ;;  %10565 = vmatprep.subr.bf16.mxu1 %v14743_v49 }
 0x81f   : > { %10414 = vmatpush1.bf16.msra.mxu0 %v10413_v32  ;;  %10567 = vmatpush3.bf16.msra.mxu1 %v10566_v59 }
 0x820   : > { %10416 = vmatprep.subr.bf16.mxu0 %v10415_v57  ;;  %10568 = vmatprep.subr.bf16.mxu1 %v14743_v49 }
 0x823   : > { %10418 = vmatpush1.bf16.msra.mxu0 %v10417_v55  ;;  %10570 = vmatpush3.bf16.msra.mxu1 %v10569_v33  ;;  %v6588_v33 = vand.u32 4294901760, %v13636_v61 }
 0x824   : > { %10420 = vmatprep.subr.bf16.mxu0 %v14785_v26  ;;  %10571 = vmatprep.subr.bf16.mxu1 %v14743_v49  ;;  %v14865_v26 = vld [vmem:[#allocation31_spill] sm:$0xff] }
 0x826   : > { %4903 = vmatmul.mubr.f32.vlgmr.msra.gmra.mrb[8].mxu0 %v13277_v6  ;;  %9244 = vmatmul.mubr.f32.vlgmr.msra.gmra.mrb[8].mxu1 %v13277_v6 }
 0x827   : > { %10422 = vmatpush1.bf16.msra.mxu0 %v14787_v41  ;;  %10573 = vmatpush3.bf16.msra.mxu1 %v14859_v16  ;;  %v14866_v41 = vld [vmem:[#allocation19_spill] sm:$0xff]  ;;  %v6591_v16 = vand.u32 4294901760, %v13641_v4 }
 0x828   : > { %10424 = vmatprep.subr.bf16.mxu0 %v14860_v30  ;;  %10574 = vmatprep.subr.bf16.mxu1 %v14743_v49  ;;  %v13648_v30 = vld [vmem:[%s14348_s10 + $0x10] sm:$0xff] }
 0x829   : > { %5005 = vmatprep.mubr.f32.mxu0 %v14744_v14  ;;  %9278 = vmatprep.mubr.msk.f32.mxu1 %vm11040_vm0, %v14744_v14 }
 0x82b   : > { %10426 = vmatpush1.bf16.msra.mxu0 %v14861_v25  ;;  %10576 = vmatpush3.bf16.msra.mxu1 %v14862_v13  ;;  %v13653_v25 = vld [vmem:[%s14348_s10 + $0x18] sm:$0xff]  ;;  %v13658_v13 = vsub.f32 %v13636_v61, %v6588_v33 }
 0x82c   : > { %10428 = vmatprep.subr.bf16.mxu0 %v14863_v45  ;;  %10577 = vmatprep.subr.bf16.mxu1 %v14743_v49  ;;  %v13663_v45 = vsub.f32 %v13641_v4, %v6591_v16 }
 0x82f   : > { %10430 = vmatpush1.bf16.msra.mxu0 %v14864_v24  ;;  %10579 = vmatpush3.bf16.msra.mxu1 %v14865_v26  ;;  %v6594_v24 = vand.u32 4294901760, %v13648_v30  ;;  %v6597_v26 = vand.u32 4294901760, %v13653_v25 }
 0x830   : > { %10432 = vmatprep.subr.bf16.mxu0 %v14866_v41  ;;  %10580 = vmatprep.subr.bf16.mxu1 %v14743_v49 }
 0x831   : > { %v13670_v41 = vsub.f32 %v13648_v30, %v6594_v24 }
 0x833   : > { %10434 = vmatpush1.bf16.msra.mxu0 %v14867_v42  ;;  %10582 = vmatpush3.bf16.msra.mxu1 %v14868_v38  ;;  %v13675_v42 = vsub.f32 %v13653_v25, %v6597_v26  ;;  %v13680_v38 = vld [vmem:[%s14348_s10 + $0x20] sm:$0xff] }
 0x834   : > { %10436 = vmatprep.subr.bf16.mxu0 %v14869_v27  ;;  %10583 = vmatprep.subr.bf16.mxu1 %v14743_v49  ;;  %v13685_v27 = vld [vmem:[%s14348_s10 + $0x28] sm:$0xff] }
 0x837   : > { %10438 = vmatpush1.bf16.msra.mxu0 %v14870_v56  ;;  %10585 = vmatpush3.bf16.msra.mxu1 %v14871_v58  ;;  %v6600_v56 = vand.u32 4294901760, %v13680_v38  ;;  %v6603_v58 = vand.u32 4294901760, %v13685_v27 }
 0x838   : > { %10440 = vmatprep.subr.bf16.mxu0 %v14872_v18  ;;  %10586 = vmatprep.subr.bf16.mxu1 %v14743_v49 }
 0x839   : > { %v13692_v18 = vsub.f32 %v13680_v38, %v6600_v56 }
 0x83b   : > { %10442 = vmatpush1.bf16.msra.mxu0 %v14873_v17  ;;  %10588 = vmatpush3.bf16.msra.mxu1 %v14874_v28  ;;  %v13695_v17 = vsub.f32 %v13685_v27, %v6603_v58  ;;  %v13700_v28 = vld [vmem:[%s14348_s10 + $0x30] sm:$0xff]  ;;  %v6695_v27 = vand.u32 4294901760, %v13670_v41 }
 0x83c   : > { %10444 = vmatprep.subr.bf16.mxu0 %v14875_v35  ;;  %10589 = vmatprep.subr.bf16.mxu1 %v14743_v49  ;;  %v6571_v35 = vld [vmem:[%s14348_s10 + $0x38] sm:$0xff] }
 0x83f   : > { %10446 = vmatpush1.bf16.msra.mxu0 %v14876_v52  ;;  %10591 = vmatpush3.bf16.msra.mxu1 %v14877_v10  ;;  %v6606_v52 = vand.u32 4294901760, %v13700_v28  ;;  %v6609_v10 = vand.u32 4294901760, %v6571_v35 }
 0x840   : > { %10448 = vmatprep.subr.bf16.mxu0 %v14878_v1  ;;  %10592 = vmatprep.subr.bf16.mxu1 %v14743_v49 }
 0x841   : > { %v13707_v1 = vsub.f32 %v13700_v28, %v6606_v52 }
 0x843   : > { %10450 = vmatpush1.bf16.msra.mxu0 %v14810_v21  ;;  %10594 = vmatpush3.bf16.msra.mxu1 %v14811_v40  ;;  %v4141_v21 = vld [vmem:[%s14347_s9] sm:$0x7]  ;;  %v14880_v40 = vsub.s32 2, %v14879_v51 }
 0x844   : > { %9281 = vmatprep.subr.mxu0 %v14744_v14  ;;  %10739 = vmatprep.subr.bf16.mxu1 %v14743_v49  ;;  %v4150_v22 = vrot.slane %v4141_v21, %v14881_v3  ;;  %v4146_v9 = vrot.slane %v4141_v21, %v14882_v46  ;;  %v6572_v51 = vld [vmem:[%s14348_s10 + $0x40] sm:$0xff] }
 0x845   : > { %v4154_v36 = vrot.slane %v4141_v21, %v14880_v40  ;;  %v13709_v21 = vsub.f32 %v6571_v35, %v6609_v10  ;;  %v6573_v40 = vld [vmem:[%s14348_s10 + $0x48] sm:$0xff] }
 0x846   : > { %5007 = vmatmul.mubr.f32.vlgmr.msra.gmra.mrb[8].mxu0 %v13277_v6  ;;  %9279 = vmatmul.mubr.f32.vlgmr.msra.gmra.mrb[8].mxu1 %v13277_v6  ;;  %v6615_v3 = vand.u32 4294901760, %v6573_v40 }
 0x847   : > { %9283 = vmatprep.mubr.msk.f32.mxu0 %vm11040_vm0, %v14744_v14  ;;  %9583 = vmatprep.mubr.msk.f32.mxu1 %vm11040_vm0, %v14744_v14 }
 0x919   : > { %v5008_v12 = vpop.f32.mrb[8].mxu0  ;;  %v5650_v23 = vpop.f32.mrb[8].mxu1 }
 0x91a   : > { %v10893_v47 = vadd.f32 %v5650_v23, %v4154_v36  ;;  %v5010_v6 = vpop.f32.mrb[9].mxu0  ;;  %v9280_v7 = vpop.f32.mrb[9].mxu1  ;;  %v13617_v8 = vadd.f32 %v5008_v12, %v4146_v9  ;;  %v6612_v36 = vand.u32 4294901760, %v6572_v51  ;;  %v13719_v12 = vsub.f32 %v6573_v40, %v6615_v3  ;;  %v6574_v23 = vld [vmem:[%s14348_s10 + $0x50] sm:$0xff] }
 0x91b   : > { %v10892_v50 = vadd.f32 %v5010_v6, %v4150_v22  ;;  %v6618_v6 = vand.u32 4294901760, %v6574_v23 }
 0x91c   : > { %v5656_v5 = vmax.f32 %v10893_v47, 0.0  ;;  %v5654_v43 = vmax.f32 %v13617_v8, 0.0  ;;  %v13717_v22 = vsub.f32 %v6572_v51, %v6612_v36  ;;  %v6575_v47 = vld [vmem:[%s14348_s10 + $0x58] sm:$0xff]  ;;  %v13754_v8 = vpack.c.bf16 %v6591_v16, %v6588_v33 }
 0x91d   : > { %v5655_v11 = vmax.f32 %v10892_v50, 0.0  ;;  %v6621_v7 = vand.u32 4294901760, %v6575_v47  ;;  %v13727_v50 = vsub.f32 %v6574_v23, %v6618_v6  ;;  %v13777_v48 = vpack.c.bf16 %v6615_v3, %v6612_v36 }
 0x91e   : > { %v5658_v39 = vand.u32 4294901760, %v5656_v5  ;;  %v13623_v37 = vand.u32 4294901760, %v5654_v43  ;;  %v6681_v33 = vand.u32 4294901760, %v13658_v13  ;;  %v6688_v16 = vand.u32 4294901760, %v13663_v45 }
 0x91f   : > { %v5723_v34 = vand.u32 4294901760, %v5655_v11  ;;  %v6696_v51 = vsub.f32 %v13670_v41, %v6695_v27  ;;  %v14556_v23 = vand.u32 4294901760, %v13692_v18 }
 0x920   : > { %v5735_v0 = vsub.f32 %v5656_v5, %v5658_v39  ;;  %9282 = vmatpush3.xpose.msra.mxu0 %v5658_v39  ;;  %v13729_v5 = vsub.f32 %v6575_v47, %v6621_v7  ;;  %v6682_v25 = vsub.f32 %v13658_v13, %v6681_v33  ;;  %v14555_v47 = vand.u32 4294901760, %v13695_v17 }
 0x921   : > { %v5724_v60 = vsub.f32 %v5655_v11, %v5723_v34  ;;  %9286 = vmatprep.subr.mxu0 %v14744_v14  ;;  %v6697_v36 = vand.u32 4294901760, %v6696_v51 }
 0x922   : > { %v5736_v54 = vand.u32 4294901760, %v5735_v0 }
 0x923   : > { %v5725_v44 = vand.u32 4294901760, %v5724_v60 }
 0x924   : > { %v5737_v29 = vsub.f32 %v5735_v0, %v5736_v54 }
 0x925   : > { %v5726_v62 = vsub.f32 %v5724_v60, %v5725_v44 }
 0x926   : > { %v5738_v2 = vand.u32 4294901760, %v5737_v29 }
 0x927   : > { %v5727_v19 = vand.u32 4294901760, %v5726_v62 }
 0x929   : > { %9284 = vmatmul.mubr.f32.vlgmr.msra.gmra.mrb[10].mxu0 %v5727_v19 }
 0x92a   : > { %9287 = vmatpush3.xpose.msra.mxu0 %v5738_v2  ;;  %9288 = vmatprep.mubr.msk.f32.mxu0 %vm11040_vm0, %v14744_v14 }
 0x92b   : > { %9291 = vmatprep.subr.mxu0 %v14744_v14 }
 0x931   : > { %9289 = vmatmul.mubr.f32.vlgmr.msra.gmra.mrb[10].mxu0 %v5723_v34 }
 0x932   : > { %9292 = vmatpush3.xpose.msra.mxu0 %v5735_v0  ;;  %9293 = vmatprep.mubr.msk.f32.mxu0 %vm11040_vm0, %v14744_v14 }
 0x933   : > { %9296 = vmatprep.subr.mxu0 %v14744_v14 }
 0x939   : > { %9294 = vmatmul.mubr.f32.vlgmr.msra.gmra.mrb[10].mxu0 %v5724_v60 }
 0x93a   : > { %9297 = vmatpush3.xpose.msra.mxu0 %v5658_v39  ;;  %9298 = vmatprep.mubr.msk.f32.mxu0 %vm11040_vm0, %v14744_v14 }
 0x93b   : > { %9301 = vmatprep.subr.mxu0 %v14744_v14 }
 0x941   : > { %9299 = vmatmul.mubr.f32.vlgmr.msra.gmra.mrb[10].mxu0 %v5725_v44 }
 0x942   : > { %9302 = vmatpush3.xpose.msra.mxu0 %v5736_v54  ;;  %9303 = vmatprep.mubr.msk.f32.mxu0 %vm11040_vm0, %v14744_v14 }
 0x943   : > { %9306 = vmatprep.subr.mxu0 %v14744_v14 }
 0x949   : > { %9304 = vmatmul.mubr.f32.vlgmr.msra.gmra.mrb[10].mxu0 %v5723_v34 }
 0x94a   : > { %9307 = vmatpush3.xpose.msra.mxu0 %v5658_v39  ;;  %9308 = vmatprep.mubr.msk.f32.mxu0 %vm11040_vm0, %v14744_v14 }
 0x94b   : > { %9311 = vmatprep.subr.mxu0 %v14744_v14 }
 0x951   : > { %9309 = vmatmul.mubr.f32.vlgmr.msra.gmra.mrb[10].mxu0 %v5723_v34  ;;  %v6196_v34 = vsub.f32 %v5654_v43, %v13623_v37  ;;  %v13761_v43 = vpack.c.bf16 %v6597_v26, %v6594_v24  ;;  %v6689_v24 = vsub.f32 %v13663_v45, %v6688_v16  ;;  %v6683_v26 = vand.u32 4294901760, %v6682_v25 }
 0x952   : > { %9312 = vmatpush3.msra.mxu0 %v13623_v37  ;;  %9313 = vmatprep.mubr.msk.f32.mxu0 %vm11040_vm0, %v14744_v14 }
 0x953   : > { %9316 = vmatprep.subr.mxu0 %v14744_v14  ;;  %v6197_v44 = vand.u32 4294901760, %v6196_v34  ;;  %v6690_v38 = vand.u32 4294901760, %v6689_v24 }
 0x955   : > { %v6198_v2 = vsub.f32 %v6196_v34, %v6197_v44 }
 0x957   : > { %v6199_v9 = vand.u32 4294901760, %v6198_v2 }
 0xa24   : > { %v6099_v32 = vpop.f32.mrb[10].mxu0 }
 0xa25   : > { %v6103_v20 = vsel %vm2965_vm2, %v6099_v32, -9e+15  ;;  %v9310_v59 = vpop.f32.mrb[11].mxu0  ;;  %v13773_v32 = vpack.c.bf16 %v6609_v10, %v6606_v52  ;;  %v13824_v10 = vpack.c.bf16 %v6690_v38, %v6683_v26 }
 0xa26   : > { %v6104_v15 = vsel %vm2967_vm3, %v6103_v20, -inf  ;;  %v6576_v59 = vld [vmem:[%s14348_s10 + $0x60] sm:$0xff] }
 0xa27   : > { %6105 = vmax.xlane.f32.xlu1 %v6104_v15  ;;  %v6577_v15 = vld [vmem:[%s14348_s10 + $0x68] sm:$0xff] }
 0xab4   : > { %v6106_v63 = vpop.xlane.xlu1 %6105 }
 0xab5   : > { %v6107_v57 = vsub.f32 %v6103_v20, %v6106_v63  ;;  %v13781_v20 = vpack.c.bf16 %v6621_v7, %v6618_v6  ;;  %v6624_v63 = vand.u32 4294901760, %v6576_v59  ;;  %v6710_v7 = vsub.f32 %v13692_v18, %v14556_v23 }
 0xab7   : > { %v6108_v53 = vmul.f32 1.442695, %v6107_v57  ;;  %v6627_v57 = vand.u32 4294901760, %v6577_v15 }
 0xab9   : > { %11027 = vpow2.f32 %v6108_v53  ;;  %v13792_v53 = vpack.c.bf16 %v6627_v57, %v6624_v63  ;;  %v13817_v28 = vsub.f32 %v6577_v15, %v6627_v57 }
 0xabb   : > { %v14547_v51 = vand.u32 4294901760, %v13817_v28 }
 0xac3   : > { %v11028_v31 = vpop.eup %11027 }
 0xac4   : > { %v6110_v55 = vsel %vm2967_vm3, %v11028_v31, 0.0 }
 0xac5   : > { %6111 = vadd.xlane.f32.xlu1 %v6110_v55  ;;  %v6579_v55 = vld [vmem:[%s14348_s10 + $0x78] sm:$0xff] }
 0xac6   : > { %v6633_v4 = vand.u32 4294901760, %v6579_v55 }
 0xac8   : > { %v13821_v52 = vsub.f32 %v6579_v55, %v6633_v4  ;;  %v14549_v55 = vand.u32 4294901760, %v13729_v5 }
 0xaca   : > { %v6759_v25 = vsub.f32 %v13729_v5, %v14549_v55 }
 0xacc   : > { %v6760_v26 = vand.u32 4294901760, %v6759_v25  ;;  %v10653_v25 = vpack.c.bf16 %v13709_v21, %v13707_v1 }
 0xb52   : > { %v6112_v11 = vpop.xlane.xlu1 %6111 }
 0xb53   : > { %11029 = vrcp.f32 %v6112_v11  ;;  %v6717_v11 = vsub.f32 %v13695_v17, %v14555_v47 }
 0xb5d   : > { %v11030_v39 = vpop.eup %11029 }
 0xb5e   : > { %v6114_v0 = vmul.f32 %v11030_v39, %v11028_v31  ;;  %v6578_v31 = vld [vmem:[%s14348_s10 + $0x70] sm:$0xff]  ;;  %v6711_v39 = vand.u32 4294901760, %v6710_v7 }
 0xb5f   : > { %v6630_v61 = vand.u32 4294901760, %v6578_v31 }
 0xb60   : > { %v6116_v60 = vsel %vm2967_vm3, %v6114_v0, 0  ;;  %v14554_v0 = vand.u32 4294901760, %v13707_v1 }
 0xb61   : > { %v6184_v54 = vand.u32 4294901760, %v6116_v60  ;;  %v13804_v30 = vpack.c.bf16 %v6633_v4, %v6630_v61  ;;  %v13819_v35 = vsub.f32 %v6578_v31, %v6630_v61  ;;  %v14550_v31 = vand.u32 4294901760, %v13727_v50 }
 0xb63   : > { %v6185_v29 = vsub.f32 %v6116_v60, %v6184_v54  ;;  %v14553_v60 = vand.u32 4294901760, %v13709_v21  ;;  %v6752_v4 = vsub.f32 %v13727_v50, %v14550_v31 }
 0xb65   : > { %v6186_v62 = vand.u32 4294901760, %v6185_v29  ;;  %v6753_v24 = vand.u32 4294901760, %v6752_v4  ;;  %v10650_v4 = vpack.c.bf16 %v13695_v17, %v13692_v18 }
 0xb67   : > { %v6187_v19 = vsub.f32 %v6185_v29, %v6186_v62 }
 0xb69   : > { %v6188_v46 = vand.u32 4294901760, %v6187_v19  ;;  %v14552_v19 = vand.u32 4294901760, %v13717_v22 }
 0xb6b   : > { %9314 = vmatmul.mubr.f32.vlgmr.msra.gmra.mrb[12].mxu0 %v6188_v46  ;;  %v14551_v46 = vand.u32 4294901760, %v13719_v12 }
 0xb6c   : > { %9317 = vmatpush3.msra.mxu0 %v6199_v9  ;;  %9318 = vmatprep.mubr.msk.f32.mxu0 %vm11040_vm0, %v14744_v14 }
 0xb6d   : > { %9321 = vmatprep.subr.mxu0 %v14744_v14  ;;  %v6745_v15 = vsub.f32 %v13719_v12, %v14551_v46 }
 0xb6f   : > { %v6746_v57 = vand.u32 4294901760, %v6745_v15 }
 0xb73   : > { %9319 = vmatmul.mubr.f32.vlgmr.msra.gmra.mrb[12].mxu0 %v6184_v54 }
 0xb74   : > { %9322 = vmatpush3.msra.mxu0 %v6196_v34  ;;  %9323 = vmatprep.mubr.msk.f32.mxu0 %vm11040_vm0, %v14744_v14  ;;  %v6718_v34 = vand.u32 4294901760, %v6717_v11 }
 0xb75   : > { %9326 = vmatprep.subr.mxu0 %v14744_v14 }
 0xb7b   : > { %9324 = vmatmul.mubr.f32.vlgmr.msra.gmra.mrb[12].mxu0 %v6185_v29  ;;  %v6731_v29 = vsub.f32 %v13709_v21, %v14553_v60 }
 0xb7c   : > { %9327 = vmatpush3.msra.mxu0 %v13623_v37  ;;  %9328 = vmatprep.mubr.msk.f32.mxu0 %vm11040_vm0, %v14744_v14 }
 0xb7d   : > { %9331 = vmatprep.subr.mxu0 %v14744_v14  ;;  %v6732_v2 = vand.u32 4294901760, %v6731_v29 }
 0xb83   : > { %9329 = vmatmul.mubr.f32.vlgmr.msra.gmra.mrb[12].mxu0 %v6186_v62 }
 0xb84   : > { %9332 = vmatpush3.msra.mxu0 %v6197_v44  ;;  %9333 = vmatprep.mubr.msk.f32.mxu0 %vm11040_vm0, %v14744_v14  ;;  %v6724_v44 = vsub.f32 %v13707_v1, %v14554_v0 }
 0xb85   : > { %9336 = vmatprep.subr.mxu0 %v14744_v14 }
 0xb86   : > { %v6725_v62 = vand.u32 4294901760, %v6724_v44 }
 0xb88   : > { %v10629_v9 = vpack.c.bf16 %v6732_v2, %v6725_v62 }
 0xb8b   : > { %9334 = vmatmul.mubr.f32.vlgmr.msra.gmra.mrb[12].mxu0 %v6184_v54 }
 0xb8c   : > { %9337 = vmatpush3.msra.mxu0 %v13623_v37  ;;  %9338 = vmatprep.mubr.msk.f32.mxu0 %vm11040_vm0, %v14744_v14  ;;  %v13769_v37 = vpack.c.bf16 %v6603_v58, %v6600_v56  ;;  %v6702_v56 = vand.u32 4294901760, %v13675_v42  ;;  %v13815_v58 = vsub.f32 %v6576_v59, %v6624_v63  ;;  %v6738_v59 = vsub.f32 %v13717_v22, %v14552_v19  ;;  %v7238_v19 = vld [vmem:[%s14350_s12 + $0x48] sm:$0xff] }
 0xb8d   : > { %10595 = vmatprep.subr.bf16.mxu0 %v14743_v49 }
 0xb8e   : > { %v6703_v40 = vsub.f32 %v13675_v42, %v6702_v56  ;;  %v6739_v63 = vand.u32 4294901760, %v6738_v59  ;;  %v14548_v38 = vand.u32 4294901760, %v13815_v58 }
 0xb90   : > { %v6704_v3 = vand.u32 4294901760, %v6703_v40  ;;  %v10632_v61 = vpack.c.bf16 %v6746_v57, %v6739_v63  ;;  %v10635_v40 = vpack.c.bf16 %v6760_v26, %v6753_v24  ;;  %v10644_v63 = vpack.c.bf16 %v13663_v45, %v13658_v13 }
 0xb91   : > { %v10647_v57 = vpack.c.bf16 %v13675_v42, %v13670_v41  ;;  %v10656_v24 = vpack.c.bf16 %v13719_v12, %v13717_v22  ;;  %v10659_v26 = vpack.c.bf16 %v13729_v5, %v13727_v50  ;;  %v14884_v13 = vand.u32 4294901760, %v13692_v18 }
 0xb92   : > { %v10623_v6 = vpack.c.bf16 %v6704_v3, %v6697_v36  ;;  %v6766_v36 = vsub.f32 %v13815_v58, %v14548_v38  ;;  %v6773_v3 = vsub.f32 %v13817_v28, %v14547_v51  ;;  %v7237_v51 = vld [vmem:[%s14350_s12 + $0x40] sm:$0xff]  ;;  %v14885_v45 = vand.u32 4294901760, %v13695_v17 }
 0xb93   : > { %9339 = vmatmul.mubr.f32.vlgmr.msra.gmra.mrb[12].mxu0 %v6184_v54  ;;  %v10626_v54 = vpack.c.bf16 %v6718_v34, %v6711_v39  ;;  %v14546_v39 = vand.u32 4294901760, %v13819_v35  ;;  %v14545_v34 = vand.u32 4294901760, %v13821_v52  ;;  %v14887_v41 = vand.u32 4294901760, %v13709_v21 }
 0xb94   : > { %10597 = vmatpush3.bf16.msra.mxu0 %v13754_v8  ;;  %9373 = vmatprep.mubr.msk.f32.mxu0 %vm11040_vm0, %v14744_v14  ;;  %v6767_v7 = vand.u32 4294901760, %v6766_v36  ;;  %v6774_v11 = vand.u32 4294901760, %v6773_v3  ;;  %v10662_v36 = vpack.c.bf16 %v13817_v28, %v13815_v58  ;;  %v10665_v3 = vpack.c.bf16 %v13821_v52, %v13819_v35 }
 0xb95   : > { %10598 = vmatprep.subr.bf16.mxu0 %v14743_v49  ;;  %v6780_v29 = vsub.f32 %v13819_v35, %v14546_v39  ;;  %v6787_v62 = vsub.f32 %v13821_v52, %v14545_v34  ;;  %v7236_v39 = vld [vmem:[%s14350_s12 + $0x38] sm:$0xff]  ;;  %v14890_v18 = vand.u32 4294901760, %v13727_v50  ;;  %v14891_v17 = vand.u32 4294901760, %v13729_v5  ;;  %v7239_v50 = vld [vmem:[%s14350_s12 + $0x50] sm:$0xff] }
 0xb96   : > { %v10638_v44 = vpack.c.bf16 %v6774_v11, %v6767_v7  ;;  %v14893_v21 = vand.u32 4294901760, %v13817_v28  ;;  %v7240_v5 = vld [vmem:[%s14350_s12 + $0x58] sm:$0xff] }
 0xb97   : > { %v6781_v2 = vand.u32 4294901760, %v6780_v29  ;;  %v6788_v59 = vand.u32 4294901760, %v6787_v62  ;;  %v7244_v28 = vld [vmem:[%s14350_s12 + $0x78] sm:$0xff] }
 0xb98   : > { %10600 = vmatpush3.bf16.msra.mxu0 %v13761_v43 }
 0xb99   : > { %10601 = vmatprep.subr.bf16.mxu0 %v14743_v49  ;;  %v10641_v15 = vpack.c.bf16 %v6788_v59, %v6781_v2 }
 0xb9c   : > { %10603 = vmatpush3.bf16.msra.mxu0 %v13769_v37 }
 0xb9d   : > { %10604 = vmatprep.subr.bf16.mxu0 %v14743_v49 }
 0xba0   : > { %10606 = vmatpush3.bf16.msra.mxu0 %v13773_v32 }
 0xba1   : > { %10607 = vmatprep.subr.bf16.mxu0 %v14743_v49 }
 0xba4   : > { %10609 = vmatpush3.bf16.msra.mxu0 %v13777_v48 }
 0xba5   : > { %10610 = vmatprep.subr.bf16.mxu0 %v14743_v49 }
 0xba8   : > { %10612 = vmatpush3.bf16.msra.mxu0 %v13781_v20 }
 0xba9   : > { %10613 = vmatprep.subr.bf16.mxu0 %v14743_v49 }
 0xbac   : > { %10615 = vmatpush3.bf16.msra.mxu0 %v13792_v53 }
 0xbad   : > { %10616 = vmatprep.subr.bf16.mxu0 %v14743_v49 }
 0xbb0   : > { %10618 = vmatpush3.bf16.msra.mxu0 %v13804_v30 }
 0xbb1   : > { %10619 = vmatprep.subr.bf16.mxu0 %v14743_v49 }
 0xc66   : > { %v6560_v7 = vpop.f32.mrb[12].mxu0 }
 0xc67   : > { %v13896_v11 = vand.u32 4294901760, %v6560_v7  ;;  %v9340_v29 = vpop.f32.mrb[13].mxu0 }
 0xc69   : > { %v13899_v62 = vsub.f32 %v6560_v7, %v13896_v11 }
 0xc6b   : > { %v6670_v2 = vand.u32 4294901760, %v13899_v62 }
 0xc6d   : > { %v6671_v59 = vsub.f32 %v13899_v62, %v6670_v2 }
 0xc6f   : > { %v6672_v34 = vand.u32 4294901760, %v6671_v59  ;;  %v7235_v59 = vld [vmem:[%s14350_s12 + $0x30] sm:$0xff] }
 0xc71   : > { %9374 = vmatmul.mubr.f32.vlgmr.msra.gmra.mrb[14].mxu0 %v6672_v34 }
 0xc72   : > { %10621 = vmatpush3.bf16.msra.mxu0 %v13824_v10  ;;  %9408 = vmatprep.mubr.msk.f32.mxu0 %vm11040_vm0, %v14744_v14  ;;  %v7229_v10 = vld [vmem:[%s14350_s12] sm:$0xff] }
 0xc73   : > { %10622 = vmatprep.subr.bf16.mxu0 %v14743_v49 }
 0xc76   : > { %10624 = vmatpush3.bf16.msra.mxu0 %v10623_v6  ;;  %v7230_v6 = vld [vmem:[%s14350_s12 + $0x8] sm:$0xff] }
 0xc77   : > { %10625 = vmatprep.subr.bf16.mxu0 %v14743_v49 }
 0xc7a   : > { %10627 = vmatpush3.bf16.msra.mxu0 %v10626_v54  ;;  %v7231_v54 = vld [vmem:[%s14350_s12 + $0x10] sm:$0xff] }
 0xc7b   : > { %10628 = vmatprep.subr.bf16.mxu0 %v14743_v49  ;;  %v7259_v34 = vand.u32 4294901760, %v7231_v54 }
 0xc7d   : > { %v13953_v46 = vsub.f32 %v7231_v54, %v7259_v34  ;;  %v7280_v54 = vand.u32 4294901760, %v7238_v19 }
 0xc7e   : > { %10630 = vmatpush3.bf16.msra.mxu0 %v10629_v9  ;;  %v7253_v9 = vand.u32 4294901760, %v7229_v10 }
 0xc7f   : > { %10631 = vmatprep.subr.bf16.mxu0 %v14743_v49 }
 0xc80   : > { %v13949_v55 = vsub.f32 %v7229_v10, %v7253_v9  ;;  %v7271_v10 = vand.u32 4294901760, %v7235_v59 }
 0xc82   : > { %10633 = vmatpush3.bf16.msra.mxu0 %v10632_v61  ;;  %v7256_v61 = vand.u32 4294901760, %v7230_v6 }
 0xc83   : > { %10634 = vmatprep.subr.bf16.mxu0 %v14743_v49 }
 0xc84   : > { %v13947_v38 = vpack.c.bf16 %v7256_v61, %v7253_v9  ;;  %v13951_v31 = vsub.f32 %v7230_v6, %v7256_v61  ;;  %v7274_v6 = vand.u32 4294901760, %v7236_v39  ;;  %v7277_v9 = vand.u32 4294901760, %v7237_v51 }
 0xc85   : > { %v13969_v61 = vsub.f32 %v7235_v59, %v7271_v10 }
 0xc86   : > { %10636 = vmatpush3.bf16.msra.mxu0 %v10635_v40  ;;  %v7232_v40 = vld [vmem:[%s14350_s12 + $0x18] sm:$0xff]  ;;  %10741 = vmatpush3.bf16.msra.mxu1 %v13947_v38 }
 0xc87   : > { %10637 = vmatprep.subr.bf16.mxu0 %v14743_v49  ;;  %10742 = vmatprep.subr.bf16.mxu1 %v14743_v49 }
 0xc8a   : > { %10639 = vmatpush3.bf16.msra.mxu0 %v10638_v44  ;;  %v7233_v44 = vld [vmem:[%s14350_s12 + $0x20] sm:$0xff] }
 0xc8b   : > { %10640 = vmatprep.subr.bf16.mxu0 %v14743_v49  ;;  %v7265_v7 = vand.u32 4294901760, %v7233_v44 }
 0xc8d   : > { %v13962_v47 = vsub.f32 %v7233_v44, %v7265_v7  ;;  %v13975_v44 = vsub.f32 %v7238_v19, %v7280_v54  ;;  %v13989_v19 = vpack.c.bf16 %v7274_v6, %v7271_v10 }
 0xc8e   : > { %10642 = vmatpush3.bf16.msra.mxu0 %v10641_v15  ;;  %v7234_v15 = vld [vmem:[%s14350_s12 + $0x28] sm:$0xff] }
 0xc8f   : > { %10643 = vmatprep.subr.bf16.mxu0 %v14743_v49  ;;  %v7268_v29 = vand.u32 4294901760, %v7234_v15 }
 0xc91   : > { %9409 = vmatmul.mubr.f32.vlgmr.msra.gmra.mrb[14].mxu0 %v13896_v11  ;;  %v13965_v23 = vsub.f32 %v7234_v15, %v7268_v29 }
 0xc92   : > { %10645 = vmatpush3.bf16.msra.mxu0 %v10644_v63  ;;  %9443 = vmatprep.mubr.msk.f32.mxu0 %vm11040_vm0, %v14744_v14  ;;  %v7262_v63 = vand.u32 4294901760, %v7232_v40 }
 0xc93   : > { %10646 = vmatprep.subr.bf16.mxu0 %v14743_v49 }
 0xc94   : > { %v13958_v60 = vpack.c.bf16 %v7262_v63, %v7259_v34  ;;  %v13960_v0 = vsub.f32 %v7232_v40, %v7262_v63  ;;  %v13971_v34 = vsub.f32 %v7236_v39, %v7274_v6  ;;  %v13973_v40 = vsub.f32 %v7237_v51, %v7277_v9 }
 0xc95   : > { %v13997_v51 = vpack.c.bf16 %v7280_v54, %v7277_v9  ;;  %v10692_v39 = vpack.c.bf16 %v6688_v16, %v6681_v33  ;;  %v10698_v33 = vpack.c.bf16 %v14885_v45, %v14884_v13  ;;  %v14886_v16 = vand.u32 4294901760, %v13707_v1 }
 0xc96   : > { %10648 = vmatpush3.bf16.msra.mxu0 %v10647_v57  ;;  %10744 = vmatpush3.bf16.msra.mxu1 %v13958_v60  ;;  %v13981_v57 = vpack.c.bf16 %v7268_v29, %v7265_v7  ;;  %v14892_v1 = vand.u32 4294901760, %v13815_v58  ;;  %v7243_v58 = vld [vmem:[%s14350_s12 + $0x70] sm:$0xff] }
 0xc97   : > { %10649 = vmatprep.subr.bf16.mxu0 %v14743_v49  ;;  %10745 = vmatprep.subr.bf16.mxu1 %v14743_v49  ;;  %v10701_v42 = vpack.c.bf16 %v14887_v41, %v14886_v16  ;;  %v7374_v16 = vand.u32 4294901760, %v13962_v47  ;;  %v7381_v41 = vand.u32 4294901760, %v13965_v23 }
 0xc9a   : > { %10651 = vmatpush3.bf16.msra.mxu0 %v10650_v4  ;;  %10747 = vmatpush3.bf16.msra.mxu1 %v13981_v57  ;;  %v10695_v4 = vpack.c.bf16 %v6702_v56, %v6695_v27  ;;  %v14888_v27 = vand.u32 4294901760, %v13717_v22  ;;  %v14889_v56 = vand.u32 4294901760, %v13719_v12  ;;  %v14894_v22 = vand.u32 4294901760, %v13819_v35 }
 0xc9b   : > { %10652 = vmatprep.subr.bf16.mxu0 %v14743_v49  ;;  %10748 = vmatprep.subr.bf16.mxu1 %v14743_v49  ;;  %v14895_v12 = vand.u32 4294901760, %v13821_v52  ;;  %v7295_v35 = vand.u32 4294901760, %v7243_v58  ;;  %v7298_v52 = vand.u32 4294901760, %v7244_v28 }
 0xc9d   : > { %v14142_v10 = vsub.f32 %v7243_v58, %v7295_v35  ;;  %v14144_v6 = vsub.f32 %v7244_v28, %v7298_v52 }
 0xc9e   : > { %10654 = vmatpush3.bf16.msra.mxu0 %v10653_v25  ;;  %10750 = vmatpush3.bf16.msra.mxu1 %v13989_v19  ;;  %v10704_v25 = vpack.c.bf16 %v14889_v56, %v14888_v27  ;;  %v7375_v56 = vsub.f32 %v13962_v47, %v7374_v16 }
 0xc9f   : > { %10655 = vmatprep.subr.bf16.mxu0 %v14743_v49  ;;  %10751 = vmatprep.subr.bf16.mxu1 %v14743_v49 }
 0xca2   : > { %10657 = vmatpush3.bf16.msra.mxu0 %v10656_v24  ;;  %10753 = vmatpush3.bf16.msra.mxu1 %v13997_v51  ;;  %v10707_v24 = vpack.c.bf16 %v14891_v17, %v14890_v18  ;;  %v7376_v17 = vand.u32 4294901760, %v7375_v56 }
 0xca3   : > { %10658 = vmatprep.subr.bf16.mxu0 %v14743_v49  ;;  %10754 = vmatprep.subr.bf16.mxu1 %v14743_v49 }
 0xca6   : > { %10660 = vmatpush3.bf16.msra.mxu0 %v10659_v26  ;;  %v10710_v26 = vpack.c.bf16 %v14893_v21, %v14892_v1  ;;  %v7388_v1 = vand.u32 4294901760, %v13969_v61  ;;  %v7395_v21 = vand.u32 4294901760, %v13971_v34 }
 0xca7   : > { %10661 = vmatprep.subr.bf16.mxu0 %v14743_v49 }
 0xcaa   : > { %10663 = vmatpush3.bf16.msra.mxu0 %v10662_v36  ;;  %v10713_v36 = vpack.c.bf16 %v14895_v12, %v14894_v22  ;;  %v7389_v22 = vsub.f32 %v13969_v61, %v7388_v1  ;;  %v7396_v12 = vsub.f32 %v13971_v34, %v7395_v21 }
 0xcab   : > { %10664 = vmatprep.subr.bf16.mxu0 %v14743_v49 }
 0xcae   : > { %10666 = vmatpush3.bf16.msra.mxu0 %v10665_v3  ;;  %v7346_v3 = vand.u32 4294901760, %v13949_v55 }
 0xcaf   : > { %10667 = vmatprep.subr.bf16.mxu0 %v14743_v49 }
 0xcb1   : > { %9444 = vmatmul.mubr.f32.vlgmr.msra.gmra.mrb[14].mxu0 %v13899_v62  ;;  %v14125_v62 = vpack.c.bf16 %v7298_v52, %v7295_v35 }
 0xcb2   : > { %10669 = vmatpush3.bf16.msra.mxu0 %v13754_v8  ;;  %9478 = vmatprep.mubr.msk.f32.mxu0 %vm11040_vm0, %v14744_v14 }
 0xcb3   : > { %10670 = vmatprep.subr.bf16.mxu0 %v14743_v49 }
 0xcb6   : > { %10672 = vmatpush3.bf16.msra.mxu0 %v13761_v43 }
 0xcb7   : > { %10673 = vmatprep.subr.bf16.mxu0 %v14743_v49 }
 0xcba   : > { %10675 = vmatpush3.bf16.msra.mxu0 %v13769_v37 }
 0xcbb   : > { %10676 = vmatprep.subr.bf16.mxu0 %v14743_v49 }
 0xcbe   : > { %10678 = vmatpush3.bf16.msra.mxu0 %v13773_v32 }
 0xcbf   : > { %10679 = vmatprep.subr.bf16.mxu0 %v14743_v49 }
 0xcc2   : > { %10681 = vmatpush3.bf16.msra.mxu0 %v13777_v48 }
 0xcc3   : > { %10682 = vmatprep.subr.bf16.mxu0 %v14743_v49 }
 0xcc6   : > { %10684 = vmatpush3.bf16.msra.mxu0 %v13781_v20 }
 0xcc7   : > { %10685 = vmatprep.subr.bf16.mxu0 %v14743_v49 }
 0xcca   : > { %10687 = vmatpush3.bf16.msra.mxu0 %v13792_v53 }
 0xccb   : > { %10688 = vmatprep.subr.bf16.mxu0 %v14743_v49 }
 0xcce   : > { %10690 = vmatpush3.bf16.msra.mxu0 %v13804_v30 }
 0xccf   : > { %10691 = vmatprep.subr.bf16.mxu0 %v14743_v49 }
 0xcd1   : > { %9479 = vmatmul.mubr.f32.vlgmr.msra.gmra.mrb[14].mxu0 %v6670_v2  ;;  %v7347_v2 = vsub.f32 %v13949_v55, %v7346_v3 }
 0xcd2   : > { %10693 = vmatpush3.bf16.msra.mxu0 %v10692_v39  ;;  %9513 = vmatprep.mubr.msk.f32.mxu0 %vm11040_vm0, %v14744_v14  ;;  %v7360_v39 = vand.u32 4294901760, %v13953_v46 }
 0xcd3   : > { %10694 = vmatprep.subr.bf16.mxu0 %v14743_v49  ;;  %v7348_v9 = vand.u32 4294901760, %v7347_v2 }
 0xcd4   : > { %v7361_v45 = vsub.f32 %v13953_v46, %v7360_v39 }
 0xcd6   : > { %10696 = vmatpush3.bf16.msra.mxu0 %v10695_v4  ;;  %v7367_v4 = vand.u32 4294901760, %v13960_v0 }
 0xcd7   : > { %10697 = vmatprep.subr.bf16.mxu0 %v14743_v49 }
 0xcda   : > { %10699 = vmatpush3.bf16.msra.mxu0 %v10698_v33  ;;  %v7368_v33 = vsub.f32 %v13960_v0, %v7367_v4 }
 0xcdb   : > { %10700 = vmatprep.subr.bf16.mxu0 %v14743_v49 }
 0xcdc   : > { %v7369_v27 = vand.u32 4294901760, %v7368_v33 }
 0xcde   : > { %10702 = vmatpush3.bf16.msra.mxu0 %v10701_v42  ;;  %v7362_v42 = vand.u32 4294901760, %v7361_v45 }
 0xcdf   : > { %10703 = vmatprep.subr.bf16.mxu0 %v14743_v49 }
 0xce0   : > { %v10767_v18 = vpack.c.bf16 %v7369_v27, %v7362_v42 }
 0xce2   : > { %10705 = vmatpush3.bf16.msra.mxu0 %v10704_v25  ;;  %v7382_v25 = vsub.f32 %v13965_v23, %v7381_v41 }
 0xce3   : > { %10706 = vmatprep.subr.bf16.mxu0 %v14743_v49 }
 0xce6   : > { %10708 = vmatpush3.bf16.msra.mxu0 %v10707_v24  ;;  %v7383_v24 = vand.u32 4294901760, %v7382_v25 }
 0xce7   : > { %10709 = vmatprep.subr.bf16.mxu0 %v14743_v49 }
 0xcea   : > { %10711 = vmatpush3.bf16.msra.mxu0 %v10710_v26  ;;  %v10770_v26 = vpack.c.bf16 %v7383_v24, %v7376_v17  ;;  %v14558_v17 = vand.u32 4294901760, %v14142_v10  ;;  %v14557_v24 = vand.u32 4294901760, %v14144_v6 }
 0xceb   : > { %10712 = vmatprep.subr.bf16.mxu0 %v14743_v49 }
 0xcee   : > { %10714 = vmatpush3.bf16.msra.mxu0 %v10713_v36  ;;  %v7390_v36 = vand.u32 4294901760, %v7389_v22 }
 0xcef   : > { %10715 = vmatprep.subr.bf16.mxu0 %v14743_v49 }
 0xcf1   : > { %9514 = vmatmul.mubr.f32.vlgmr.msra.gmra.mrb[14].mxu0 %v13896_v11 }
 0xcf2   : > { %10717 = vmatpush3.bf16.msra.mxu0 %v13754_v8  ;;  %9548 = vmatprep.mubr.msk.f32.mxu0 %vm11040_vm0, %v14744_v14  ;;  %v7283_v8 = vand.u32 4294901760, %v7239_v50 }
 0xcf3   : > { %10718 = vmatprep.subr.bf16.mxu0 %v14743_v49 }
 0xcf4   : > { %v14133_v63 = vsub.f32 %v7239_v50, %v7283_v8  ;;  %v7397_v50 = vand.u32 4294901760, %v7396_v12  ;;  %v7445_v12 = vsub.f32 %v14142_v10, %v14558_v17 }
 0xcf6   : > { %10720 = vmatpush3.bf16.msra.mxu0 %v13761_v43  ;;  %v7286_v43 = vand.u32 4294901760, %v7240_v5  ;;  %v7416_v58 = vand.u32 4294901760, %v14133_v63 }
 0xcf7   : > { %10721 = vmatprep.subr.bf16.mxu0 %v14743_v49 }
 0xcf8   : > { %v14135_v7 = vsub.f32 %v7240_v5, %v7286_v43  ;;  %v7402_v5 = vand.u32 4294901760, %v13973_v40  ;;  %v7417_v52 = vsub.f32 %v14133_v63, %v7416_v58 }
 0xcfa   : > { %10723 = vmatpush3.bf16.msra.mxu0 %v13769_v37  ;;  %v14103_v37 = vpack.c.bf16 %v7286_v43, %v7283_v8  ;;  %v7409_v8 = vand.u32 4294901760, %v13975_v44  ;;  %v10773_v43 = vpack.c.bf16 %v7397_v50, %v7390_v36  ;;  %v7423_v28 = vand.u32 4294901760, %v14135_v7 }
 0xcfb   : > { %10724 = vmatprep.subr.bf16.mxu0 %v14743_v49  ;;  %v7452_v36 = vsub.f32 %v14144_v6, %v14557_v24  ;;  %v7446_v50 = vand.u32 4294901760, %v7445_v12 }
 0xcfc   : > { %10756 = vmatpush3.bf16.msra.mxu1 %v14103_v37  ;;  %v7424_v2 = vsub.f32 %v14135_v7, %v7423_v28 }
 0xcfd   : > { %10757 = vmatprep.subr.bf16.mxu1 %v14743_v49 }
 0xcfe   : > { %10726 = vmatpush3.bf16.msra.mxu0 %v13773_v32  ;;  %v7241_v32 = vld [vmem:[%s14350_s12 + $0x60] sm:$0xff] }
 0xcff   : > { %10727 = vmatprep.subr.bf16.mxu0 %v14743_v49 }
 0xd02   : > { %10729 = vmatpush3.bf16.msra.mxu0 %v13777_v48  ;;  %v7242_v48 = vld [vmem:[%s14350_s12 + $0x68] sm:$0xff] }
 0xd03   : > { %10730 = vmatprep.subr.bf16.mxu0 %v14743_v49 }
 0xd06   : > { %10732 = vmatpush3.bf16.msra.mxu0 %v13781_v20  ;;  %v7289_v20 = vand.u32 4294901760, %v7241_v32 }
 0xd07   : > { %10733 = vmatprep.subr.bf16.mxu0 %v14743_v49 }
 0xd08   : > { %v14137_v29 = vsub.f32 %v7241_v32, %v7289_v20  ;;  %v7403_v32 = vsub.f32 %v13973_v40, %v7402_v5 }
 0xd0a   : > { %10735 = vmatpush3.bf16.msra.mxu0 %v13792_v53  ;;  %v7292_v53 = vand.u32 4294901760, %v7242_v48 }
 0xd0b   : > { %10736 = vmatprep.subr.bf16.mxu0 %v14743_v49 }
 0xd0c   : > { %v14139_v59 = vsub.f32 %v7242_v48, %v7292_v53  ;;  %v7410_v48 = vsub.f32 %v13975_v44, %v7409_v8 }
 0xd0e   : > { %10738 = vmatpush3.bf16.msra.mxu0 %v13804_v30  ;;  %v14113_v30 = vpack.c.bf16 %v7292_v53, %v7289_v20  ;;  %v7404_v20 = vand.u32 4294901760, %v7403_v32  ;;  %v7411_v53 = vand.u32 4294901760, %v7410_v48  ;;  %v14559_v45 = vand.u32 4294901760, %v14139_v59 }
 0xd0f   : > { %v7453_v32 = vand.u32 4294901760, %v7452_v36 }
 0xd10   : > { %10759 = vmatpush3.bf16.msra.mxu1 %v14113_v30  ;;  %v10776_v35 = vpack.c.bf16 %v7411_v53, %v7404_v20  ;;  %v7438_v27 = vsub.f32 %v14139_v59, %v14559_v45  ;;  %v10788_v20 = vpack.c.bf16 %v13951_v31, %v13949_v55  ;;  %v10791_v53 = vpack.c.bf16 %v13960_v0, %v13953_v46 }
 0xd11   : > { %9549 = vmatmul.mubr.f32.vlgmr.msra.gmra.mrb[14].mxu0 %v13896_v11  ;;  %v7353_v11 = vand.u32 4294901760, %v13951_v31  ;;  %10760 = vmatprep.subr.bf16.mxu1 %v14743_v49  ;;  %v10785_v48 = vpack.c.bf16 %v7453_v32, %v7446_v50  ;;  %v10845_v0 = vpack.c.bf16 %v7395_v21, %v7388_v1  ;;  %v10848_v46 = vpack.c.bf16 %v7409_v8, %v7402_v5 }
 0xd12   : > { %v7439_v25 = vand.u32 4294901760, %v7438_v27  ;;  %v10809_v27 = vpack.c.bf16 %v14144_v6, %v14142_v10  ;;  %v14897_v55 = vand.u32 4294901760, %v14139_v59 }
 0xd13   : > { %v7354_v15 = vsub.f32 %v13951_v31, %v7353_v11  ;;  %v10842_v31 = vpack.c.bf16 %v7381_v41, %v7374_v16 }
 0xd14   : > { %10762 = vmatpush3.bf16.msra.mxu1 %v14125_v62 }
 0xd15   : > { %10763 = vmatprep.subr.bf16.mxu1 %v14743_v49  ;;  %v7355_v54 = vand.u32 4294901760, %v7354_v15  ;;  %v7418_v15 = vand.u32 4294901760, %v7417_v52  ;;  %v10794_v52 = vpack.c.bf16 %v13965_v23, %v13962_v47  ;;  %v10851_v23 = vpack.c.bf16 %v7423_v28, %v7416_v58 }
 0xd16   : > { %v14896_v47 = vand.u32 4294901760, %v14137_v29 }
 0xd17   : > { %v14149_v13 = vpack.c.bf16 %v7355_v54, %v7348_v9  ;;  %v7425_v9 = vand.u32 4294901760, %v7424_v2  ;;  %v14560_v54 = vand.u32 4294901760, %v14137_v29  ;;  %v10797_v2 = vpack.c.bf16 %v13971_v34, %v13969_v61 }
 0xd18   : > { %v10854_v61 = vpack.c.bf16 %v14897_v55, %v14896_v47  ;;  %v14898_v34 = vand.u32 4294901760, %v14142_v10 }
 0xd19   : > { %v10779_v33 = vpack.c.bf16 %v7425_v9, %v7418_v15  ;;  %v7431_v42 = vsub.f32 %v14137_v29, %v14560_v54  ;;  %v10800_v15 = vpack.c.bf16 %v13975_v44, %v13973_v40  ;;  %v10803_v9 = vpack.c.bf16 %v14135_v7, %v14133_v63 }
 0xd1a   : > { %v14899_v40 = vand.u32 4294901760, %v14144_v6 }
 0xd1b   : > { %v7432_v56 = vand.u32 4294901760, %v7431_v42  ;;  %v10806_v42 = vpack.c.bf16 %v14139_v59, %v14137_v29 }
 0xd1c   : > { %v10857_v44 = vpack.c.bf16 %v14899_v40, %v14898_v34 }
 0xd1d   : > { %v10782_v22 = vpack.c.bf16 %v7439_v25, %v7432_v56  ;;  %v7969_v56 = vld [vmem:[%s14349_s11] ss:$0 sm:$0xff] }
 0xde4   : > { %v7224_v25 = vpop.f32.mrb[14].mxu0 }
 0xde5   : > { %v10894_v12 = vadd.f32 %v7969_v56, %v7224_v25  ;;  %v9550_v36 = vpop.f32.mrb[15].mxu0 }
 0xde7   : > { %v7228_v50 = vmax.f32 %v10894_v12, 0.0 }
 0xde9   : > { %v14224_v32 = vand.u32 4294901760, %v7228_v50 }
 0xdeb   : > { %v7334_v24 = vsub.f32 %v7228_v50, %v14224_v32 }
 0xded   : > { %v7335_v17 = vand.u32 4294901760, %v7334_v24 }
 0xdef   : > { %v7336_v45 = vsub.f32 %v7334_v24, %v7335_v17 }
 0xdf1   : > { %v7337_v54 = vand.u32 4294901760, %v7336_v45 }
 0xdf3   : > { %9584 = vmatmul.mubr.f32.vlgmr.msra.gmra.mrb[10].mxu1 %v7337_v54 }
 0xdf4   : > { %10765 = vmatpush3.bf16.msra.mxu1 %v14149_v13  ;;  %9618 = vmatprep.mubr.msk.f32.mxu1 %vm11040_vm0, %v14744_v14  ;;  %v10836_v13 = vpack.c.bf16 %v7353_v11, %v7346_v3 }
 0xdf5   : > { %10766 = vmatprep.subr.bf16.mxu1 %v14743_v49 }
 0xdf8   : > { %10768 = vmatpush3.bf16.msra.mxu1 %v10767_v18  ;;  %v10839_v18 = vpack.c.bf16 %v7367_v4, %v7360_v39 }
 0xdf9   : > { %10769 = vmatprep.subr.bf16.mxu1 %v14743_v49 }
 0xdfc   : > { %10771 = vmatpush3.bf16.msra.mxu1 %v10770_v26 }
 0xdfd   : > { %10772 = vmatprep.subr.bf16.mxu1 %v14743_v49 }
 0xe00   : > { %10774 = vmatpush3.bf16.msra.mxu1 %v10773_v43 }
 0xe01   : > { %10775 = vmatprep.subr.bf16.mxu1 %v14743_v49 }
 0xe04   : > { %10777 = vmatpush3.bf16.msra.mxu1 %v10776_v35 }
 0xe05   : > { %10778 = vmatprep.subr.bf16.mxu1 %v14743_v49 }
 0xe08   : > { %10780 = vmatpush3.bf16.msra.mxu1 %v10779_v33 }
 0xe09   : > { %10781 = vmatprep.subr.bf16.mxu1 %v14743_v49 }
 0xe0c   : > { %10783 = vmatpush3.bf16.msra.mxu1 %v10782_v22 }
 0xe0d   : > { %10784 = vmatprep.subr.bf16.mxu1 %v14743_v49 }
 0xe10   : > { %10786 = vmatpush3.bf16.msra.mxu1 %v10785_v48 }
 0xe11   : > { %10787 = vmatprep.subr.bf16.mxu1 %v14743_v49 }
 0xe13   : > { %9619 = vmatmul.mubr.f32.vlgmr.msra.gmra.mrb[10].mxu1 %v14224_v32 }
 0xe14   : > { %10789 = vmatpush3.bf16.msra.mxu1 %v10788_v20  ;;  %9653 = vmatprep.mubr.msk.f32.mxu1 %vm11040_vm0, %v14744_v14 }
 0xe15   : > { %10790 = vmatprep.subr.bf16.mxu1 %v14743_v49 }
 0xe18   : > { %10792 = vmatpush3.bf16.msra.mxu1 %v10791_v53 }
 0xe19   : > { %10793 = vmatprep.subr.bf16.mxu1 %v14743_v49 }
 0xe1c   : > { %10795 = vmatpush3.bf16.msra.mxu1 %v10794_v52 }
 0xe1d   : > { %10796 = vmatprep.subr.bf16.mxu1 %v14743_v49 }
 0xe20   : > { %10798 = vmatpush3.bf16.msra.mxu1 %v10797_v2 }
 0xe21   : > { %10799 = vmatprep.subr.bf16.mxu1 %v14743_v49 }
 0xe24   : > { %10801 = vmatpush3.bf16.msra.mxu1 %v10800_v15 }
 0xe25   : > { %10802 = vmatprep.subr.bf16.mxu1 %v14743_v49 }
 0xe28   : > { %10804 = vmatpush3.bf16.msra.mxu1 %v10803_v9 }
 0xe29   : > { %10805 = vmatprep.subr.bf16.mxu1 %v14743_v49 }
 0xe2c   : > { %10807 = vmatpush3.bf16.msra.mxu1 %v10806_v42 }
 0xe2d   : > { %10808 = vmatprep.subr.bf16.mxu1 %v14743_v49 }
 0xe30   : > { %10810 = vmatpush3.bf16.msra.mxu1 %v10809_v27 }
 0xe31   : > { %10811 = vmatprep.subr.bf16.mxu1 %v14743_v49 }
 0xe33   : > { %9654 = vmatmul.mubr.f32.vlgmr.msra.gmra.mrb[10].mxu1 %v7334_v24 }
 0xe34   : > { %10813 = vmatpush3.bf16.msra.mxu1 %v13947_v38  ;;  %9688 = vmatprep.mubr.msk.f32.mxu1 %vm11040_vm0, %v14744_v14 }
 0xe35   : > { %10814 = vmatprep.subr.bf16.mxu1 %v14743_v49 }
 0xe38   : > { %10816 = vmatpush3.bf16.msra.mxu1 %v13958_v60 }
 0xe39   : > { %10817 = vmatprep.subr.bf16.mxu1 %v14743_v49 }
 0xe3c   : > { %10819 = vmatpush3.bf16.msra.mxu1 %v13981_v57 }
 0xe3d   : > { %10820 = vmatprep.subr.bf16.mxu1 %v14743_v49 }
 0xe40   : > { %10822 = vmatpush3.bf16.msra.mxu1 %v13989_v19 }
 0xe41   : > { %10823 = vmatprep.subr.bf16.mxu1 %v14743_v49 }
 0xe44   : > { %10825 = vmatpush3.bf16.msra.mxu1 %v13997_v51 }
 0xe45   : > { %10826 = vmatprep.subr.bf16.mxu1 %v14743_v49 }
 0xe48   : > { %10828 = vmatpush3.bf16.msra.mxu1 %v14103_v37 }
 0xe49   : > { %10829 = vmatprep.subr.bf16.mxu1 %v14743_v49 }
 0xe4c   : > { %10831 = vmatpush3.bf16.msra.mxu1 %v14113_v30 }
 0xe4d   : > { %10832 = vmatprep.subr.bf16.mxu1 %v14743_v49 }
 0xe50   : > { %10834 = vmatpush3.bf16.msra.mxu1 %v14125_v62 }
 0xe51   : > { %10835 = vmatprep.subr.bf16.mxu1 %v14743_v49 }
 0xe53   : > { %9689 = vmatmul.mubr.f32.vlgmr.msra.gmra.mrb[10].mxu1 %v7335_v17 }
 0xe54   : > { %10837 = vmatpush3.bf16.msra.mxu1 %v10836_v13  ;;  %9723 = vmatprep.mubr.msk.f32.mxu1 %vm11040_vm0, %v14744_v14 }
 0xe55   : > { %10838 = vmatprep.subr.bf16.mxu1 %v14743_v49 }
 0xe58   : > { %10840 = vmatpush3.bf16.msra.mxu1 %v10839_v18 }
 0xe59   : > { %10841 = vmatprep.subr.bf16.mxu1 %v14743_v49 }
 0xe5c   : > { %10843 = vmatpush3.bf16.msra.mxu1 %v10842_v31 }
 0xe5d   : > { %10844 = vmatprep.subr.bf16.mxu1 %v14743_v49 }
 0xe60   : > { %10846 = vmatpush3.bf16.msra.mxu1 %v10845_v0 }
 0xe61   : > { %10847 = vmatprep.subr.bf16.mxu1 %v14743_v49 }
 0xe64   : > { %10849 = vmatpush3.bf16.msra.mxu1 %v10848_v46 }
 0xe65   : > { %10850 = vmatprep.subr.bf16.mxu1 %v14743_v49 }
 0xe68   : > { %10852 = vmatpush3.bf16.msra.mxu1 %v10851_v23 }
 0xe69   : > { %10853 = vmatprep.subr.bf16.mxu1 %v14743_v49 }
 0xe6c   : > { %10855 = vmatpush3.bf16.msra.mxu1 %v10854_v61 }
 0xe6d   : > { %10856 = vmatprep.subr.bf16.mxu1 %v14743_v49 }
 0xe70   : > { %10858 = vmatpush3.bf16.msra.mxu1 %v10857_v44 }
 0xe71   : > { %10859 = vmatprep.subr.bf16.mxu1 %v14743_v49 }
 0xe73   : > { %9724 = vmatmul.mubr.f32.vlgmr.msra.gmra.mrb[10].mxu1 %v14224_v32 }
 0xe74   : > { %10861 = vmatpush3.bf16.msra.mxu1 %v13947_v38  ;;  %9758 = vmatprep.mubr.msk.f32.mxu1 %vm11040_vm0, %v14744_v14  ;;  %v7970_v14 = vld [vmem:[%s14351_s13] ss:$0 sm:$0xff] }
 0xe75   : > { %10862 = vmatprep.subr.bf16.mxu1 %v14743_v49 }
 0xe78   : > { %10864 = vmatpush3.bf16.msra.mxu1 %v13958_v60 }
 0xe79   : > { %10865 = vmatprep.subr.bf16.mxu1 %v14743_v49 }
 0xe7c   : > { %10867 = vmatpush3.bf16.msra.mxu1 %v13981_v57 }
 0xe7d   : > { %10868 = vmatprep.subr.bf16.mxu1 %v14743_v49 }
 0xe80   : > { %10870 = vmatpush3.bf16.msra.mxu1 %v13989_v19 }
 0xe81   : > { %10871 = vmatprep.subr.bf16.mxu1 %v14743_v49 }
 0xe84   : > { %10873 = vmatpush3.bf16.msra.mxu1 %v13997_v51 }
 0xe85   : > { %10874 = vmatprep.subr.bf16.mxu1 %v14743_v49 }
 0xe88   : > { %10876 = vmatpush3.bf16.msra.mxu1 %v14103_v37 }
 0xe89   : > { %10877 = vmatprep.subr.bf16.mxu1 %v14743_v49 }
 0xe8c   : > { %10879 = vmatpush3.bf16.msra.mxu1 %v14113_v30 }
 0xe8d   : > { %10880 = vmatprep.subr.bf16.mxu1 %v14743_v49 }
 0xe90   : > { %10882 = vmatpush3.bf16.msra.mxu1 %v14125_v62 }
 0xe93   : > { %9759 = vmatmul.mubr.f32.vlgmr.msra.gmra.mrb[10].mxu1 %v14224_v32 }
 0xf66   : > { %v7889_v60 = vpop.f32.mrb[10].mxu1 }
 0xf67   : > { %v10895_v38 = vadd.f32 %v7970_v14, %v7889_v60  ;;  %v9760_v57 = vpop.f32.mrb[11].mxu1 }
 0xf69   : > { %7893 = vst [vmem:[%s479_s19] sm:$0xff] %v10895_v38 }
 0xf6a PF: > { %s24_s29 = sadd.s32 1, %s11037_s29  }
 0xf6b   : > { %p21_p4 = scmp.ge.s32.totalorder %s24_s29, 4  }
 0xf6d   :  { %23 = sbr.rel (!%p21_p4) target bundleno = 1 (0x1), region = 109 }

</bundles_post_ra>
